<compile_context>
chip_gen: v5e
topology: v5e:2x2
jax: 0.10.0
libtpu: 0.0.40
codegen_flags: <defaults>
</compile_context>

<pallas_src>
import functools

import jax
import jax.numpy as jnp
import numpy as np
from jax.experimental import pallas as pl
from jax.experimental.pallas import tpu as pltpu


def _rpn_kernel(x_ref, wc_ref, bc_ref, wh_ref, bh_ref, out_ref, *,
                num_anchor, w_padded, m_tile):
    """One grid step == one batch element x one band of `m_tile` virtual pixels.

    x_ref  : (1, (Hp+3)*(W+2), Cin)  flattened zero-padded NHWC image (VMEM-resident)
    wc_ref : (9*Cin, 512) bf16       packed 3x3 conv weights
    bc_ref : (1, 512) f32
    wh_ref : (512, P) bf16           fused [cls | loc | 0-pad] 1x1 head weights (P=128*ceil(6k/128))
    bh_ref : (1, P) f32
    out_ref: (1, m_tile, P) f32      [prob(2k) | loc(4k) | 0-pad] per virtual pixel
    """
    k = num_anchor
    r = pl.program_id(1)
    q0 = pl.multiple_of(r * m_tile, 8)          # first virtual pixel of this tile

    # Build the 3x3 im2col patch on-chip: tap (dy, dx) for virtual pixel q lives at
    # flat row q + dy*(W+2) + dx of the padded image.  All slices are contiguous.
    taps = []
    for dy in range(3):
        for dx in range(3):
            off = dy * w_padded + dx
            taps.append(x_ref[0, pl.ds(q0 + off, m_tile), :].astype(jnp.bfloat16))
    patch = jnp.concatenate(taps, axis=-1)      # (m_tile, 9*Cin) bf16

    # 3x3 conv == one fused MXU matmul with K = 9*Cin, f32 accumulation.
    feat = jnp.dot(patch, wc_ref[...], preferred_element_type=jnp.float32)
    feat = jnp.maximum(feat + bc_ref[...], 0.0)                      # ReLU, (m_tile, 512) f32

    # Fused cls+loc 1x1 heads: one matmul into a lane-dense 128-wide slab.
    head = jnp.dot(feat.astype(jnp.bfloat16), wh_ref[...],
                   preferred_element_type=jnp.float32) + bh_ref[...]  # (m_tile, P) f32

    # 2-way softmax over channel pairs (c, c+k) of the cls logits (lanes [0, 2k)).
    p0 = head[:, :k]
    p1 = head[:, k:2 * k]
    m = jnp.maximum(p0, p1)
    e0 = jnp.exp(p0 - m)
    e1 = jnp.exp(p1 - m)
    inv = pl.reciprocal(e0 + e1, approx=True)

    # One dense 128-lane store, then overwrite the logit lanes with the probabilities
    # via slice stores (raw logits are not needed in eval and are never written to HBM
    # as a separate output).
    out_ref[0] = head.astype(out_ref.dtype)
    out_ref[0, :, :k] = (e0 * inv).astype(out_ref.dtype)
    out_ref[0, :, k:2 * k] = (e1 * inv).astype(out_ref.dtype)


def rpn_forward(x_nchw, gt_boxes, im_info, params, num_anchor, *,
                mid_channels=512, tile_rows=8):
    """Pallas implementation of RPN.forward (eval phase)."""
    del gt_boxes  # only used by the (external) AnchorMatchLayer during training
    del im_info   # only used by the (external) ProposalLayer
    n, cin, h, w = x_nchw.shape
    k = num_anchor
    assert tile_rows % 8 == 0, "tile_rows must keep the pixel tile 8-row aligned"

    wp = w + 2                                              # padded width
    hp = ((h + tile_rows - 1) // tile_rows) * tile_rows     # rows padded to tile multiple
    m_tile = tile_rows * wp                                 # virtual pixels per grid step
    p = ((6 * k + 127) // 128) * 128                        # lane-dense head width
    q_in = (hp + 3) * wp                                    # padded-image flat rows
    q_out = hp * wp                                         # virtual output rows

    # ---- glue (plain JAX): NCHW -> NHWC, zero-pad (conv pad=1 + tile slack), flatten ----
    x = jnp.transpose(x_nchw, (0, 2, 3, 1))                             # (N, H, W, Cin)
    xpad = jnp.pad(x, ((0, 0), (1, hp - h + 2), (1, 1), (0, 0)))        # (N, Hp+3, W+2, Cin)
    x_flat = xpad.reshape(n, q_in, cin).astype(jnp.float32)             # (N, (Hp+3)*(W+2), Cin)

    # ---- pack torch-layout weights for the fused matmuls (bf16 for the MXU) ----
    # rpn_conv weight (512, Cin, 3, 3) -> (ky, kx, Cin, 512) -> (9*Cin, 512)
    w_conv = jnp.transpose(params["w_conv"], (2, 3, 1, 0)).reshape(9 * cin, mid_channels)
    w_conv = w_conv.astype(jnp.bfloat16)
    b_conv = params["b_conv"].reshape(1, mid_channels).astype(jnp.float32)
    # pred_cls (2k,512,1,1) / pred_loc (4k,512,1,1) -> fused (512, P) with zero lane pad
    w_cls = params["w_cls"].reshape(2 * k, mid_channels).T
    w_loc = params["w_loc"].reshape(4 * k, mid_channels).T
    w_head = jnp.zeros((mid_channels, p), jnp.float32)
    w_head = w_head.at[:, :2 * k].set(w_cls).at[:, 2 * k:6 * k].set(w_loc)
    w_head = w_head.astype(jnp.bfloat16)
    b_head = jnp.zeros((1, p), jnp.float32)
    b_head = b_head.at[0, :2 * k].set(params["b_cls"]).at[0, 2 * k:6 * k].set(params["b_loc"])

    grid = (n, hp // tile_rows)
    out = pl.pallas_call(
        functools.partial(_rpn_kernel, num_anchor=k, w_padded=wp, m_tile=m_tile),
        out_shape=jax.ShapeDtypeStruct((n, q_out, p), jnp.float32),
        grid_spec=pltpu.PrefetchScalarGridSpec(
            num_scalar_prefetch=0,
            grid=grid,
            in_specs=[
                # full padded image stays VMEM-resident across the row-tile axis
                pl.BlockSpec((1, q_in, cin), lambda b, r: (b, 0, 0)),
                pl.BlockSpec((9 * cin, mid_channels), lambda b, r: (0, 0)),
                pl.BlockSpec((1, mid_channels), lambda b, r: (0, 0)),
                pl.BlockSpec((mid_channels, p), lambda b, r: (0, 0)),
                pl.BlockSpec((1, p), lambda b, r: (0, 0)),
            ],
            out_specs=pl.BlockSpec((1, m_tile, p), lambda b, r: (b, r, 0)),
        ),
        compiler_params=pltpu.CompilerParams(
            dimension_semantics=("parallel", "parallel")),
    )(x_flat, w_conv, b_conv, w_head, b_head)

    # ---- glue: drop the padded virtual pixels, back to PyTorch NCHW convention ----
    out = out.reshape(n, hp, wp, p)[:, :h, :w, :]
    pred_prob = jnp.transpose(out[..., :2 * k], (0, 3, 1, 2))      # (N, 2k, H, W)
    pred_loc = jnp.transpose(out[..., 2 * k:6 * k], (0, 3, 1, 2))  # (N, 4k, H, W)

    # TODO(synk): ProposalLayer (anchor gen + bbox decode + NMS) has no clean Pallas
    #             equivalent; return its dense inputs instead.
    proposals = (pred_prob, pred_loc)
    rpn_cls_loss = jnp.float32(0.0)
    rpn_loc_loss = jnp.float32(0.0)
    return proposals, rpn_cls_loss, rpn_loc_loss


def init_rpn_params(key, base_net_out_dim, num_anchor, mid_channels=512):
    """Deterministic synthetic parameters in the torch conv layouts."""
    k1, k2, k3, k4, k5, k6 = jax.random.split(key, 6)
    s = 0.01
    return {
        "w_conv": s * jax.random.normal(k1, (mid_channels, base_net_out_dim, 3, 3), jnp.float32),
        "b_conv": s * jax.random.normal(k4, (mid_channels,), jnp.float32),
        "w_cls": s * jax.random.normal(k2, (2 * num_anchor, mid_channels, 1, 1), jnp.float32),
        "b_cls": s * jax.random.normal(k5, (2 * num_anchor,), jnp.float32),
        "w_loc": s * jax.random.normal(k3, (4 * num_anchor, mid_channels, 1, 1), jnp.float32),
        "b_loc": s * jax.random.normal(k6, (4 * num_anchor,), jnp.float32),
    }


def rpn_reference(x_nchw, params, num_anchor):
    """Pure-JAX reference of the dense forward path (f32)."""
    feat = jax.lax.conv_general_dilated(
        x_nchw, params["w_conv"], window_strides=(1, 1), padding=((1, 1), (1, 1)),
        dimension_numbers=("NCHW", "OIHW", "NCHW"))
    feat = jnp.maximum(feat + params["b_conv"][None, :, None, None], 0.0)
    cls = jnp.einsum("nchw,oc->nohw", feat, params["w_cls"][:, :, 0, 0])
    cls = cls + params["b_cls"][None, :, None, None]
    loc = jnp.einsum("nchw,oc->nohw", feat, params["w_loc"][:, :, 0, 0])
    loc = loc + params["b_loc"][None, :, None, None]
    n, _, h, w = cls.shape
    k = num_anchor
    prob = jax.nn.softmax(cls.reshape(n, 2, k, h, w), axis=1).reshape(n, 2 * k, h, w)
    return prob, loc


if __name__ == "__main__":
    # cfg (synthetic): anchor_scales=[8,16,32], anchor_ratios=[0.5,1,2] -> num_anchor=9
    anchor_scales = (8, 16, 32)
    anchor_ratios = (0.5, 1.0, 2.0)
    num_anchor = len(anchor_scales) * len(anchor_ratios)

    N, CIN, H, W = 2, 32, 16, 16  # small base-net feature map
    key = jax.random.PRNGKey(0)
    kx, kp = jax.random.split(key)

    x = jax.random.normal(kx, (N, CIN, H, W), jnp.float32)
    gt_boxes = jnp.zeros((N, 4, 5), jnp.float32)   # unused in eval phase
    im_info = jnp.array([[H * 16.0, W * 16.0, 1.0]] * N, jnp.float32)
    params = init_rpn_params(kp, CIN, num_anchor)

    (pred_prob, pred_loc), cls_loss, loc_loss = rpn_forward(
        x, gt_boxes, im_info, params, num_anchor)
    jax.block_until_ready((pred_prob, pred_loc, cls_loss, loc_loss))

    assert pred_prob.shape == (N, 2 * num_anchor, H, W)
    assert pred_loc.shape == (N, 4 * num_anchor, H, W)

    # correctness check against the pure-JAX f32 reference (kernel matmuls are bf16).
    prob_ref, loc_ref = rpn_reference(x, params, num_anchor)
    np.testing.assert_allclose(np.asarray(pred_prob), np.asarray(prob_ref), rtol=0, atol=5e-3)
    np.testing.assert_allclose(np.asarray(pred_loc), np.asarray(loc_ref), rtol=0, atol=1e-2)

    print("KERNEL_OK")
</pallas_src>

<mosaic_0001>
module attributes {stable_mosaic.version = 11 : i64} {
  func.func @_rpn_kernel(%arg0: i32, %arg1: i32, %arg2: memref<1x342x32xf32, #tpu.memory_space<vmem>>, %arg3: memref<288x512xbf16, #tpu.memory_space<vmem>>, %arg4: memref<1x512xf32, #tpu.memory_space<vmem>>, %arg5: memref<512x128xbf16, #tpu.memory_space<vmem>>, %arg6: memref<1x128xf32, #tpu.memory_space<vmem>>, %arg7: memref<1x144x128xf32, #tpu.memory_space<vmem>>) attributes {dimension_semantics = [#tpu.dimension_semantics<parallel>, #tpu.dimension_semantics<parallel>], iteration_bounds = array<i64: 2, 2>, scalar_prefetch = 0 : i64, scratch_operands = 0 : i64, tpu.core_type = #tpu.core_type<tc>, window_params = [{transform_indices = @transform_0, window_bounds = array<i64: 1, 342, 32>}, {pipeline_mode = #tpu.pipeline_mode<synchronous>, transform_indices = @transform_1, window_bounds = array<i64: 288, 512>}, {pipeline_mode = #tpu.pipeline_mode<synchronous>, transform_indices = @transform_2, window_bounds = array<i64: 1, 512>}, {pipeline_mode = #tpu.pipeline_mode<synchronous>, transform_indices = @transform_3, window_bounds = array<i64: 512, 128>}, {pipeline_mode = #tpu.pipeline_mode<synchronous>, transform_indices = @transform_4, window_bounds = array<i64: 1, 128>}, {transform_indices = @transform_5, window_bounds = array<i64: 1, 144, 128>}]} {
    %c144_i32 = arith.constant 144 : i32
    %0 = arith.muli %arg1, %c144_i32 : i32
    %1 = tpu.assume_multiple %0, 8 : i32
    %c0_i32 = arith.constant 0 : i32
    %2 = arith.addi %1, %c0_i32 : i32
    %c0 = arith.constant 0 : index
    %3 = arith.index_cast %2 : i32 to index
    %c0_0 = arith.constant 0 : index
    %4 = vector.load %arg2[%c0, %3, %c0_0] : memref<1x342x32xf32, #tpu.memory_space<vmem>>, vector<1x144x32xf32>
    %5 = vector.shape_cast %4 : vector<1x144x32xf32> to vector<144x32xf32>
    %6 = arith.truncf %5 : vector<144x32xf32> to vector<144x32xbf16>
    %c1_i32 = arith.constant 1 : i32
    %7 = arith.addi %1, %c1_i32 : i32
    %c0_1 = arith.constant 0 : index
    %8 = arith.index_cast %7 : i32 to index
    %c0_2 = arith.constant 0 : index
    %9 = vector.load %arg2[%c0_1, %8, %c0_2] : memref<1x342x32xf32, #tpu.memory_space<vmem>>, vector<1x144x32xf32>
    %10 = vector.shape_cast %9 : vector<1x144x32xf32> to vector<144x32xf32>
    %11 = arith.truncf %10 : vector<144x32xf32> to vector<144x32xbf16>
    %c2_i32 = arith.constant 2 : i32
    %12 = arith.addi %1, %c2_i32 : i32
    %c0_3 = arith.constant 0 : index
    %13 = arith.index_cast %12 : i32 to index
    %c0_4 = arith.constant 0 : index
    %14 = vector.load %arg2[%c0_3, %13, %c0_4] : memref<1x342x32xf32, #tpu.memory_space<vmem>>, vector<1x144x32xf32>
    %15 = vector.shape_cast %14 : vector<1x144x32xf32> to vector<144x32xf32>
    %16 = arith.truncf %15 : vector<144x32xf32> to vector<144x32xbf16>
    %c18_i32 = arith.constant 18 : i32
    %17 = arith.addi %1, %c18_i32 : i32
    %c0_5 = arith.constant 0 : index
    %18 = arith.index_cast %17 : i32 to index
    %c0_6 = arith.constant 0 : index
    %19 = vector.load %arg2[%c0_5, %18, %c0_6] : memref<1x342x32xf32, #tpu.memory_space<vmem>>, vector<1x144x32xf32>
    %20 = vector.shape_cast %19 : vector<1x144x32xf32> to vector<144x32xf32>
    %21 = arith.truncf %20 : vector<144x32xf32> to vector<144x32xbf16>
    %c19_i32 = arith.constant 19 : i32
    %22 = arith.addi %1, %c19_i32 : i32
    %c0_7 = arith.constant 0 : index
    %23 = arith.index_cast %22 : i32 to index
    %c0_8 = arith.constant 0 : index
    %24 = vector.load %arg2[%c0_7, %23, %c0_8] : memref<1x342x32xf32, #tpu.memory_space<vmem>>, vector<1x144x32xf32>
    %25 = vector.shape_cast %24 : vector<1x144x32xf32> to vector<144x32xf32>
    %26 = arith.truncf %25 : vector<144x32xf32> to vector<144x32xbf16>
    %c20_i32 = arith.constant 20 : i32
    %27 = arith.addi %1, %c20_i32 : i32
    %c0_9 = arith.constant 0 : index
    %28 = arith.index_cast %27 : i32 to index
    %c0_10 = arith.constant 0 : index
    %29 = vector.load %arg2[%c0_9, %28, %c0_10] : memref<1x342x32xf32, #tpu.memory_space<vmem>>, vector<1x144x32xf32>
    %30 = vector.shape_cast %29 : vector<1x144x32xf32> to vector<144x32xf32>
    %31 = arith.truncf %30 : vector<144x32xf32> to vector<144x32xbf16>
    %c36_i32 = arith.constant 36 : i32
    %32 = arith.addi %1, %c36_i32 : i32
    %c0_11 = arith.constant 0 : index
    %33 = arith.index_cast %32 : i32 to index
    %c0_12 = arith.constant 0 : index
    %34 = vector.load %arg2[%c0_11, %33, %c0_12] : memref<1x342x32xf32, #tpu.memory_space<vmem>>, vector<1x144x32xf32>
    %35 = vector.shape_cast %34 : vector<1x144x32xf32> to vector<144x32xf32>
    %36 = arith.truncf %35 : vector<144x32xf32> to vector<144x32xbf16>
    %c37_i32 = arith.constant 37 : i32
    %37 = arith.addi %1, %c37_i32 : i32
    %c0_13 = arith.constant 0 : index
    %38 = arith.index_cast %37 : i32 to index
    %c0_14 = arith.constant 0 : index
    %39 = vector.load %arg2[%c0_13, %38, %c0_14] : memref<1x342x32xf32, #tpu.memory_space<vmem>>, vector<1x144x32xf32>
    %40 = vector.shape_cast %39 : vector<1x144x32xf32> to vector<144x32xf32>
    %41 = arith.truncf %40 : vector<144x32xf32> to vector<144x32xbf16>
    %c38_i32 = arith.constant 38 : i32
    %42 = arith.addi %1, %c38_i32 : i32
    %c0_15 = arith.constant 0 : index
    %43 = arith.index_cast %42 : i32 to index
    %c0_16 = arith.constant 0 : index
    %44 = vector.load %arg2[%c0_15, %43, %c0_16] : memref<1x342x32xf32, #tpu.memory_space<vmem>>, vector<1x144x32xf32>
    %45 = vector.shape_cast %44 : vector<1x144x32xf32> to vector<144x32xf32>
    %46 = arith.truncf %45 : vector<144x32xf32> to vector<144x32xbf16>
    %47 = tpu.concatenate %6, %11, %16, %21, %26, %31, %36, %41, %46 in 1 : vector<144x32xbf16>, vector<144x32xbf16>, vector<144x32xbf16>, vector<144x32xbf16>, vector<144x32xbf16>, vector<144x32xbf16>, vector<144x32xbf16>, vector<144x32xbf16>, vector<144x32xbf16> -> vector<144x288xbf16>
    %c0_17 = arith.constant 0 : index
    %c0_18 = arith.constant 0 : index
    %48 = vector.load %arg3[%c0_17, %c0_18] : memref<288x512xbf16, #tpu.memory_space<vmem>>, vector<288x512xbf16>
    %cst = arith.constant dense<0.000000e+00> : vector<144x512xf32>
    %49 = tpu.matmul %47, %48, %cst {dimension_numbers = #tpu.dot_dimension_numbers<[1], [0], [0], [1], [0, 0, 1, 1], [], []>} : vector<144x288xbf16>, vector<288x512xbf16>, vector<144x512xf32> -> vector<144x512xf32>
    %c0_19 = arith.constant 0 : index
    %c0_20 = arith.constant 0 : index
    %50 = vector.load %arg4[%c0_19, %c0_20] : memref<1x512xf32, #tpu.memory_space<vmem>>, vector<1x512xf32>
    %51 = vector.broadcast %50 : vector<1x512xf32> to vector<144x512xf32>
    %52 = arith.addf %49, %51 : vector<144x512xf32>
    %cst_21 = arith.constant 0.000000e+00 : f32
    %53 = vector.broadcast %cst_21 : f32 to vector<144x512xf32>
    %54 = arith.maximumf %52, %53 : vector<144x512xf32>
    %55 = arith.truncf %54 : vector<144x512xf32> to vector<144x512xbf16>
    %c0_22 = arith.constant 0 : index
    %c0_23 = arith.constant 0 : index
    %56 = vector.load %arg5[%c0_22, %c0_23] : memref<512x128xbf16, #tpu.memory_space<vmem>>, vector<512x128xbf16>
    %cst_24 = arith.constant dense<0.000000e+00> : vector<144x128xf32>
    %57 = tpu.matmul %55, %56, %cst_24 {dimension_numbers = #tpu.dot_dimension_numbers<[1], [0], [0], [1], [0, 0, 1, 1], [], []>} : vector<144x512xbf16>, vector<512x128xbf16>, vector<144x128xf32> -> vector<144x128xf32>
    %c0_25 = arith.constant 0 : index
    %c0_26 = arith.constant 0 : index
    %58 = vector.load %arg6[%c0_25, %c0_26] : memref<1x128xf32, #tpu.memory_space<vmem>>, vector<1x128xf32>
    %59 = vector.broadcast %58 : vector<1x128xf32> to vector<144x128xf32>
    %60 = arith.addf %57, %59 : vector<144x128xf32>
    %61 = vector.extract_strided_slice %60 {offsets = [0, 0], sizes = [144, 9], strides = [1, 1]} : vector<144x128xf32> to vector<144x9xf32>
    %62 = vector.extract_strided_slice %60 {offsets = [0, 9], sizes = [144, 9], strides = [1, 1]} : vector<144x128xf32> to vector<144x9xf32>
    %63 = arith.maximumf %61, %62 : vector<144x9xf32>
    %64 = arith.subf %61, %63 : vector<144x9xf32>
    %65 = math.exp %64 : vector<144x9xf32>
    %66 = arith.subf %62, %63 : vector<144x9xf32>
    %67 = math.exp %66 : vector<144x9xf32>
    %68 = arith.addf %65, %67 : vector<144x9xf32>
    %69 = tpu.reciprocal %68 {approx = true} : vector<144x9xf32> -> vector<144x9xf32>
    %c0_27 = arith.constant 0 : index
    %c0_28 = arith.constant 0 : index
    %c0_29 = arith.constant 0 : index
    %70 = vector.load %arg7[%c0_27, %c0_28, %c0_29] : memref<1x144x128xf32, #tpu.memory_space<vmem>>, vector<1x144x128xf32>
    %71 = vector.shape_cast %70 : vector<1x144x128xf32> to vector<144x128xf32>
    %72 = vector.shape_cast %60 : vector<144x128xf32> to vector<1x144x128xf32>
    tpu.vector_store %arg7[%c0_27, %c0_28, %c0_29], %72 {strides = array<i32>} : memref<1x144x128xf32, #tpu.memory_space<vmem>>, vector<1x144x128xf32>,
    %73 = arith.mulf %65, %69 : vector<144x9xf32>
    %c0_30 = arith.constant 0 : index
    %c0_31 = arith.constant 0 : index
    %c0_32 = arith.constant 0 : index
    %74 = vector.load %arg7[%c0_30, %c0_31, %c0_32] : memref<1x144x128xf32, #tpu.memory_space<vmem>>, vector<1x144x9xf32>
    %75 = vector.shape_cast %74 : vector<1x144x9xf32> to vector<144x9xf32>
    %76 = vector.shape_cast %73 : vector<144x9xf32> to vector<1x144x9xf32>
    tpu.vector_store %arg7[%c0_30, %c0_31, %c0_32], %76 {strides = array<i32>} : memref<1x144x128xf32, #tpu.memory_space<vmem>>, vector<1x144x9xf32>,
    %77 = arith.mulf %67, %69 : vector<144x9xf32>
    %c0_33 = arith.constant 0 : index
    %c0_34 = arith.constant 0 : index
    %c9 = arith.constant 9 : index
    %78 = vector.load %arg7[%c0_33, %c0_34, %c9] : memref<1x144x128xf32, #tpu.memory_space<vmem>>, vector<1x144x9xf32>
    %79 = vector.shape_cast %78 : vector<1x144x9xf32> to vector<144x9xf32>
    %80 = vector.shape_cast %77 : vector<144x9xf32> to vector<1x144x9xf32>
    tpu.vector_store %arg7[%c0_33, %c0_34, %c9], %80 {strides = array<i32>} : memref<1x144x128xf32, #tpu.memory_space<vmem>>, vector<1x144x9xf32>,
    return
  }
  func.func @transform_0(%arg0: i32, %arg1: i32) -> (i32, i32, i32) {
    %c0_i32 = arith.constant 0 : i32
    %c0_i32_0 = arith.constant 0 : i32
    %c0_i32_1 = arith.constant 0 : i32
    return %arg0, %c0_i32, %c0_i32_0 : i32, i32, i32
  }
  func.func @transform_1(%arg0: i32, %arg1: i32) -> (i32, i32) {
    %c0_i32 = arith.constant 0 : i32
    %c0_i32_0 = arith.constant 0 : i32
    %c0_i32_1 = arith.constant 0 : i32
    return %c0_i32, %c0_i32_0 : i32, i32
  }
  func.func @transform_2(%arg0: i32, %arg1: i32) -> (i32, i32) {
    %c0_i32 = arith.constant 0 : i32
    %c0_i32_0 = arith.constant 0 : i32
    %c0_i32_1 = arith.constant 0 : i32
    return %c0_i32, %c0_i32_0 : i32, i32
  }
  func.func @transform_3(%arg0: i32, %arg1: i32) -> (i32, i32) {
    %c0_i32 = arith.constant 0 : i32
    %c0_i32_0 = arith.constant 0 : i32
    %c0_i32_1 = arith.constant 0 : i32
    return %c0_i32, %c0_i32_0 : i32, i32
  }
  func.func @transform_4(%arg0: i32, %arg1: i32) -> (i32, i32) {
    %c0_i32 = arith.constant 0 : i32
    %c0_i32_0 = arith.constant 0 : i32
    %c0_i32_1 = arith.constant 0 : i32
    return %c0_i32, %c0_i32_0 : i32, i32
  }
  func.func @transform_5(%arg0: i32, %arg1: i32) -> (i32, i32, i32) {
    %c0_i32 = arith.constant 0 : i32
    %c0_i32_0 = arith.constant 0 : i32
    return %arg0, %arg1, %c0_i32 : i32, i32, i32
  }
}

</mosaic_0001>

<bundles_post_ra>
// kernel: tpu_custom_call.1
= control target key start
LH: loop header
LB: loop body
LE: loop exit
PB: predicated region body
PF: predicated region fallthrough
CT: control target
= control target key end

     0   :  { %s6511_s0 = inlined_call_operand.vmem [shape: f32[2,342,32], index: 0, kind: input, shape index: {}]   ;;  %s6512_s1 = inlined_call_operand.vmem [shape: bf16[288,512], index: 1, kind: input, shape index: {}]   ;;  %s6513_s2 = inlined_call_operand.vmem [shape: f32[1,512], index: 2, kind: input, shape index: {}]   ;;  %s6514_s3 = inlined_call_operand.vmem [shape: bf16[512,128], index: 3, kind: input, shape index: {}]   ;;  %s6515_s4 = inlined_call_operand.vmem [shape: f32[1,128], index: 4, kind: input, shape index: {}]   ;;  %s6516_s5 = inlined_call_operand.hbm [shape: f32[2,288,128], index: 5, kind: output, shape index: {}]  }
   0x1   :  { %6530 = sst [smem:[#allocation17_spill]] %s6511_s0 }
   0x2   :  { %10 = vsyncpa [#allocation3], 0 }
   0x3   :  { %12 = vsyncpa [#allocation3 + $0x1], 0  ;;  %s4637_s18 = smov 0   ;;  %s4639_s19 = smov 0  }
   0x4   :  { %s4641_s20 = smov 0   ;;  %s4643_s21 = smov 0  }
   0x5   :  { %s4645_s22 = smov 0   ;;  %s4647_s23 = smov 0  }
   0x6   :  { %s4649_s24 = smov 0   ;;  %s4651_s25 = smov 0  }
   0x7 LB: > { %s3604_s26 = sadd.s32 4294967295, %s4598_s25   ;;  %s3605_s27 = sadd.s32 4294967294, %s4598_s25   ;;  %s4598_s25 = sphi %s4651_s25, %s18_s25   ;;  %s4594_s24 = sphi %s4649_s24, %s6567_s24   ;;  %s4590_s23 = sphi %s4647_s23, %s6566_s23   ;;  %s4586_s22 = sphi %s4645_s22, %s6565_s22   ;;  %s4582_s21 = sphi %s4643_s21, %s6564_s21   ;;  %s4578_s20 = sphi %s4641_s20, %s6563_s20   ;;  %s4574_s19 = sphi %s4639_s19, %s6562_s19   ;;  %s4570_s18 = sphi %s4637_s18, %s6561_s18  }
   0x8   : > { %s27_s28 = sadd.s32 1, %s4590_s23  ;;  %s30_s29 = sadd.s32 1, %s4594_s24 }
   0x9   : > { %p28_p0 = scmp.ge.s32.totalorder %s27_s28, 2  ;;  %p159_p1 = scmp.ne.s32.totalorder %s4578_s20, %s4574_s19 }
   0xa   : > { %p160_p2 = scmp.eq.s32.totalorder %s3604_s26, 3  ;;  %p165_p5 = scmp.ne.s32.totalorder %s4574_s19, %s4570_s18 }
   0xb   : > { %s6569_s28 = smov (%p28_p0, %s27_s28), 0  ;;  %s6571_s29 = smov (!%p28_p0, %s30_s29), %s4594_s24 }
   0xc   : > { %s145_s30 = ssub.s32 %s4590_s23, %s6569_s28  ;;  %p4688_p3 = por %p160_p2, %p159_p1 }
   0xd   : > { %p32_p4 = scmp.ge.s32.totalorder %s6571_s29, 2  ;;  %p166_p6 = scmp.eq.s32.totalorder %s3605_s27, 3 }
   0xe   : > { %p3608_p7 = scmp.ge.s32.totalorder %s4598_s25, 1  ;;  %p204_p9 = scmp.lt.s32.totalorder %s4598_s25, 5 }
   0xf   : > { %s6573_s29 = smov (%p32_p4, %s6571_s29), 0  ;;  %p4697_p8 = por %p166_p6, %p165_p5 }
  0x10   : > { %6532 = sst [smem:[#allocation5_spill]] %s6573_s29  ;;  %s144_s8 = ssub.s32 %s4594_s24, %s6573_s29 }
  0x11   : > { %s149_s9 = sadd.s32 1, %s4578_s20  ;;  %s146_s10 = sor.u32 %s145_s30, %s144_s8 }
  0x12   : > { %p205_p10 = pnand %p3608_p7, %p204_p9  ;;  %p147_p11 = scmp.eq.s32.totalorder %s146_s10, 0 }
  0x14   : > { %s4706_s11 = scalar_select %p147_p11, %s4578_s20, %s149_s9  }
  0x15   : > { %208 = sbr.rel (%p205_p10) target bundleno = 1352 (0x548), region = 40 }
  0x1a   : > { %v4028_v0 = vld [vmem:[%s6512_s1 + $0x220] sm:$0xf]  ;;  %v4279_v1 = vld [vmem:[%s6512_s1 + $0x22c] sm:$0xf0]  ;;  %p232_p12 = scmp.lt.s32.totalorder %s4586_s22, 1  ;;  %s239_s8 = smul.u32 144, %s4582_s21 }
  0x1b   : > { %v4012_v2 = vld [vmem:[%s6512_s1 + $0x200] sm:$0xf]  ;;  %v4029_v3 = vor.u32 %v4279_v1, %v4028_v0  ;;  %v4275_v4 = vld [vmem:[%s6512_s1 + $0x20c] sm:$0xf0]  ;;  %s6534_s0 = sld [smem:[#allocation17_spill]]  ;;  %vm1094_vm0 = vcmask 261120  }
  0x1c   : > { %v4013_v5 = vor.u32 %v4275_v4, %v4012_v2  ;;  %s233_s30 = scalar_select %p232_p12, %s4586_s22, 1  ;;  %vm1122_vm1 = vcmask 523264   ;;  %vm1141_vm2 = vcmask 785408   ;;  %vm3356_vm3 = vcmask 72704  }
  0x1d   : > { %1824 = vmatpush.bf16.msra.mxu2 %v4029_v3  ;;  %s6521_s15 = smov 96   ;;  %s6519_s16 = smov 32   ;;  %vm3465_vm4 = vcmask 146504  }
  0x1e   : > { %s4314_s9 = smul.u32 344, %s233_s30  ;;  %s6517_s17 = smov 64  }
  0x1f   : > { %s6535_s12 = smov 32   ;;  %s4604_s29 = smov 9  }
  0x21   : > { %1825 = vmatpush.bf16.msra.mxu2 %v4013_v5  ;;  %s236_s13 = scalar_lea.vmem %s6534_s0, %s4314_s9  ;;  %s6537_s9 = smov 96  }
  0x22   : > { %s4726_s14 = scalar_lea.vmem %s236_s13, %s239_s8  ;;  %s6536_s13 = smov 64  }
  0x23   : > { %v3736_v6 = vld [vmem:[%s4726_s14 + $0x26] sm:$0xff]  ;;  %v3737_v7 = vld [vmem:[%s4726_s14 + $0x2e] sm:$0xff]  ;;  %v3647_v11 = vld [vmem:[%s4726_s14 + $0x1a] sm:$0xff] }
  0x24   : > { %v3646_v8 = vld [vmem:[%s4726_s14 + $0x12] sm:$0xff]  ;;  %v563_v9 = vpack.c.bf16 %v3736_v6, %v3736_v6  ;;  %v564_v10 = vpack.c.bf16 %v3737_v7, %v3737_v7  ;;  %v3610_v13 = vld [vmem:[%s4726_s14 + $0x1] sm:$0xff]  ;;  %v3611_v14 = vld [vmem:[%s4726_s14 + $0x9] sm:$0xff]  ;;  %v374_v15 = vpack.c.bf16 %v3647_v11, %v3647_v11 }
  0x25   : > { %v373_v12 = vpack.c.bf16 %v3646_v8, %v3646_v8  ;;  %v297_v16 = vpack.c.bf16 %v3610_v13, %v3610_v13  ;;  %v298_v17 = vpack.c.bf16 %v3611_v14, %v3611_v14  ;;  %v3682_v18 = vld [vmem:[%s4726_s14 + $0x14] sm:$0xff]  ;;  %v3683_v19 = vld [vmem:[%s4726_s14 + $0x1c] sm:$0xff]  ;;  %v3629_v25 = vld [vmem:[%s4726_s14 + $0xa] sm:$0xff] }
  0x26   : > { %v3628_v20 = vld [vmem:[%s4726_s14 + $0x2] sm:$0xff]  ;;  %v1067_v21 = vunpack.c.l.b16 %v563_v9  ;;  %v1068_v22 = vunpack.c.l.b16 %v564_v10  ;;  %v449_v24 = vpack.c.bf16 %v3682_v18, %v3682_v18  ;;  %v771_v26 = vunpack.c.l.b16 %v374_v15  ;;  %v3685_v36 = vld [vmem:[%s4726_s14 + $0x2c] sm:$0xff]  ;;  %v3738_v41 = vld [vmem:[%s4726_s14 + $0x36] sm:$0xff] }
  0x27   : > { %v770_v23 = vunpack.c.l.b16 %v373_v12  ;;  %v644_v27 = vunpack.c.l.b16 %v297_v16  ;;  %v645_v28 = vunpack.c.l.b16 %v298_v17  ;;  %v450_v29 = vpack.c.bf16 %v3683_v19, %v3683_v19  ;;  %v3684_v33 = vld [vmem:[%s4726_s14 + $0x24] sm:$0xff]  ;;  %v3612_v44 = vld [vmem:[%s4726_s14 + $0x11] sm:$0xff]  ;;  %v3613_v45 = vld [vmem:[%s4726_s14 + $0x19] sm:$0xff] }
  0x28   : > { %v4738_v30 = vpack.c.b16 %v1068_v22, %v1067_v21  ;;  %v335_v31 = vpack.c.bf16 %v3628_v20, %v3628_v20  ;;  %v336_v32 = vpack.c.bf16 %v3629_v25, %v3629_v25  ;;  %v878_v37 = vunpack.c.l.b16 %v449_v24  ;;  %v3739_v42 = vld [vmem:[%s4726_s14 + $0x3e] sm:$0xff]  ;;  %v3719_v56 = vld [vmem:[%s4726_s14 + $0x2d] sm:$0xff]  ;;  %v3720_v17 = vld [vmem:[%s4726_s14 + $0x35] sm:$0xff] }
  0x29   : > { %v788_v34 = vpack.c.b16 %v771_v26, %v770_v23  ;;  %v662_v35 = vpack.c.b16 %v645_v28, %v644_v27  ;;  %v879_v38 = vunpack.c.l.b16 %v450_v29  ;;  %v451_v43 = vpack.c.bf16 %v3684_v33, %v3684_v33  ;;  %v3718_v55 = vld [vmem:[%s4726_s14 + $0x25] sm:$0xff]  ;;  %v3702_v0 = vld [vmem:[%s4726_s14 + $0x34] sm:$0xff]  ;;  %v3703_v1 = vld [vmem:[%s4726_s14 + $0x3c] sm:$0xff] }
  0x2a   : > { %4042 = vmatmul.msk.bf16.vlgmr.msra.gmra.mxu2 %vm1094_vm0, %v4738_v30  ;;  %v707_v39 = vunpack.c.l.b16 %v335_v31  ;;  %v708_v40 = vunpack.c.l.b16 %v336_v32  ;;  %v452_v46 = vpack.c.bf16 %v3685_v36, %v3685_v36  ;;  %v565_v48 = vpack.c.bf16 %v3738_v41, %v3738_v41  ;;  %v3632_v4 = vld [vmem:[%s4726_s14 + $0x22] sm:$0xff]  ;;  %v3633_v5 = vld [vmem:[%s4726_s14 + $0x2a] sm:$0xff]  ;;  %v3635_v41 = vld [vmem:[%s4726_s14 + $0x3a] sm:$0xff] }
  0x2b   : > { %797 = vrot.lane.b32.xlu1 %v788_v34, %s6521_s15  ;;  %671 = vrot.lane.b32.xlu0 %v662_v35, %s6519_s16  ;;  %v880_v47 = vunpack.c.l.b16 %v451_v43  ;;  %v566_v49 = vpack.c.bf16 %v3739_v42, %v3739_v42  ;;  %v896_v51 = vpack.c.b16 %v879_v38, %v878_v37  ;;  %v299_v53 = vpack.c.bf16 %v3612_v44, %v3612_v44  ;;  %v3740_v13 = vld [vmem:[%s4726_s14 + $0x46] sm:$0xff]  ;;  %v3741_v14 = vld [vmem:[%s4726_s14 + $0x4e] sm:$0xff] }
  0x2c   : > { %v881_v50 = vunpack.c.l.b16 %v452_v46  ;;  %v725_v52 = vpack.c.b16 %v708_v40, %v707_v39  ;;  %v300_v54 = vpack.c.bf16 %v3613_v45, %v3613_v45  ;;  %v1069_v58 = vunpack.c.l.b16 %v565_v48  ;;  %v3721_v18 = vld [vmem:[%s4726_s14 + $0x3d] sm:$0xff]  ;;  %v3615_v20 = vld [vmem:[%s4726_s14 + $0x29] sm:$0xff]  ;;  %v3634_v40 = vld [vmem:[%s4726_s14 + $0x32] sm:$0xff] }
  0x2d   : > { %v1070_v59 = vunpack.c.l.b16 %v566_v49  ;;  %v525_v60 = vpack.c.bf16 %v3718_v55, %v3718_v55  ;;  %v526_v61 = vpack.c.bf16 %v3719_v56, %v3719_v56  ;;  %v646_v62 = vunpack.c.l.b16 %v299_v53  ;;  %v3614_v19 = vld [vmem:[%s4726_s14 + $0x21] sm:$0xff]  ;;  %v3705_v39 = vld [vmem:[%s4726_s14 + $0x4c] sm:$0xff]  ;;  %v3742_v49 = vld [vmem:[%s4726_s14 + $0x56] sm:$0xff] }
  0x2e   : > { %v897_v57 = vpack.c.b16 %v881_v50, %v880_v47  ;;  %v647_v63 = vunpack.c.l.b16 %v300_v54  ;;  %v489_v9 = vpack.c.bf16 %v3702_v0, %v3702_v0  ;;  %v490_v10 = vpack.c.bf16 %v3703_v1, %v3703_v1  ;;  %v3704_v38 = vld [vmem:[%s4726_s14 + $0x44] sm:$0xff]  ;;  %v3723_v54 = vld [vmem:[%s4726_s14 + $0x4d] sm:$0xff]  ;;  %v3617_v56 = vld [vmem:[%s4726_s14 + $0x39] sm:$0xff] }
  0x2f   : > { %v1004_v2 = vunpack.c.l.b16 %v525_v60  ;;  %v1005_v3 = vunpack.c.l.b16 %v526_v61  ;;  %v4759_v6 = vpack.c.b16 %v1070_v59, %v1069_v58  ;;  %v339_v11 = vpack.c.bf16 %v3632_v4, %v3632_v4  ;;  %v3743_v50 = vld [vmem:[%s4726_s14 + $0x5e] sm:$0xff]  ;;  %v3616_v55 = vld [vmem:[%s4726_s14 + $0x31] sm:$0xff] }
  0x30   : > { %968 = vrot.lane.b32.xlu2 %v897_v57, %s6517_s17  ;;  %v663_v8 = vpack.c.b16 %v647_v63, %v646_v62  ;;  %v340_v12 = vpack.c.bf16 %v3633_v5, %v3633_v5  ;;  %v943_v15 = vunpack.c.l.b16 %v489_v9  ;;  %v944_v16 = vunpack.c.l.b16 %v490_v10  ;;  %v3722_v53 = vld [vmem:[%s4726_s14 + $0x45] sm:$0xff]  ;;  %v3706_v10 = vld [vmem:[%s4726_s14 + $0x54] sm:$0xff] }
  0x31   : > { %v1022_v7 = vpack.c.b16 %v1005_v3, %v1004_v2  ;;  %v711_v21 = vunpack.c.l.b16 %v339_v11  ;;  %v567_v23 = vpack.c.bf16 %v3740_v13, %v3740_v13  ;;  %v568_v24 = vpack.c.bf16 %v3741_v14, %v3741_v14  ;;  %v3707_v11 = vld [vmem:[%s4726_s14 + $0x5c] sm:$0xff]  ;;  %v3637_v13 = vld [vmem:[%s4726_s14 + $0x4a] sm:$0xff] }
  0x32   : > { %v712_v22 = vunpack.c.l.b16 %v340_v12  ;;  %v527_v25 = vpack.c.bf16 %v3720_v17, %v3720_v17  ;;  %v528_v26 = vpack.c.bf16 %v3721_v18, %v3721_v18  ;;  %v960_v27 = vpack.c.b16 %v944_v16, %v943_v15  ;;  %v3636_v12 = vld [vmem:[%s4726_s14 + $0x42] sm:$0xff] }
  0x33   : > { %905 = vrot.lane.b32.xlu1 %v896_v51, %s6519_s16  ;;  %734 = vrot.lane.b32.xlu0 %v725_v52, %s6517_s17  ;;  %v301_v28 = vpack.c.bf16 %v3614_v19, %v3614_v19  ;;  %v302_v29 = vpack.c.bf16 %v3615_v20, %v3615_v20  ;;  %v1071_v32 = vunpack.c.l.b16 %v567_v23  ;;  %v1072_v33 = vunpack.c.l.b16 %v568_v24 }
  0x34   : > { %v727_v31 = vpack.c.b16 %v712_v22, %v711_v21  ;;  %v1007_v35 = vunpack.c.l.b16 %v528_v26  ;;  %v491_v45 = vpack.c.bf16 %v3704_v38, %v3704_v38  ;;  %v492_v46 = vpack.c.bf16 %v3705_v39, %v3705_v39  ;;  %v3744_v21 = vld [vmem:[%s4726_s14 + $0x66] sm:$0xff]  ;;  %v3745_v22 = vld [vmem:[%s4726_s14 + $0x6e] sm:$0xff]  ;;  %v3725_v26 = vld [vmem:[%s4726_s14 + $0x5d] sm:$0xff] }
  0x35   : > { %v648_v36 = vunpack.c.l.b16 %v301_v28  ;;  %v649_v37 = vunpack.c.l.b16 %v302_v29  ;;  %v4779_v42 = vpack.c.b16 %v1072_v33, %v1071_v32  ;;  %v341_v47 = vpack.c.bf16 %v3634_v40, %v3634_v40  ;;  %v3619_v28 = vld [vmem:[%s4726_s14 + $0x49] sm:$0xff] }
  0x36   : > { %v342_v48 = vpack.c.bf16 %v3635_v41, %v3635_v41  ;;  %v945_v51 = vunpack.c.l.b16 %v491_v45  ;;  %v946_v52 = vunpack.c.l.b16 %v492_v46  ;;  %v569_v59 = vpack.c.bf16 %v3742_v49, %v3742_v49  ;;  %v3868_v49 = vld [vmem:[%s6512_s1 + $0xe0] sm:$0xf] }
  0x37   : > { %v664_v44 = vpack.c.b16 %v649_v37, %v648_v36  ;;  %v570_v60 = vpack.c.bf16 %v3743_v50, %v3743_v50  ;;  %v529_v61 = vpack.c.bf16 %v3722_v53, %v3722_v53  ;;  %v530_v62 = vpack.c.bf16 %v3723_v54, %v3723_v54  ;;  %v4239_v50 = vld [vmem:[%s6512_s1 + $0xec] sm:$0xf0]  ;;  %v3870_v53 = vld [vmem:[%s6512_s1 + $0xf0] sm:$0xf0]  ;;  %v3996_v54 = vld [vmem:[%s6512_s1 + $0x1e0] sm:$0xf] }
  0x38   : > { %1031 = vrot.lane.b32.xlu2 %v1022_v7, %s6521_s15  ;;  %v714_v58 = vunpack.c.l.b16 %v342_v48  ;;  %v961_v63 = vpack.c.b16 %v946_v52, %v945_v51  ;;  %v303_v0 = vpack.c.bf16 %v3616_v55, %v3616_v55  ;;  %v304_v1 = vpack.c.bf16 %v3617_v56, %v3617_v56  ;;  %v4237_v52 = vld [vmem:[%s6512_s1 + $0xe4] sm:$0xf]  ;;  %v3638_v55 = vld [vmem:[%s4726_s14 + $0x52] sm:$0xff]  ;;  %v3639_v56 = vld [vmem:[%s4726_s14 + $0x5a] sm:$0xff] }
  0x39   : > { %v1073_v3 = vunpack.c.l.b16 %v569_v59  ;;  %v1074_v4 = vunpack.c.l.b16 %v570_v60  ;;  %v1008_v5 = vunpack.c.l.b16 %v529_v61  ;;  %v1009_v7 = vunpack.c.l.b16 %v530_v62 }
  0x3a   : > { %4043 = vmatmul.msk.bf16.gmra.mxu2 %vm1094_vm0, %v4759_v6  ;;  %v651_v9 = vunpack.c.l.b16 %v304_v1  ;;  %v493_v17 = vpack.c.bf16 %v3706_v10, %v3706_v10  ;;  %v494_v18 = vpack.c.bf16 %v3707_v11, %v3707_v11  ;;  %v343_v19 = vpack.c.bf16 %v3636_v12, %v3636_v12  ;;  %v3746_v1 = vld [vmem:[%s4726_s14 + $0x76] sm:$0xff]  ;;  %v3852_v10 = vld [vmem:[%s6512_s1 + $0xc0] sm:$0xf]  ;;  %v4235_v11 = vld [vmem:[%s6512_s1 + $0xcc] sm:$0xf0] }
  0x3b   : > { %673 = vrot.lane.b32.xlu0 %v663_v8, %s6519_s16  ;;  %736 = vrot.lane.b32.xlu1 %v788_v34, %s6517_s17  ;;  %v1006_v34 = vunpack.c.l.b16 %v527_v25  ;;  %v650_v8 = vunpack.c.l.b16 %v303_v0  ;;  %v4799_v14 = vpack.c.b16 %v1074_v4, %v1073_v3  ;;  %v1024_v15 = vpack.c.b16 %v1009_v7, %v1008_v5  ;;  %v3724_v25 = vld [vmem:[%s4726_s14 + $0x55] sm:$0xff]  ;;  %v3747_v4 = vld [vmem:[%s4726_s14 + $0x7e] sm:$0xff] }
  0x3c   : > { %v344_v20 = vpack.c.bf16 %v3637_v13, %v3637_v13  ;;  %v947_v23 = vunpack.c.l.b16 %v493_v17  ;;  %v948_v24 = vunpack.c.l.b16 %v494_v18  ;;  %v715_v29 = vunpack.c.l.b16 %v343_v19  ;;  %v3726_v5 = vld [vmem:[%s4726_s14 + $0x65] sm:$0xff]  ;;  %v3727_v7 = vld [vmem:[%s4726_s14 + $0x6d] sm:$0xff]  ;;  %v3980_v18 = vld [vmem:[%s6512_s1 + $0x1c0] sm:$0xf] }
  0x3d   : > { %v1023_v43 = vpack.c.b16 %v1007_v35, %v1006_v34  ;;  %v665_v16 = vpack.c.b16 %v651_v9, %v650_v8  ;;  %v571_v32 = vpack.c.bf16 %v3744_v21, %v3744_v21  ;;  %v572_v33 = vpack.c.bf16 %v3745_v22, %v3745_v22  ;;  %v3620_v8 = vld [vmem:[%s4726_s14 + $0x51] sm:$0xff]  ;;  %v3621_v9 = vld [vmem:[%s4726_s14 + $0x59] sm:$0xff]  ;;  %v4233_v12 = vld [vmem:[%s6512_s1 + $0xc4] sm:$0xf] }
  0x3e   : > { %v531_v34 = vpack.c.bf16 %v3724_v25, %v3724_v25  ;;  %v532_v35 = vpack.c.bf16 %v3725_v26, %v3725_v26  ;;  %v4812_v36 = vpack.c.b16 %v948_v24, %v947_v23  ;;  %v306_v38 = vpack.c.bf16 %v3619_v28, %v3619_v28  ;;  %v3854_v17 = vld [vmem:[%s6512_s1 + $0xd0] sm:$0xf0]  ;;  %v4267_v22 = vld [vmem:[%s6512_s1 + $0x1cc] sm:$0xf0]  ;;  %v3836_v23 = vld [vmem:[%s6512_s1 + $0xa0] sm:$0xf] }
  0x3f   : > { %v1075_v40 = vunpack.c.l.b16 %v571_v32  ;;  %v1076_v41 = vunpack.c.l.b16 %v572_v33  ;;  %v3869_v51 = vor.u32 %v4239_v50, %v3868_v49  ;;  %v346_v3 = vpack.c.bf16 %v3639_v56, %v3639_v56  ;;  %v4231_v24 = vld [vmem:[%s6512_s1 + $0xac] sm:$0xf0]  ;;  %v4229_v28 = vld [vmem:[%s6512_s1 + $0xa4] sm:$0xf]  ;;  %v3820_v50 = vld [vmem:[%s6512_s1 + $0x80] sm:$0xf] }
  0x40   : > { %799 = vrot.lane.b32.xlu2 %v727_v31, %s6521_s15  ;;  %v1010_v45 = vunpack.c.l.b16 %v531_v34  ;;  %v1011_v46 = vunpack.c.l.b16 %v532_v35  ;;  %v653_v48 = vunpack.c.l.b16 %v306_v38  ;;  %v3857_v21 = vor.u32 %v4233_v12, %v3854_v17  ;;  %v3641_v56 = vld [vmem:[%s4726_s14 + $0x6a] sm:$0xff] }
  0x41   : > { %v4840_v59 = vpack.c.b16 %v1076_v41, %v1075_v40  ;;  %1710 = vmatpush.bf16.msra.mxu0 %v3869_v51  ;;  %v573_v25 = vpack.c.bf16 %v3746_v1, %v3746_v1  ;;  %v3981_v26 = vor.u32 %v4267_v22, %v3980_v18  ;;  %v574_v32 = vpack.c.bf16 %v3747_v4, %v3747_v4  ;;  %v4227_v51 = vld [vmem:[%s6512_s1 + $0x8c] sm:$0xf0]  ;;  %v3932_v4 = vld [vmem:[%s6512_s1 + $0x160] sm:$0xf]  ;;  %v3748_v12 = vld [vmem:[%s4726_s14 + $0x86] sm:$0xff] }
  0x42   : > { %v1025_v60 = vpack.c.b16 %v1011_v46, %v1010_v45  ;;  %v533_v33 = vpack.c.bf16 %v3726_v5, %v3726_v5  ;;  %v534_v34 = vpack.c.bf16 %v3727_v7, %v3727_v7  ;;  %v308_v40 = vpack.c.bf16 %v3621_v9, %v3621_v9  ;;  %v3710_v46 = vld [vmem:[%s4726_s14 + $0x74] sm:$0xff]  ;;  %v3622_v22 = vld [vmem:[%s4726_s14 + $0x61] sm:$0xff] }
  0x43   : > { %907 = vrot.lane.b32.xlu0 %v897_v57, %s6519_s16  ;;  %970 = vrot.lane.b32.xlu1 %v960_v27, %s6517_s17  ;;  %v713_v57 = vunpack.c.l.b16 %v341_v47  ;;  %v1078_v45 = vunpack.c.l.b16 %v574_v32  ;;  %v3749_v18 = vld [vmem:[%s4726_s14 + $0x8e] sm:$0xff]  ;;  %v3729_v32 = vld [vmem:[%s4726_s14 + $0x7d] sm:$0xff] }
  0x44   : > { %v1013_v49 = vunpack.c.l.b16 %v534_v34 }
  0x45   : > { %v728_v2 = vpack.c.b16 %v714_v58, %v713_v57  ;;  %v3873_v57 = vor.u32 %v4237_v52, %v3870_v53  ;;  %v4271_v58 = vld [vmem:[%s6512_s1 + $0x1ec] sm:$0xf0]  ;;  %v4225_v52 = vld [vmem:[%s6512_s1 + $0x84] sm:$0xf] }
  0x46   : > { %v3997_v61 = vor.u32 %v4271_v58, %v3996_v54  ;;  %v655_v54 = vunpack.c.l.b16 %v308_v40  ;;  %v3822_v58 = vld [vmem:[%s6512_s1 + $0x90] sm:$0xf0]  ;;  %v4251_v40 = vld [vmem:[%s6512_s1 + $0x14c] sm:$0xf0] }
  0x47   : > { %1872 = vmatpush.bf16.msra.mxu3 %v3873_v57  ;;  %v3821_v57 = vor.u32 %v4227_v51, %v3820_v50  ;;  %v3772_v50 = vld [vmem:[%s6512_s1 + $0x20] sm:$0xf]  ;;  %v4215_v51 = vld [vmem:[%s6512_s1 + $0x2c] sm:$0xf0] }
  0x48   : > { %1033 = vrot.lane.b32.xlu2 %v1023_v43, %s6521_s15  ;;  %v3708_v43 = vld [vmem:[%s4726_s14 + $0x64] sm:$0xff]  ;;  %1764 = vmatpush.bf16.msra.mxu1 %v3997_v61  ;;  %v3825_v61 = vor.u32 %v4225_v52, %v3822_v58  ;;  %v3900_v58 = vld [vmem:[%s6512_s1 + $0x120] sm:$0xf] }
  0x49   : > { %v4213_v52 = vld [vmem:[%s6512_s1 + $0x24] sm:$0xf] }
  0x4a   : > { %4044 = vmatmul.msk.bf16.gmra.mxu2 %vm1094_vm0, %v4779_v42 }
  0x4b   : > { %675 = vrot.lane.b32.xlu0 %v664_v44, %s6519_s16  ;;  %738 = vrot.lane.b32.xlu1 %v727_v31, %s6517_s17  ;;  %v716_v31 = vunpack.c.l.b16 %v344_v20  ;;  %v3709_v44 = vld [vmem:[%s4726_s14 + $0x6c] sm:$0xff]  ;;  %v718_v20 = vunpack.c.l.b16 %v346_v3  ;;  %v3806_v3 = vld [vmem:[%s6512_s1 + $0x70] sm:$0xf0] }
  0x4c   : > { %v496_v0 = vpack.c.bf16 %v3709_v44, %v3709_v44  ;;  %1873 = vmatpush.bf16.msra.mxu3 %v3857_v21  ;;  %1765 = vmatpush.bf16.msra.mxu1 %v3981_v26  ;;  %v1077_v44 = vunpack.c.l.b16 %v573_v25  ;;  %v3728_v21 = vld [vmem:[%s4726_s14 + $0x75] sm:$0xff]  ;;  %v4219_v25 = vld [vmem:[%s6512_s1 + $0x4c] sm:$0xf0]  ;;  %v4217_v26 = vld [vmem:[%s6512_s1 + $0x44] sm:$0xf] }
  0x4d   : > { %v729_v39 = vpack.c.b16 %v716_v31, %v715_v29  ;;  %v3838_v29 = vld [vmem:[%s6512_s1 + $0xb0] sm:$0xf0]  ;;  %v3964_v31 = vld [vmem:[%s6512_s1 + $0x1a0] sm:$0xf] }
  0x4e   : > { %v3841_v35 = vor.u32 %v4229_v28, %v3838_v29  ;;  %v4933_v5 = vpack.c.b16 %v1078_v45, %v1077_v44  ;;  %v4265_v44 = vld [vmem:[%s6512_s1 + $0x1c4] sm:$0xf]  ;;  %v3982_v45 = vld [vmem:[%s6512_s1 + $0x1d0] sm:$0xf0] }
  0x50   : > { %801 = vrot.lane.b32.xlu2 %v728_v2, %s6521_s15  ;;  %1874 = vmatpush.bf16.msra.mxu3 %v3841_v35 }
  0x53   : > { %909 = vrot.lane.b32.xlu0 %v960_v27, %s6519_s16  ;;  %972 = vrot.lane.b32.xlu1 %v961_v63, %s6517_s17  ;;  %v3618_v27 = vld [vmem:[%s4726_s14 + $0x41] sm:$0xff] }
  0x54   : > { %v305_v37 = vpack.c.bf16 %v3618_v27, %v3618_v27  ;;  %v3837_v27 = vor.u32 %v4231_v24, %v3836_v23  ;;  %1875 = vmatpush.bf16.msra.mxu3 %v3825_v61  ;;  %v3788_v24 = vld [vmem:[%s6512_s1 + $0x40] sm:$0xf] }
  0x55   : > { %v3789_v29 = vor.u32 %v4219_v25, %v3788_v24  ;;  %v3950_v24 = vld [vmem:[%s6512_s1 + $0x190] sm:$0xf0] }
  0x56   : > { %v652_v47 = vunpack.c.l.b16 %v305_v37  ;;  %v4263_v37 = vld [vmem:[%s6512_s1 + $0x1ac] sm:$0xf0] }
  0x58   : > { %1035 = vrot.lane.b32.xlu2 %v1024_v15, %s6521_s15  ;;  %v666_v62 = vpack.c.b16 %v653_v48, %v652_v47  ;;  %v950_v15 = vunpack.c.l.b16 %v496_v0  ;;  %v3711_v47 = vld [vmem:[%s4726_s14 + $0x7c] sm:$0xff]  ;;  %v1012_v48 = vunpack.c.l.b16 %v533_v33  ;;  %v3623_v33 = vld [vmem:[%s4726_s14 + $0x69] sm:$0xff] }
  0x5a   : > { %4045 = vmatmul.msk.bf16.gmra.mxu2 %vm1094_vm0, %v4799_v14  ;;  %v1026_v7 = vpack.c.b16 %v1013_v49, %v1012_v48  ;;  %v536_v48 = vpack.c.bf16 %v3729_v32, %v3729_v32  ;;  %v3985_v49 = vor.u32 %v4265_v44, %v3982_v45  ;;  %v3750_v32 = vld [vmem:[%s4726_s14 + $0x96] sm:$0xff]  ;;  %v4253_v44 = vld [vmem:[%s6512_s1 + $0x164] sm:$0xf] }
  0x5b   : > { %677 = vrot.lane.b32.xlu0 %v665_v16, %s6519_s16  ;;  %740 = vrot.lane.b32.xlu1 %v728_v2, %s6517_s17  ;;  %v345_v2 = vpack.c.bf16 %v3638_v55, %v3638_v55  ;;  %v3853_v16 = vor.u32 %v4235_v11, %v3852_v10  ;;  %v3640_v55 = vld [vmem:[%s4726_s14 + $0x62] sm:$0xff]  ;;  %v497_v10 = vpack.c.bf16 %v3710_v46, %v3710_v46 }
  0x5c   : > { %v498_v11 = vpack.c.bf16 %v3711_v47, %v3711_v47  ;;  %v576_v46 = vpack.c.bf16 %v3749_v18, %v3749_v18  ;;  %v535_v47 = vpack.c.bf16 %v3728_v21, %v3728_v21  ;;  %v3713_v18 = vld [vmem:[%s4726_s14 + $0x8c] sm:$0xff]  ;;  %v3643_v21 = vld [vmem:[%s4726_s14 + $0x7a] sm:$0xff] }
  0x5d   : > { %v717_v19 = vunpack.c.l.b16 %v345_v2  ;;  %1711 = vmatpush.bf16.msra.mxu0 %v3853_v16  ;;  %v4221_v2 = vld [vmem:[%s6512_s1 + $0x64] sm:$0xf] }
  0x5e   : > { %v3809_v16 = vor.u32 %v4221_v2, %v3806_v3  ;;  %v952_v28 = vunpack.c.l.b16 %v498_v11  ;;  %v1080_v2 = vunpack.c.l.b16 %v576_v46  ;;  %v3712_v3 = vld [vmem:[%s4726_s14 + $0x84] sm:$0xff]  ;;  %v3934_v46 = vld [vmem:[%s6512_s1 + $0x170] sm:$0xf0] }
  0x5f   : > { %v730_v41 = vpack.c.b16 %v718_v20, %v717_v19  ;;  %v4269_v19 = vld [vmem:[%s6512_s1 + $0x1e4] sm:$0xf]  ;;  %v3998_v20 = vld [vmem:[%s6512_s1 + $0x1f0] sm:$0xf0] }
  0x60   : > { %803 = vrot.lane.b32.xlu2 %v729_v39, %s6521_s15  ;;  %v4001_v23 = vor.u32 %v4269_v19, %v3998_v20  ;;  %1876 = vmatpush.bf16.msra.mxu3 %v3809_v16  ;;  %v4209_v11 = vld [vmem:[%s6512_s1 + $0x4] sm:$0xf]  ;;  %v3758_v16 = vld [vmem:[%s6512_s1 + $0x10] sm:$0xf0]  ;;  %v4243_v20 = vld [vmem:[%s6512_s1 + $0x10c] sm:$0xf0] }
  0x61   : > { %1712 = vmatpush.bf16.msra.mxu0 %v3837_v27  ;;  %v951_v27 = vunpack.c.l.b16 %v497_v10  ;;  %v4211_v10 = vld [vmem:[%s6512_s1 + $0xc] sm:$0xf0] }
  0x62   : > { %1926 = vmatpush.bf16.msrb.mxu2 %v4001_v23  ;;  %v3642_v19 = vld [vmem:[%s4726_s14 + $0x72] sm:$0xff]  ;;  %v4257_v23 = vld [vmem:[%s6512_s1 + $0x184] sm:$0xf] }
  0x63   : > { %911 = vrot.lane.b32.xlu0 %v961_v63, %s6519_s16  ;;  %974 = vrot.lane.b32.xlu1 %v4812_v36, %s6517_s17  ;;  %v495_v63 = vpack.c.bf16 %v3708_v43, %v3708_v43  ;;  %v3965_v43 = vor.u32 %v4263_v37, %v3964_v31  ;;  %v3790_v31 = vld [vmem:[%s6512_s1 + $0x50] sm:$0xf0]  ;;  %s3492_s16 = smul.u32 18, %s4582_s21 }
  0x64   : > { %v3793_v37 = vor.u32 %v4217_v26, %v3790_v31  ;;  %v500_v31 = vpack.c.bf16 %v3713_v18, %v3713_v18  ;;  %s4315_s17 = smul.u32 36, %s4586_s22 }
  0x65   : > { %v949_v13 = vunpack.c.l.b16 %v495_v63  ;;  %1766 = vmatpush.bf16.msra.mxu1 %v3965_v43  ;;  %v4223_v63 = vld [vmem:[%s6512_s1 + $0x6c] sm:$0xf0]  ;;  %1713 = vmatpush.bf16.msra.mxu0 %v3821_v57  ;;  %v3774_v57 = vld [vmem:[%s6512_s1 + $0x30] sm:$0xf0] }
  0x66   : > { %1877 = vmatpush.bf16.msra.mxu3 %v3793_v37  ;;  %1927 = vmatpush.bf16.msrb.mxu2 %v3985_v49  ;;  %v4272_v37 = vld [vmem:[%s6512_s1 + $0x1f4] sm:$0xf0]  ;;  %s3496_s30 = sadd.s32 %s4315_s17, %s3492_s16  ;;  %s4524_s16 = scalar_lea.hbm %s6516_s5, 576 }
  0x67   : > { %v4889_v38 = vpack.c.b16 %v950_v15, %v949_v13  ;;  %v347_v13 = vpack.c.bf16 %v3640_v55, %v3640_v55  ;;  %v348_v15 = vpack.c.bf16 %v3641_v56, %v3641_v56  ;;  %v310_v55 = vpack.c.bf16 %v3623_v33, %v3623_v33  ;;  %s4206_s8 = sshll.u32 %s3496_s30, 3 }
  0x68   : > { %1037 = vrot.lane.b32.xlu2 %v1025_v60, %s6521_s15  ;;  %v3948_v60 = vld [vmem:[%s6512_s1 + $0x180] sm:$0xf]  ;;  %v3773_v56 = vor.u32 %v4215_v51, %v3772_v50  ;;  %v349_v33 = vpack.c.bf16 %v3642_v19, %v3642_v19  ;;  %v954_v50 = vunpack.c.l.b16 %v500_v31  ;;  %v3937_v51 = vor.u32 %v4253_v44, %v3934_v46  ;;  %s3498_s15 = scalar_lea.hbm %s6516_s5, %s4206_s8 }
  0x69   : > { %v719_v34 = vunpack.c.l.b16 %v347_v13  ;;  %v720_v35 = vunpack.c.l.b16 %v348_v15  ;;  %v657_v13 = vunpack.c.l.b16 %v310_v55  ;;  %v3624_v55 = vld [vmem:[%s4726_s14 + $0x71] sm:$0xff] }
  0x6a   : > { %4046 = vmatmul.msk.bf16.gmra.mxu2 %vm1094_vm0, %v4840_v59 }
  0x6b   : > { %679 = vrot.lane.b32.xlu0 %v666_v62, %s6535_s12  ;;  %742 = vrot.lane.b32.xlu1 %v729_v39, %s6536_s13  ;;  %v307_v39 = vpack.c.bf16 %v3620_v8, %v3620_v8  ;;  %v3804_v62 = vld [vmem:[%s6512_s1 + $0x60] sm:$0xf]  ;;  %v4255_v8 = vld [vmem:[%s6512_s1 + $0x16c] sm:$0xf0]  ;;  %v4999_v61 = vpack.c.b16 %v720_v35, %v719_v34  ;;  %v350_v34 = vpack.c.bf16 %v3643_v21, %v3643_v21 }
  0x6c   : > { %v3805_v1 = vor.u32 %v4223_v63, %v3804_v62  ;;  %v3933_v17 = vor.u32 %v4255_v8, %v3932_v4  ;;  %v1014_v4 = vunpack.c.l.b16 %v535_v47  ;;  %v4004_v35 = vld [vmem:[%s6512_s1 + $0x1e8] sm:$0xf] }
  0x6d   : > { %v654_v53 = vunpack.c.l.b16 %v307_v39  ;;  %v3916_v39 = vld [vmem:[%s6512_s1 + $0x140] sm:$0xf]  ;;  %v3730_v47 = vld [vmem:[%s4726_s14 + $0x85] sm:$0xff] }
  0x6e   : > { %1714 = vmatpush.bf16.msra.mxu0 %v3805_v1  ;;  %v3917_v43 = vor.u32 %v4251_v40, %v3916_v39  ;;  %v3966_v1 = vld [vmem:[%s6512_s1 + $0x1b0] sm:$0xf0]  ;;  %v3751_v39 = vld [vmem:[%s4726_s14 + $0x9e] sm:$0xff]  ;;  %v4005_v40 = vor.u32 %v4272_v37, %v4004_v35 }
  0x6f   : > { %v667_v9 = vpack.c.b16 %v655_v54, %v654_v53  ;;  %v4988_v53 = vpack.c.b16 %v952_v28, %v951_v27  ;;  %v309_v54 = vpack.c.bf16 %v3622_v22, %v3622_v22  ;;  %v3953_v27 = vor.u32 %v4257_v23, %v3950_v24  ;;  %v3645_v23 = vld [vmem:[%s4726_s14 + $0x8a] sm:$0xff]  ;;  %v3886_v24 = vld [vmem:[%s6512_s1 + $0x110] sm:$0xf0]  ;;  %v3665_v37 = vld [vmem:[%s4726_s14 + $0x1b] sm:$0xff] }
  0x70   : > { %805 = vrot.lane.b32.xlu2 %v730_v41, %s6537_s9  ;;  %v3664_v35 = vld [vmem:[%s4726_s14 + $0x13] sm:$0xff]  ;;  %v352_v44 = vpack.c.bf16 %v3645_v23, %v3645_v23 }
  0x72   : > { %1715 = vmatpush.bf16.msra.mxu0 %v3789_v29  ;;  %v499_v29 = vpack.c.bf16 %v3712_v3, %v3712_v3 }
  0x73   : > { %913 = vrot.lane.b32.xlu0 %v4812_v36, %s6535_s12  ;;  %976 = vrot.lane.b32.xlu1 %v4889_v38, %s6536_s13  ;;  %v4259_v36 = vld [vmem:[%s6512_s1 + $0x18c] sm:$0xf0] }
  0x74   : > { %v3949_v0 = vor.u32 %v4259_v36, %v3948_v60  ;;  %v4247_v60 = vld [vmem:[%s6512_s1 + $0x12c] sm:$0xf0]  ;;  %v3777_v36 = vor.u32 %v4213_v52, %v3774_v57  ;;  %v953_v49 = vunpack.c.l.b16 %v499_v29  ;;  %v3876_v52 = vld [vmem:[%s6512_s1 + $0xe8] sm:$0xf]  ;;  %v721_v57 = vunpack.c.l.b16 %v349_v33 }
  0x75   : > { %v3901_v62 = vor.u32 %v4247_v60, %v3900_v58  ;;  %v722_v58 = vunpack.c.l.b16 %v350_v34 }
  0x76   : > { %1767 = vmatpush.bf16.msra.mxu1 %v3949_v0  ;;  %1716 = vmatpush.bf16.msra.mxu0 %v3773_v56  ;;  %v4261_v0 = vld [vmem:[%s6512_s1 + $0x1a4] sm:$0xf]  ;;  %v3625_v56 = vld [vmem:[%s4726_s14 + $0x79] sm:$0xff] }
  0x77   : > { %v3969_v8 = vor.u32 %v4261_v0, %v3966_v1  ;;  %1878 = vmatpush.bf16.msra.mxu3 %v3777_v36  ;;  %v577_v36 = vpack.c.bf16 %v3750_v32, %v3750_v32  ;;  %v578_v0 = vpack.c.bf16 %v3751_v39, %v3751_v39  ;;  %v537_v1 = vpack.c.bf16 %v3730_v47, %v3730_v47  ;;  %v3752_v39 = vld [vmem:[%s4726_s14 + $0xa6] sm:$0xff] }
  0x78   : > { %1039 = vrot.lane.b32.xlu2 %v1026_v7, %s6537_s9  ;;  %v1015_v7 = vunpack.c.l.b16 %v536_v48  ;;  %v3731_v48 = vld [vmem:[%s4726_s14 + $0x8d] sm:$0xff] }
  0x79   : > { %1928 = vmatpush.bf16.msrb.mxu2 %v3969_v8  ;;  %v312_v8 = vpack.c.bf16 %v3625_v56, %v3625_v56  ;;  %v3627_v47 = vld [vmem:[%s4726_s14 + $0x89] sm:$0xff] }
  0x7a   : > { %4047 = vmatmul.msk.bf16.gmra.mxu2 %vm1094_vm0, %v4933_v5  ;;  %1768 = vmatpush.bf16.msra.mxu1 %v3933_v17  ;;  %v3884_v17 = vld [vmem:[%s6512_s1 + $0x100] sm:$0xf]  ;;  %v1027_v26 = vpack.c.b16 %v1015_v7, %v1014_v4  ;;  %v5087_v4 = vpack.c.b16 %v954_v50, %v953_v49  ;;  %v311_v7 = vpack.c.bf16 %v3624_v55, %v3624_v55  ;;  %v4268_v49 = vld [vmem:[%s6512_s1 + $0x1d4] sm:$0xf0] }
  0x7b   : > { %681 = vrot.lane.b32.xlu0 %v667_v9, %s6535_s12  ;;  %744 = vrot.lane.b32.xlu1 %v730_v41, %s6536_s13  ;;  %v575_v41 = vpack.c.bf16 %v3748_v12, %v3748_v12  ;;  %v3756_v9 = vld [vmem:[%s6512_s1] sm:$0xf]  ;;  %v656_v12 = vunpack.c.l.b16 %v309_v54  ;;  %v3885_v22 = vor.u32 %v4243_v20, %v3884_v17  ;;  %v4240_v54 = vld [vmem:[%s6512_s1 + $0xf4] sm:$0xf0]  ;;  %v659_v19 = vunpack.c.l.b16 %v312_v8 }
  0x7c   : > { %v3757_v15 = vor.u32 %v4211_v10, %v3756_v9  ;;  %v732_v9 = vpack.c.b16 %v722_v58, %v721_v57  ;;  %v1081_v10 = vunpack.c.l.b16 %v577_v36  ;;  %v658_v18 = vunpack.c.l.b16 %v311_v7  ;;  %v3715_v20 = vld [vmem:[%s4726_s14 + $0x9c] sm:$0xff] }
  0x7d   : > { %v1079_v63 = vunpack.c.l.b16 %v575_v41  ;;  %v668_v28 = vpack.c.b16 %v657_v13, %v656_v12  ;;  %1929 = vmatpush.bf16.msrb.mxu2 %v3953_v27  ;;  %v4277_v41 = vld [vmem:[%s6512_s1 + $0x224] sm:$0xf]  ;;  %v3902_v12 = vld [vmem:[%s6512_s1 + $0x130] sm:$0xf0]  ;;  %v1082_v13 = vunpack.c.l.b16 %v578_v0  ;;  %v502_v34 = vpack.c.bf16 %v3715_v20, %v3715_v20 }
  0x7e   : > { %1769 = vmatpush.bf16.msra.mxu1 %v3917_v43  ;;  %1717 = vmatpush.bf16.msra.mxu0 %v3757_v15  ;;  %v4030_v43 = vld [vmem:[%s6512_s1 + $0x230] sm:$0xf0]  ;;  %v1016_v15 = vunpack.c.l.b16 %v537_v1  ;;  %v241_v27 = vld [vmem:[%s4726_s14] sm:$0xff]  ;;  %v669_v32 = vpack.c.b16 %v659_v19, %v658_v18  ;;  %v411_v50 = vpack.c.bf16 %v3664_v35, %v3664_v35  ;;  %v579_v58 = vpack.c.bf16 %v3752_v39, %v3752_v39 }
  0x7f   : > { %v5041_v25 = vpack.c.b16 %v1080_v2, %v1079_v63  ;;  %v4033_v45 = vor.u32 %v4277_v41, %v4030_v43  ;;  %v3918_v63 = vld [vmem:[%s6512_s1 + $0x150] sm:$0xf0]  ;;  %v538_v2 = vpack.c.bf16 %v3731_v48, %v3731_v48  ;;  %v3626_v41 = vld [vmem:[%s4726_s14 + $0x81] sm:$0xff]  ;;  %v956_v57 = vunpack.c.l.b16 %v502_v34 }
  0x80   : > { %807 = vrot.lane.b32.xlu2 %v4999_v61, %s6537_s9  ;;  %v3988_v48 = vld [vmem:[%s6512_s1 + $0x1c8] sm:$0xf]  ;;  %v3733_v55 = vld [vmem:[%s4726_s14 + $0x9d] sm:$0xff]  ;;  %v313_v36 = vpack.c.bf16 %v3626_v41, %v3626_v41  ;;  %v724_v0 = vunpack.c.l.b16 %v352_v44 }
  0x81   : > { %1930 = vmatpush.bf16.msrb.mxu2 %v3937_v51  ;;  %v412_v51 = vpack.c.bf16 %v3665_v37, %v3665_v37  ;;  %v3716_v35 = vld [vmem:[%s4726_s14 + $0xa4] sm:$0xff]  ;;  %v3717_v37 = vld [vmem:[%s4726_s14 + $0xac] sm:$0xff] }
  0x82   : > { %1770 = vmatpush.bf16.msra.mxu1 %v3901_v62  ;;  %1986 = vmatpush.bf16.msrb.mxu0 %v4033_v45  ;;  %v4249_v62 = vld [vmem:[%s6512_s1 + $0x144] sm:$0xf]  ;;  %v259_v45 = vpack.c.bf16 %v241_v27, %v241_v27 }
  0x83   : > { %915 = vrot.lane.b32.xlu0 %v4889_v38, %s6535_s12  ;;  %978 = vrot.lane.b32.xlu1 %v4988_v53, %s6536_s13  ;;  %v3761_v38 = vor.u32 %v4209_v11, %v3758_v16  ;;  %v3921_v3 = vor.u32 %v4249_v62, %v3918_v63  ;;  %v4245_v11 = vld [vmem:[%s6512_s1 + $0x124] sm:$0xf]  ;;  %v1017_v16 = vunpack.c.l.b16 %v538_v2  ;;  %v314_v62 = vpack.c.bf16 %v3627_v47, %v3627_v47 }
  0x84   : > { %v3905_v17 = vor.u32 %v4245_v11, %v3902_v12  ;;  %v599_v7 = vunpack.c.l.b16 %v259_v45  ;;  %v540_v11 = vpack.c.bf16 %v3733_v55, %v3733_v55  ;;  %v833_v12 = vunpack.c.l.b16 %v411_v50 }
  0x85   : > { %1879 = vmatpush.bf16.msra.mxu3 %v3761_v38  ;;  %1931 = vmatpush.bf16.msrb.mxu2 %v3921_v3  ;;  %v3714_v38 = vld [vmem:[%s4726_s14 + $0x94] sm:$0xff]  ;;  %v1028_v29 = vpack.c.b16 %v1017_v16, %v1016_v15  ;;  %v661_v20 = vunpack.c.l.b16 %v314_v62  ;;  %v504_v55 = vpack.c.bf16 %v3717_v37, %v3717_v37 }
  0x86   : > { %1771 = vmatpush.bf16.msra.mxu1 %v3885_v22  ;;  %v3644_v22 = vld [vmem:[%s4726_s14 + $0x82] sm:$0xff]  ;;  %v501_v33 = vpack.c.bf16 %v3714_v38, %v3714_v38  ;;  %v4236_v15 = vld [vmem:[%s6512_s1 + $0xd4] sm:$0xf0]  ;;  %v660_v38 = vunpack.c.l.b16 %v313_v36 }
  0x87   : > { %v351_v43 = vpack.c.bf16 %v3644_v22, %v3644_v22 }
  0x88   : > { %1041 = vrot.lane.b32.xlu2 %v1027_v26, %s6537_s9  ;;  %v5112_v26 = vpack.c.b16 %v1082_v13, %v1081_v10  ;;  %v955_v56 = vunpack.c.l.b16 %v501_v33  ;;  %v3860_v13 = vld [vmem:[%s6512_s1 + $0xc8] sm:$0xf]  ;;  %v670_v34 = vpack.c.b16 %v661_v20, %v660_v38 }
  0x89   : > { %2088 = vmatpush.bf16.msrb.mxu3 %v4005_v40  ;;  %1932 = vmatpush.bf16.msrb.mxu2 %v3905_v17  ;;  %v3753_v40 = vld [vmem:[%s4726_s14 + $0xae] sm:$0xff]  ;;  %v723_v63 = vunpack.c.l.b16 %v351_v43  ;;  %v1083_v17 = vunpack.c.l.b16 %v579_v58  ;;  %v3861_v18 = vor.u32 %v4236_v15, %v3860_v13 }
  0x8a   : > { %4048 = vmatmul.msk.bf16.gmra.mxu2 %vm1094_vm0, %v5041_v25  ;;  %v5079_v60 = vpop.permute.xlu2 %968  ;;  %v5143_v16 = vpack.c.b16 %v956_v57, %v955_v56  ;;  %v3667_v56 = vld [vmem:[%s4726_s14 + $0x2b] sm:$0xff] }
  0x8b   : > { %683 = vrot.lane.b32.xlu0 %v668_v28, %s6535_s12  ;;  %746 = vrot.lane.b32.xlu1 %v4999_v61, %s6536_s13  ;;  %v3877_v61 = vor.u32 %v4240_v54, %v3876_v52  ;;  %v242_v28 = vld [vmem:[%s4726_s14 + $0x8] sm:$0xff]  ;;  %v3989_v52 = vor.u32 %v4268_v49, %v3988_v48  ;;  %v3732_v54 = vld [vmem:[%s4726_s14 + $0x95] sm:$0xff]  ;;  %v733_v22 = vpack.c.b16 %v724_v0, %v723_v63 }
  0x8c   : > { %v260_v46 = vpack.c.bf16 %v242_v28, %v242_v28  ;;  %v539_v10 = vpack.c.bf16 %v3732_v54, %v3732_v54  ;;  %v243_v28 = vld [vmem:[%s4726_s14 + $0x10] sm:$0xff]  ;;  %v3666_v48 = vld [vmem:[%s4726_s14 + $0x23] sm:$0xff]  ;;  %v503_v54 = vpack.c.bf16 %v3716_v35, %v3716_v35  ;;  %v414_v36 = vpack.c.bf16 %v3667_v56, %v3667_v56  ;;  %v4264_v0 = vld [vmem:[%s6512_s1 + $0x1b4] sm:$0xf0] }
  0x8d   : > { %2034 = vmatpush.bf16.msrb.mxu1 %v3877_v61  ;;  %v580_v61 = vpack.c.bf16 %v3753_v40, %v3753_v40  ;;  %2089 = vmatpush.bf16.msrb.mxu3 %v3989_v52  ;;  %v261_v43 = vpack.c.bf16 %v243_v28, %v243_v28  ;;  %v3972_v63 = vld [vmem:[%s6512_s1 + $0x1a8] sm:$0xf] }
  0x8e   : > { %v600_v8 = vunpack.c.l.b16 %v260_v46 }
  0x8f   : > { %v1084_v19 = vunpack.c.l.b16 %v580_v61  ;;  %v601_v58 = vunpack.c.l.b16 %v261_v43  ;;  %v413_v61 = vpack.c.bf16 %v3666_v48, %v3666_v48  ;;  %v3668_v48 = vld [vmem:[%s4726_s14 + $0x33] sm:$0xff] }
  0x90   : > { %809 = vrot.lane.b32.xlu2 %v732_v9, %s6537_s9  ;;  %v617_v23 = vpack.c.b16 %v600_v8, %v599_v7  ;;  %v3973_v7 = vor.u32 %v4264_v0, %v3972_v63  ;;  %v3734_v8 = vld [vmem:[%s4726_s14 + $0xa5] sm:$0xff]  ;;  %v4260_v63 = vld [vmem:[%s6512_s1 + $0x194] sm:$0xf0] }
  0x91   : > { %2035 = vmatpush.bf16.msrb.mxu1 %v3861_v18  ;;  %v5154_v33 = vpack.c.b16 %v1084_v19, %v1083_v17  ;;  %v835_v15 = vunpack.c.l.b16 %v413_v61  ;;  %v836_v18 = vunpack.c.l.b16 %v414_v36  ;;  %v541_v38 = vpack.c.bf16 %v3734_v8, %v3734_v8 }
  0x92   : > { %v5102_v21 = vpop.permute.xlu2 %1031  ;;  %2090 = vmatpush.bf16.msrb.mxu3 %v3973_v7 }
  0x93   : > { %917 = vrot.lane.b32.xlu0 %v4988_v53, %s6535_s12  ;;  %980 = vrot.lane.b32.xlu1 %v5087_v4, %s6536_s13  ;;  %v4241_v53 = vld [vmem:[%s6512_s1 + $0x104] sm:$0xf]  ;;  %v852_v28 = vpack.c.b16 %v836_v18, %v835_v15 }
  0x94   : > { %v3889_v31 = vor.u32 %v4241_v53, %v3886_v24  ;;  %v1018_v53 = vunpack.c.l.b16 %v539_v10  ;;  %v1019_v24 = vunpack.c.l.b16 %v540_v11  ;;  %v3735_v10 = vld [vmem:[%s4726_s14 + $0xad] sm:$0xff] }
  0x95   : > { %v542_v20 = vpack.c.bf16 %v3735_v10, %v3735_v10 }
  0x96   : > { %1933 = vmatpush.bf16.msrb.mxu2 %v3889_v31  ;;  %v3662_v31 = vld [vmem:[%s4726_s14 + $0x92] sm:$0xff]  ;;  %v1029_v45 = vpack.c.b16 %v1019_v24, %v1018_v53 }
  0x97   : > { %v389_v49 = vpack.c.bf16 %v3662_v31, %v3662_v31  ;;  %v4232_v53 = vld [vmem:[%s6512_s1 + $0xb4] sm:$0xf0]  ;;  %v246_v31 = vld [vmem:[%s4726_s14 + $0x28] sm:$0xff] }
  0x98   : > { %1043 = vrot.lane.b32.xlu2 %v1028_v29, %s6537_s9  ;;  %v244_v29 = vld [vmem:[%s4726_s14 + $0x18] sm:$0xff]  ;;  %v264_v43 = vpack.c.bf16 %v246_v31, %v246_v31 }
  0x99   : > { %v262_v44 = vpack.c.bf16 %v244_v29, %v244_v29  ;;  %v786_v62 = vunpack.c.l.b16 %v389_v49  ;;  %v245_v29 = vld [vmem:[%s4726_s14 + $0x20] sm:$0xff] }
  0x9a   : > { %4049 = vmatmul.msk.bf16.gmra.mxu2 %vm1094_vm0, %v5112_v26  ;;  %v5135_v1 = vpop.permute.xlu2 %799  ;;  %v3669_v49 = vld [vmem:[%s4726_s14 + $0x3b] sm:$0xff] }
  0x9b   : > { %685 = vrot.lane.b32.xlu0 %v669_v32, %s6535_s12  ;;  %748 = vrot.lane.b32.xlu1 %v732_v9, %s6536_s13  ;;  %v834_v9 = vunpack.c.l.b16 %v412_v51  ;;  %v3663_v32 = vld [vmem:[%s4726_s14 + $0x9a] sm:$0xff] }
  0x9c   : > { %v390_v50 = vpack.c.bf16 %v3663_v32, %v3663_v32  ;;  %v1020_v32 = vunpack.c.l.b16 %v541_v38 }
  0x9d   : > { %v798_v2 = vpop.permute.xlu1 %797  ;;  %v672_v3 = vpop.permute.xlu0 %671  ;;  %v851_v27 = vpack.c.b16 %v834_v9, %v833_v12 }
  0x9e   : > { %v1097_v40 = vsel %vm1094_vm0, %v617_v23, %v672_v3  ;;  %v958_v3 = vunpack.c.l.b16 %v504_v55  ;;  %v3844_v23 = vld [vmem:[%s6512_s1 + $0xa8] sm:$0xf]  ;;  %v416_v55 = vpack.c.bf16 %v3669_v49, %v3669_v49 }
  0xa0   : > { %811 = vrot.lane.b32.xlu2 %v733_v22, %s6537_s9 }
  0xa2   : > { %v5158_v39 = vpop.permute.xlu2 %1033 }
  0xa3   : > { %919 = vrot.lane.b32.xlu0 %v5087_v4, %s6535_s12  ;;  %982 = vrot.lane.b32.xlu1 %v5143_v16, %s6536_s13 }
  0xa5   : > { %v906_v41 = vpop.permute.xlu1 %905  ;;  %v735_v4 = vpop.permute.xlu0 %734 }
  0xa6   : > { %v1171_v46 = vsel %vm1094_vm0, %v851_v27, %v906_v41  ;;  %v1124_v47 = vsel %vm1122_vm1, %v1097_v40, %v735_v4  ;;  %v3845_v27 = vor.u32 %v4232_v53, %v3844_v23  ;;  %v263_v4 = vpack.c.bf16 %v245_v29, %v245_v29 }
  0xa7   : > { %v1197_v51 = vsel %vm1122_vm1, %v1171_v46, %v5079_v60  ;;  %v5167_v52 = vsel %vm1141_vm2, %v1124_v47, %v798_v2  ;;  %v602_v60 = vunpack.c.l.b16 %v262_v44  ;;  %v957_v2 = vunpack.c.l.b16 %v503_v54 }
  0xa8   : > { %v5172_v57 = vsel %vm1141_vm2, %v1197_v51, %v5102_v21  ;;  %1718 = vmatmul.bf16.vlgmr.msra.gmra.mxu0 %v5167_v52  ;;  %1880 = vmatmul.bf16.vlgmr.msra.gmra.mxu3 %v5167_v52  ;;  %v787_v21 = vunpack.c.l.b16 %v390_v50  ;;  %v603_v51 = vunpack.c.l.b16 %v263_v4  ;;  %v604_v54 = vunpack.c.l.b16 %v264_v43 }
  0xa9   : > { %1772 = vmatmul.bf16.vlgmr.msra.gmra.mxu1 %v5172_v57  ;;  %1045 = vrot.lane.b32.xlu2 %v1029_v45, %s6537_s9  ;;  %v618_v9 = vpack.c.b16 %v602_v60, %v601_v58 }
  0xaa   : > { %4050 = vmatmul.msk.bf16.gmra.mxu2 %vm1094_vm0, %v5154_v33  ;;  %v5190_v11 = vpop.permute.xlu2 %801  ;;  %v796_v19 = vpack.c.b16 %v787_v21, %v786_v62  ;;  %2036 = vmatpush.bf16.msrb.mxu1 %v3845_v27  ;;  %v838_v62 = vunpack.c.l.b16 %v416_v55  ;;  %v3956_v21 = vld [vmem:[%s6512_s1 + $0x188] sm:$0xf]  ;;  %v4224_v55 = vld [vmem:[%s6512_s1 + $0x74] sm:$0xf0] }
  0xab   : > { %687 = vrot.lane.b32.xlu0 %v670_v34, %s6535_s12  ;;  %750 = vrot.lane.b32.xlu1 %v733_v22, %s6536_s13  ;;  %v967_v22 = vpack.c.b16 %v958_v3, %v957_v2  ;;  %v1021_v34 = vunpack.c.l.b16 %v542_v20  ;;  %v3957_v0 = vor.u32 %v4260_v63, %v3956_v21  ;;  %v3828_v2 = vld [vmem:[%s6512_s1 + $0x88] sm:$0xf]  ;;  %v4228_v3 = vld [vmem:[%s6512_s1 + $0x94] sm:$0xf0] }
  0xac   : > { %v3829_v8 = vor.u32 %v4228_v3, %v3828_v2  ;;  %v3670_v27 = vld [vmem:[%s4726_s14 + $0x43] sm:$0xff] }
  0xad   : > { %v674_v12 = vpop.permute.xlu0 %673  ;;  %v5192_v13 = vpop.f32.mrf.mxu2  ;;  %v1030_v46 = vpack.c.b16 %v1021_v34, %v1020_v32  ;;  %2091 = vmatpush.bf16.msrb.mxu3 %v3957_v0  ;;  %v417_v34 = vpack.c.bf16 %v3670_v27, %v3670_v27 }
  0xae   : > { %v737_v17 = vpop.permute.xlu1 %736  ;;  %v1100_v24 = vsel %vm1094_vm0, %v618_v9, %v674_v12  ;;  %v247_v12 = vld [vmem:[%s4726_s14 + $0x30] sm:$0xff]  ;;  %v248_v9 = vld [vmem:[%s4726_s14 + $0x38] sm:$0xff]  ;;  %2037 = vmatpush.bf16.msrb.mxu1 %v3829_v8 }
  0xaf   : > { %v1126_v35 = vsel %vm1122_vm1, %v1100_v24, %v737_v17  ;;  %v265_v38 = vpack.c.bf16 %v247_v12, %v247_v12  ;;  %v266_v20 = vpack.c.bf16 %v248_v9, %v248_v9 }
  0xb0   : > { %v5213_v47 = vsel %vm1141_vm2, %v1126_v35, %v5135_v1  ;;  %v415_v1 = vpack.c.bf16 %v3668_v48, %v3668_v48  ;;  %v4273_v48 = vld [vmem:[%s6512_s1 + $0x204] sm:$0xf] }
  0xb1   : > { %813 = vrot.lane.b32.xlu2 %v796_v19, %s6537_s9  ;;  %v605_v31 = vunpack.c.l.b16 %v265_v38  ;;  %v606_v32 = vunpack.c.l.b16 %v266_v20 }
  0xb2   : > { %v1036_v37 = vpop.permute.xlu2 %1035  ;;  %v837_v36 = vunpack.c.l.b16 %v415_v1  ;;  %v3812_v1 = vld [vmem:[%s6512_s1 + $0x68] sm:$0xf] }
  0xb3   : > { %921 = vrot.lane.b32.xlu0 %v5143_v16, %s6535_s12  ;;  %984 = vrot.lane.b32.xlu1 %v967_v22, %s6536_s13  ;;  %v620_v4 = vpack.c.b16 %v606_v32, %v605_v31  ;;  %s229_s13 = sand.u32 1, %s4574_s19   ;;  %s3501_s12 = sshll.u32 %s3498_s15, 4  ;;  %s3502_s12 = int_to_ptr.hbm [resolvable:$true] %s3501_s12 }
  0xb4   : > { %v853_v10 = vpack.c.b16 %v838_v62, %v837_v36  ;;  %v3813_v62 = vor.u32 %v4224_v55, %v3812_v1  ;;  %s4313_s26 = smul.u32 144, %s229_s13  ;;  %s3485_s21 = scalar_lea.sflag [#allocation3], %s229_s13 }
  0xb5   : > { %v908_v40 = vpop.permute.xlu0 %907  ;;  %v5208_v41 = vpop.f32.mrf.mxu2  ;;  %s4518_s22 = sshra.s32 %s3502_s12, 4  ;;  %s4519_s22 = int_to_ptr.hbm [resolvable:$true] %s4518_s22 }
  0xb6   : > { %v1174_v44 = vsel %vm1094_vm0, %v852_v28, %v908_v40  ;;  %v971_v45 = vpop.permute.xlu1 %970  ;;  %v3671_v28 = vld [vmem:[%s4726_s14 + $0x4b] sm:$0xff]  ;;  %2038 = vmatpush.bf16.msrb.mxu1 %v3813_v62  ;;  %v3674_v62 = vld [vmem:[%s4726_s14 + $0x63] sm:$0xff]  ;;  %s6017_s27 = scalar_lea.vmem [#allocation2], %s4313_s26  ;;  %s4520_s26 = scalar_lea.hbm %s4519_s22, 144 }
  0xb7   : > { %v1199_v16 = vsel %vm1122_vm1, %v1174_v44, %v971_v45  ;;  %v839_v44 = vunpack.c.l.b16 %v417_v34  ;;  %s3499_s10 = sshll.u32 %s6017_s27, 4  ;;  %p4521_p13 = scmp.ne.s32.totalorder %s4519_s22, %s4520_s26  ;;  %s3500_s10 = int_to_ptr.vmem [resolvable:$true] %s3499_s10 }
  0xb8   : > { %v5220_v50 = vsel %vm1141_vm2, %v1199_v16, %v5158_v39  ;;  %1723 = vmatmul.bf16.gmra.mxu0 %v5213_v47  ;;  %1885 = vmatmul.bf16.gmra.mxu3 %v5213_v47  ;;  %v619_v39 = vpack.c.b16 %v604_v54, %v603_v51  ;;  %v4256_v16 = vld [vmem:[%s6512_s1 + $0x174] sm:$0xf0]  ;;  %v4014_v54 = vld [vmem:[%s6512_s1 + $0x210] sm:$0xf0]  ;;  %p4525_p2 = scmp.lt.s32.totalorder %s4519_s22, %s6516_s5  ;;  %p4526_p4 = scmp.lt.s32.totalorder %s4524_s16, %s4520_s26 }
  0xb9   : > { %1777 = vmatmul.bf16.gmra.mxu1 %v5220_v50  ;;  %1047 = vrot.lane.b32.xlu2 %v1030_v46, %s6537_s9  ;;  %v3940_v46 = vld [vmem:[%s6512_s1 + $0x168] sm:$0xf]  ;;  %v4017_v36 = vor.u32 %v4273_v48, %v4014_v54  ;;  %s4603_s9 = smov 119   ;;  %p4522_p0 = pnand %p4521_p13, %p4688_p3 }
  0xba   : > { %1934 = vmatmul.bf16.vlgmr.msrb.gmra.mxu2 %v5172_v57  ;;  %v5227_v56 = vpop.permute.xlu2 %803  ;;  %v3941_v51 = vor.u32 %v4256_v16, %v3940_v46  ;;  %v252_v46 = vld [vmem:[%s4726_s14 + $0x58] sm:$0xff]  ;;  %p4527_p5 = por %p4526_p4, %p4525_p2 }
  0xbb   : > { %1987 = vmatpush.bf16.msrb.mxu0 %v4017_v36  ;;  %v270_v54 = vpack.c.bf16 %v252_v46, %v252_v46  ;;  %p4523_p1 = pneg %p4522_p0 }
  0xbc   : > { %2092 = vmatpush.bf16.msrb.mxu3 %v3941_v51 }
  0xbd   : > { %v676_v58 = vpop.permute.xlu0 %675  ;;  %v5229_v60 = vpop.f32.mrf.mxu2  ;;  %p4528_p6 = pnand %p4527_p5, %p4523_p1 }
  0xbe   : > { %v739_v61 = vpop.permute.xlu1 %738  ;;  %v1103_v7 = vsel %vm1094_vm0, %v619_v39, %v676_v58  ;;  %v249_v39 = vld [vmem:[%s4726_s14 + $0x40] sm:$0xff] }
  0xbf   : > { %v1128_v15 = vsel %vm1122_vm1, %v1103_v7, %v739_v61  ;;  %v250_v61 = vld [vmem:[%s4726_s14 + $0x48] sm:$0xff]  ;;  %v267_v3 = vpack.c.bf16 %v249_v39, %v249_v39  ;;  %v4220_v39 = vld [vmem:[%s6512_s1 + $0x54] sm:$0xf0] }
  0xc0   : > { %v5252_v53 = vsel %vm1141_vm2, %v1128_v15, %v5190_v11  ;;  %v418_v11 = vpack.c.bf16 %v3671_v28, %v3671_v28  ;;  %v268_v7 = vpack.c.bf16 %v250_v61, %v250_v61  ;;  %v3672_v15 = vld [vmem:[%s4726_s14 + $0x53] sm:$0xff] }
  0xc1   : > { %v607_v20 = vunpack.c.l.b16 %v267_v3 }
  0xc2   : > { %v1038_v17 = vpop.permute.xlu2 %1037  ;;  %v840_v45 = vunpack.c.l.b16 %v418_v11  ;;  %v3924_v11 = vld [vmem:[%s6512_s1 + $0x148] sm:$0xf] }
  0xc4   : > { %v854_v58 = vpack.c.b16 %v840_v45, %v839_v44  ;;  %v251_v45 = vld [vmem:[%s4726_s14 + $0x50] sm:$0xff] }
  0xc5   : > { %v910_v18 = vpop.permute.xlu0 %909  ;;  %v5247_v19 = vpop.f32.mrf.mxu2  ;;  %v269_v51 = vpack.c.bf16 %v251_v45, %v251_v45 }
  0xc6   : > { %v1177_v22 = vsel %vm1094_vm0, %v853_v10, %v910_v18  ;;  %v973_v23 = vpop.permute.xlu1 %972  ;;  %v3673_v18 = vld [vmem:[%s4726_s14 + $0x5b] sm:$0xff] }
  0xc7   : > { %v1201_v24 = vsel %vm1122_vm1, %v1177_v22, %v973_v23  ;;  %v608_v22 = vunpack.c.l.b16 %v268_v7  ;;  %v420_v23 = vpack.c.bf16 %v3673_v18, %v3673_v18 }
  0xc8   : > { %v5258_v29 = vsel %vm1141_vm2, %v1201_v24, %v1036_v37  ;;  %1728 = vmatmul.bf16.gmra.mxu0 %v5252_v53  ;;  %1890 = vmatmul.bf16.gmra.mxu3 %v5252_v53 }
  0xc9   : > { %6538 = vst [vmem:[#allocation6_spill] sm:$0xff] %v5258_v29  ;;  %1782 = vmatmul.bf16.gmra.mxu1 %v5258_v29  ;;  %v621_v27 = vpack.c.b16 %v608_v22, %v607_v20  ;;  %v842_v32 = vunpack.c.l.b16 %v420_v23  ;;  %v3908_v23 = vld [vmem:[%s6512_s1 + $0x128] sm:$0xf] }
  0xca   : > { %1939 = vmatmul.bf16.gmra.mxu2 %v5220_v50  ;;  %v5264_v35 = vpop.permute.xlu2 %805 }
  0xcd   : > { %v678_v40 = vpop.permute.xlu0 %677  ;;  %v5266_v37 = vpop.f32.mrf.mxu2 }
  0xce   : > { %v741_v43 = vpop.permute.xlu1 %740  ;;  %v1106_v49 = vsel %vm1094_vm0, %v620_v4, %v678_v40  ;;  %v4252_v40 = vld [vmem:[%s6512_s1 + $0x154] sm:$0xf0] }
  0xcf   : > { %v1130_v21 = vsel %vm1122_vm1, %v1106_v49, %v741_v43  ;;  %v3925_v43 = vor.u32 %v4252_v40, %v3924_v11  ;;  %v254_v11 = vld [vmem:[%s4726_s14 + $0x68] sm:$0xff] }
  0xd0   : > { %v5295_v12 = vsel %vm1141_vm2, %v1130_v21, %v5227_v56  ;;  %v419_v56 = vpack.c.bf16 %v3672_v15, %v3672_v15  ;;  %v3675_v21 = vld [vmem:[%s4726_s14 + $0x6b] sm:$0xff]  ;;  %v272_v46 = vpack.c.bf16 %v254_v11, %v254_v11 }
  0xd1   : > { %2093 = vmatpush.bf16.msrb.mxu3 %v3925_v43 }
  0xd2   : > { %v1040_v63 = vpop.permute.xlu2 %1039  ;;  %v841_v31 = vunpack.c.l.b16 %v419_v56 }
  0xd4   : > { %v855_v44 = vpack.c.b16 %v842_v32, %v841_v31  ;;  %v253_v32 = vld [vmem:[%s4726_s14 + $0x60] sm:$0xff] }
  0xd5   : > { %v912_v0 = vpop.permute.xlu0 %911  ;;  %v5290_v2 = vpop.f32.mrf.mxu2  ;;  %v271_v45 = vpack.c.bf16 %v253_v32, %v253_v32 }
  0xd6   : > { %v1180_v8 = vsel %vm1094_vm0, %v854_v58, %v912_v0  ;;  %v975_v10 = vpop.permute.xlu1 %974  ;;  %v3796_v58 = vld [vmem:[%s6512_s1 + $0x48] sm:$0xf] }
  0xd7   : > { %v1203_v9 = vsel %vm1122_vm1, %v1180_v8, %v975_v10  ;;  %v3797_v0 = vor.u32 %v4220_v39, %v3796_v58  ;;  %v609_v8 = vunpack.c.l.b16 %v269_v51  ;;  %v610_v10 = vunpack.c.l.b16 %v270_v54  ;;  %v3780_v39 = vld [vmem:[%s6512_s1 + $0x28] sm:$0xf] }
  0xd8   : > { %v5301_v38 = vsel %vm1141_vm2, %v1203_v9, %v1038_v17  ;;  %1733 = vmatmul.bf16.gmra.mxu0 %v5295_v12  ;;  %1895 = vmatmul.bf16.gmra.mxu3 %v5295_v12  ;;  %v422_v9 = vpack.c.bf16 %v3675_v21, %v3675_v21 }
  0xd9   : > { %6539 = vst [vmem:[#allocation7_spill] sm:$0xff] %v5301_v38  ;;  %1787 = vmatmul.bf16.gmra.mxu1 %v5301_v38  ;;  %v622_v18 = vpack.c.b16 %v610_v10, %v609_v8 }
  0xda   : > { %1944 = vmatmul.bf16.gmra.mxu2 %v5258_v29  ;;  %v808_v34 = vpop.permute.xlu2 %807  ;;  %2039 = vmatpush.bf16.msrb.mxu1 %v3797_v0  ;;  %v844_v56 = vunpack.c.l.b16 %v422_v9 }
  0xdd   : > { %v680_v24 = vpop.permute.xlu0 %679  ;;  %v5307_v28 = vpop.f32.mrf.mxu2 }
  0xde   : > { %v743_v17 = vpop.permute.xlu1 %742  ;;  %v1109_v4 = vsel %vm1094_vm0, %v621_v27, %v680_v24  ;;  %v4248_v24 = vld [vmem:[%s6512_s1 + $0x134] sm:$0xf0] }
  0xdf   : > { %v1132_v16 = vsel %vm1122_vm1, %v1109_v4, %v743_v17  ;;  %v3909_v17 = vor.u32 %v4248_v24, %v3908_v23  ;;  %v255_v23 = vld [vmem:[%s4726_s14 + $0x70] sm:$0xff]  ;;  %v256_v24 = vld [vmem:[%s4726_s14 + $0x78] sm:$0xff] }
  0xe0   : > { %v5330_v61 = vsel %vm1141_vm2, %v1132_v16, %v5264_v35  ;;  %v421_v35 = vpack.c.bf16 %v3674_v62, %v3674_v62  ;;  %v612_v62 = vunpack.c.l.b16 %v272_v46  ;;  %v273_v32 = vpack.c.bf16 %v255_v23, %v255_v23 }
  0xe1   : > { %6540 = vst [vmem:[#allocation8_spill] sm:$0xff] %v5330_v61  ;;  %2094 = vmatpush.bf16.msrb.mxu3 %v3909_v17  ;;  %v274_v11 = vpack.c.bf16 %v256_v24, %v256_v24 }
  0xe2   : > { %v1042_v7 = vpop.permute.xlu2 %1041  ;;  %v843_v22 = vunpack.c.l.b16 %v421_v35 }
  0xe4   : > { %v856_v31 = vpack.c.b16 %v844_v56, %v843_v22 }
  0xe5   : > { %v914_v48 = vpop.permute.xlu0 %913  ;;  %v5319_v49 = vpop.f32.mrf.mxu2 }
  0xe6   : > { %v1183_v1 = vsel %vm1094_vm0, %v855_v44, %v914_v48  ;;  %v977_v55 = vpop.permute.xlu1 %976 }
  0xe7   : > { %v1205_v36 = vsel %vm1122_vm1, %v1183_v1, %v977_v55  ;;  %v3676_v1 = vld [vmem:[%s4726_s14 + $0x73] sm:$0xff]  ;;  %v3677_v55 = vld [vmem:[%s4726_s14 + $0x7b] sm:$0xff] }
  0xe8   : > { %v5336_v3 = vsel %vm1141_vm2, %v1205_v36, %v1040_v63  ;;  %1738 = vmatmul.bf16.gmra.mxu0 %v5330_v61  ;;  %1900 = vmatmul.bf16.gmra.mxu3 %v5330_v61  ;;  %v611_v36 = vunpack.c.l.b16 %v271_v45  ;;  %v423_v0 = vpack.c.bf16 %v3676_v1, %v3676_v1 }
  0xe9   : > { %6541 = vst [vmem:[#allocation9_spill] sm:$0xff] %v5336_v3  ;;  %1792 = vmatmul.bf16.gmra.mxu1 %v5336_v3 }
  0xea   : > { %1949 = vmatmul.bf16.gmra.mxu2 %v5301_v38  ;;  %v810_v40 = vpop.permute.xlu2 %809  ;;  %v623_v35 = vpack.c.b16 %v612_v62, %v611_v36  ;;  %v3892_v36 = vld [vmem:[%s6512_s1 + $0x108] sm:$0xf]  ;;  %v4244_v62 = vld [vmem:[%s6512_s1 + $0x114] sm:$0xf0] }
  0xed   : > { %v682_v15 = vpop.permute.xlu0 %681  ;;  %v5342_v63 = vpop.f32.mrf.mxu2 }
  0xee   : > { %v745_v20 = vpop.permute.xlu1 %744  ;;  %v1112_v27 = vsel %vm1094_vm0, %v622_v18, %v682_v15  ;;  %v845_v18 = vunpack.c.l.b16 %v423_v0 }
  0xef   : > { %v1134_v4 = vsel %vm1122_vm1, %v1112_v27, %v745_v20 }
  0xf0   : > { %v5358_v51 = vsel %vm1141_vm2, %v1134_v4, %v808_v34  ;;  %v4216_v34 = vld [vmem:[%s6512_s1 + $0x34] sm:$0xf0] }
  0xf1   : > { %6542 = vst [vmem:[#allocation10_spill] sm:$0xff] %v5358_v51  ;;  %v3781_v21 = vor.u32 %v4216_v34, %v3780_v39  ;;  %v614_v39 = vunpack.c.l.b16 %v274_v11 }
  0xf2   : > { %v1044_v8 = vpop.permute.xlu2 %1043 }
  0xf3   : > { %2040 = vmatpush.bf16.msrb.mxu1 %v3781_v21  ;;  %v3764_v21 = vld [vmem:[%s6512_s1 + $0x8] sm:$0xf] }
  0xf5   : > { %v916_v43 = vpop.permute.xlu0 %915  ;;  %v5354_v44 = vpop.f32.mrf.mxu2 }
  0xf6   : > { %v1186_v16 = vsel %vm1094_vm0, %v856_v31, %v916_v43  ;;  %v979_v48 = vpop.permute.xlu1 %978 }
  0xf7   : > { %v1207_v54 = vsel %vm1122_vm1, %v1186_v16, %v979_v48  ;;  %v3678_v48 = vld [vmem:[%s4726_s14 + $0x83] sm:$0xff] }
  0xf8   : > { %v5364_v58 = vsel %vm1141_vm2, %v1207_v54, %v1042_v7  ;;  %1743 = vmatmul.bf16.gmra.mxu0 %v5358_v51  ;;  %1905 = vmatmul.bf16.gmra.mxu3 %v5358_v51  ;;  %v424_v7 = vpack.c.bf16 %v3677_v55, %v3677_v55  ;;  %v3679_v54 = vld [vmem:[%s4726_s14 + $0x8b] sm:$0xff]  ;;  %v613_v55 = vunpack.c.l.b16 %v273_v32  ;;  %v425_v34 = vpack.c.bf16 %v3678_v48, %v3678_v48 }
  0xf9   : > { %6543 = vst [vmem:[#allocation11_spill] sm:$0xff] %v5364_v58  ;;  %1797 = vmatmul.bf16.gmra.mxu1 %v5364_v58 }
  0xfa   : > { %1954 = vmatmul.bf16.gmra.mxu2 %v5336_v3  ;;  %v846_v20 = vunpack.c.l.b16 %v424_v7  ;;  %v812_v45 = vpop.permute.xlu2 %811  ;;  %v624_v7 = vpack.c.b16 %v614_v39, %v613_v55  ;;  %v4036_v55 = vld [vmem:[%s6512_s1 + $0x228] sm:$0xf]  ;;  %v4280_v39 = vld [vmem:[%s6512_s1 + $0x234] sm:$0xf0] }
  0xfc   : > { %v857_v56 = vpack.c.b16 %v846_v20, %v845_v18  ;;  %v847_v18 = vunpack.c.l.b16 %v425_v34 }
  0xfd   : > { %v684_v10 = vpop.permute.xlu0 %683  ;;  %v5376_v9 = vpop.f32.mrf.mxu2 }
  0xfe   : > { %v747_v15 = vpop.permute.xlu1 %746  ;;  %v1115_v22 = vsel %vm1094_vm0, %v623_v35, %v684_v10  ;;  %v3893_v10 = vor.u32 %v4244_v62, %v3892_v36  ;;  %v4212_v35 = vld [vmem:[%s6512_s1 + $0x14] sm:$0xf0] }
  0xff   : > { %v1136_v27 = vsel %vm1122_vm1, %v1115_v22, %v747_v15  ;;  %v3765_v22 = vor.u32 %v4212_v35, %v3764_v21  ;;  %v3680_v36 = vld [vmem:[%s4726_s14 + $0x93] sm:$0xff]  ;;  %v3681_v62 = vld [vmem:[%s4726_s14 + $0x9b] sm:$0xff]  ;;  %v4037_v21 = vor.u32 %v4280_v39, %v4036_v55 }
 0x100   : > { %v5386_v46 = vsel %vm1141_vm2, %v1136_v27, %v810_v40  ;;  %v426_v40 = vpack.c.bf16 %v3679_v54, %v3679_v54  ;;  %2095 = vmatpush.bf16.msrb.mxu3 %v3893_v10  ;;  %v257_v27 = vld [vmem:[%s4726_s14 + $0x80] sm:$0xff]  ;;  %v427_v35 = vpack.c.bf16 %v3680_v36, %v3680_v36 }
 0x101   : > { %2041 = vmatpush.bf16.msrb.mxu1 %v3765_v22  ;;  %2148 = vmatpush.bf16.msra.mxu2 %v4037_v21  ;;  %v4238_v22 = vld [vmem:[%s6512_s1 + $0xec] sm:$0xf]  ;;  %v5461_v39 = vld [vmem:[%s6513_s2] sm:$0xf] }
 0x102   : > { %v848_v20 = vunpack.c.l.b16 %v426_v40 }
 0x104   : > { %v858_v24 = vpack.c.b16 %v848_v20, %v847_v18  ;;  %v4278_v18 = vld [vmem:[%s6512_s1 + $0x22c] sm:$0xf]  ;;  %v4038_v20 = vld [vmem:[%s6512_s1 + $0x238] sm:$0xf0] }
 0x105   : > { %v918_v17 = vpop.permute.xlu0 %917  ;;  %v5382_v31 = vpop.f32.mrf.mxu2 }
 0x106   : > { %v1189_v4 = vsel %vm1094_vm0, %v857_v56, %v918_v17  ;;  %v981_v43 = vpop.permute.xlu1 %980  ;;  %v1046_v56 = vpop.permute.xlu2 %1045  ;;  %v258_v17 = vld [vmem:[%s4726_s14 + $0x88] sm:$0xff] }
 0x107   : > { %v1209_v16 = vsel %vm1122_vm1, %v1189_v4, %v981_v43  ;;  %v275_v43 = vpack.c.bf16 %v257_v27, %v257_v27  ;;  %v4041_v27 = vor.u32 %v4278_v18, %v4038_v20 }
 0x108   : > { %v5392_v1 = vsel %vm1141_vm2, %v1209_v16, %v1044_v8  ;;  %1748 = vmatmul.bf16.gmra.mxu0 %v5386_v46  ;;  %1910 = vmatmul.bf16.gmra.mxu3 %v5386_v46  ;;  %v276_v16 = vpack.c.bf16 %v258_v17, %v258_v17  ;;  %v3878_v17 = vld [vmem:[%s6512_s1 + $0xf8] sm:$0xf0] }
 0x109   : > { %1802 = vmatmul.bf16.gmra.mxu1 %v5392_v1  ;;  %2310 = vmatpush.bf16.msra.mxu3 %v4041_v27 }
 0x10a   : > { %1959 = vmatmul.bf16.gmra.mxu2 %v5364_v58  ;;  %v616_v10 = vunpack.c.l.b16 %v276_v16  ;;  %v849_v16 = vunpack.c.l.b16 %v427_v35 }
 0x10d   : > { %v686_v0 = vpop.permute.xlu0 %685  ;;  %v5407_v8 = vpop.f32.mrf.mxu2 }
 0x10e   : > { %v749_v15 = vpop.permute.xlu1 %748  ;;  %v1118_v23 = vsel %vm1094_vm0, %v624_v7, %v686_v0  ;;  %v615_v7 = vunpack.c.l.b16 %v275_v43 }
 0x10f   : > { %v1138_v32 = vsel %vm1122_vm1, %v1118_v23, %v749_v15  ;;  %v428_v15 = vpack.c.bf16 %v3681_v62, %v3681_v62  ;;  %v5465_v62 = vperm.slane %v5461_v39, 0 }
 0x110   : > { %v5426_v34 = vsel %vm1141_vm2, %v1138_v32, %v812_v45  ;;  %v814_v45 = vpop.permute.xlu2 %813  ;;  %v625_v23 = vpack.c.b16 %v616_v10, %v615_v7  ;;  %v4270_v32 = vld [vmem:[%s6512_s1 + $0x1ec] sm:$0xf] }
 0x115   : > { %v920_v11 = vpop.permute.xlu0 %919  ;;  %v5416_v4 = vpop.f32.mrf.mxu2 }
 0x116   : > { %v1192_v48 = vsel %vm1094_vm0, %v858_v24, %v920_v11  ;;  %v983_v54 = vpop.permute.xlu1 %982  ;;  %v4006_v11 = vld [vmem:[%s6512_s1 + $0x1f8] sm:$0xf0] }
 0x117   : > { %v1211_v40 = vsel %vm1122_vm1, %v1192_v48, %v983_v54  ;;  %v850_v48 = vunpack.c.l.b16 %v428_v15  ;;  %v3881_v54 = vor.u32 %v4238_v22, %v3878_v17  ;;  %v4009_v55 = vor.u32 %v4270_v32, %v4006_v11 }
 0x118   : > { %v5432_v0 = vsel %vm1141_vm2, %v1211_v40, %v1046_v56  ;;  %1753 = vmatmul.bf16.gmra.mxu0 %v5426_v34  ;;  %1915 = vmatmul.bf16.gmra.mxu3 %v5426_v34  ;;  %v1048_v7 = vpop.permute.xlu2 %1047 }
 0x119   : > { %1807 = vmatmul.bf16.gmra.mxu1 %v5432_v0  ;;  %2196 = vmatpush.bf16.msra.mxu0 %v3881_v54  ;;  %v859_v36 = vpack.c.b16 %v850_v48, %v849_v16  ;;  %v3862_v54 = vld [vmem:[%s6512_s1 + $0xd8] sm:$0xf0] }
 0x11a   : > { %1964 = vmatmul.bf16.gmra.mxu2 %v5392_v1  ;;  %2250 = vmatpush.bf16.msra.mxu1 %v4009_v55 }
 0x11d   : > { %v688_v56 = vpop.permute.xlu0 %687  ;;  %v5447_v24 = vpop.f32.mrf.mxu2 }
 0x11e   : > { %v751_v43 = vpop.permute.xlu1 %750  ;;  %v1121_v40 = vsel %vm1094_vm0, %v625_v23, %v688_v56  ;;  %v4020_v56 = vld [vmem:[%s6512_s1 + $0x208] sm:$0xf]  ;;  %v4276_v23 = vld [vmem:[%s6512_s1 + $0x214] sm:$0xf0] }
 0x11f   : > { %v1140_v21 = vsel %vm1122_vm1, %v1121_v40, %v751_v43  ;;  %v4021_v32 = vor.u32 %v4276_v23, %v4020_v56  ;;  %v4266_v23 = vld [vmem:[%s6512_s1 + $0x1cc] sm:$0xf] }
 0x120   : > { %v5479_v27 = vsel %vm1141_vm2, %v1140_v21, %v814_v45  ;;  %v4234_v45 = vld [vmem:[%s6512_s1 + $0xcc] sm:$0xf] }
 0x121   : > { %2149 = vmatpush.bf16.msra.mxu2 %v4021_v32  ;;  %v3865_v40 = vor.u32 %v4234_v45, %v3862_v54 }
 0x123   : > { %2197 = vmatpush.bf16.msra.mxu0 %v3865_v40 }
 0x125   : > { %v922_v10 = vpop.permute.xlu0 %921  ;;  %v1719_v35 = vpop.f32.mrf.mxu0 }
 0x126   : > { %v1195_v15 = vsel %vm1094_vm0, %v859_v36, %v922_v10  ;;  %v1720_v18 = vadd.f32 %v1719_v35, %v5465_v62  ;;  %v1773_v20 = vpop.f32.mrf.mxu1  ;;  %v5470_v22 = vpop.f32.mrf.mxu2 }
 0x127   : > { %v985_v17 = vpop.permute.xlu1 %984 }
 0x128   : > { %v1774_v11 = vadd.f32 %v1773_v20, %v1720_v18  ;;  %v1213_v43 = vsel %vm1122_vm1, %v1195_v15, %v985_v17  ;;  %1758 = vmatmul.bf16.gmra.mxu0 %v5479_v27  ;;  %1920 = vmatmul.bf16.gmra.mxu3 %v5479_v27  ;;  %v3990_v17 = vld [vmem:[%s6512_s1 + $0x1d8] sm:$0xf0] }
 0x129   : > { %v5485_v16 = vsel %vm1141_vm2, %v1213_v43, %v1048_v7  ;;  %v3993_v43 = vor.u32 %v4266_v23, %v3990_v17 }
 0x12a   : > { %1812 = vmatmul.bf16.gmra.mxu1 %v5485_v16  ;;  %1969 = vmatmul.bf16.gmra.mxu2 %v5432_v0  ;;  %v1828_v10 = vadd.f32 %v5192_v13, %v1774_v11 }
 0x12b   : > { %v1881_v48 = vpop.f32.mrf.mxu3  ;;  %2251 = vmatpush.bf16.msra.mxu1 %v3993_v43 }
 0x12c   : > { %v2358_v20 = vmax.f32 %v1828_v10, 0.0 }
 0x12d   : > { %v1721_v55 = vpop.f32.mrf.mxu0 }
 0x12e   : > { %v1722_v36 = vadd.f32 %v1721_v55, %v5465_v62  ;;  %v1775_v21 = vpop.f32.mrf.mxu1  ;;  %v5496_v7 = vpop.f32.mrf.mxu2  ;;  %v5515_v55 = vperm.slane %v5461_v39, 1 }
 0x130   : > { %v1776_v35 = vadd.f32 %v1775_v21, %v1722_v36  ;;  %v1882_v36 = vadd.f32 %v1881_v48, %v5515_v55  ;;  %v3846_v48 = vld [vmem:[%s6512_s1 + $0xb8] sm:$0xf0] }
 0x132   : > { %v1830_v15 = vadd.f32 %v5208_v41, %v1776_v35 }
 0x133   : > { %v1883_v18 = vpop.f32.mrf.mxu3 }
 0x134   : > { %v2362_v56 = vmax.f32 %v1830_v15, 0.0 }
 0x135   : > { %v1724_v32 = vpop.f32.mrf.mxu0 }
 0x136   : > { %v5506_v45 = vpack.c.bf16 %v2362_v56, %v2358_v20  ;;  %v1725_v13 = vadd.f32 %v1724_v32, %v5465_v62  ;;  %v1778_v11 = vpop.f32.mrf.mxu1  ;;  %v5509_v54 = vpop.f32.mrf.mxu2 }
 0x138   : > { %v1779_v41 = vadd.f32 %v1778_v11, %v1725_v13  ;;  %4051 = vmatmul.msk.bf16.vlgmr.msrb.gmra.mxu0 %vm1094_vm0, %v4738_v30  ;;  %2096 = vmatmul.bf16.vlgmr.msrb.gmra.mxu3 %v5172_v57  ;;  %v4230_v11 = vld [vmem:[%s6512_s1 + $0xac] sm:$0xf] }
 0x13a   : > { %2042 = vmatmul.bf16.vlgmr.msrb.gmra.mxu1 %v5167_v52  ;;  %1974 = vmatmul.bf16.gmra.mxu2 %v5485_v16  ;;  %v1833_v56 = vadd.f32 %v5229_v60, %v1779_v41  ;;  %v4262_v60 = vld [vmem:[%s6512_s1 + $0x1ac] sm:$0xf] }
 0x13b   : > { %v1886_v40 = vpop.f32.mrf.mxu3 }
 0x13c   : > { %v2366_v43 = vmax.f32 %v1833_v56, 0.0 }
 0x13d   : > { %v1726_v21 = vpop.f32.mrf.mxu0 }
 0x13e   : > { %v1727_v10 = vadd.f32 %v1726_v21, %v5465_v62  ;;  %v1780_v35 = vpop.f32.mrf.mxu1  ;;  %v1935_v15 = vpop.f32.mrf.mxu2  ;;  %v1884_v21 = vadd.f32 %v1883_v18, %v5515_v55 }
 0x13f   : > { %v5521_v20 = vadd.f32 %v1935_v15, %v1882_v36  ;;  %v3849_v15 = vor.u32 %v4230_v11, %v3846_v48  ;;  %v1887_v48 = vadd.f32 %v1886_v40, %v5515_v55  ;;  %v3830_v40 = vld [vmem:[%s6512_s1 + $0x98] sm:$0xf0] }
 0x140   : > { %v1781_v23 = vadd.f32 %v1780_v35, %v1727_v10 }
 0x141   : > { %2198 = vmatpush.bf16.msra.mxu0 %v3849_v15 }
 0x142   : > { %v1835_v17 = vadd.f32 %v5247_v19, %v1781_v23  ;;  %v3974_v19 = vld [vmem:[%s6512_s1 + $0x1b8] sm:$0xf0] }
 0x143   : > { %v1888_v32 = vpop.f32.mrf.mxu3  ;;  %v3977_v56 = vor.u32 %v4262_v60, %v3974_v19 }
 0x144   : > { %v2370_v13 = vmax.f32 %v1835_v17, 0.0 }
 0x145   : > { %v1729_v36 = vpop.f32.mrf.mxu0  ;;  %2252 = vmatpush.bf16.msra.mxu1 %v3977_v56 }
 0x146   : > { %v1730_v41 = vadd.f32 %v1729_v36, %v5465_v62  ;;  %v1783_v10 = vpop.f32.mrf.mxu1  ;;  %v1937_v35 = vpop.f32.mrf.mxu2  ;;  %v5539_v23 = vpack.c.bf16 %v2370_v13, %v2366_v43 }
 0x147   : > { %v5541_v17 = vadd.f32 %v1937_v35, %v1884_v21 }
 0x148   : > { %6544 = vst [vmem:[#allocation12_spill] sm:$0xff] %v5539_v23  ;;  %v1784_v18 = vadd.f32 %v1783_v10, %v1730_v41  ;;  %4052 = vmatmul.msk.bf16.gmra.mxu0 %vm1094_vm0, %v4759_v6  ;;  %2101 = vmatmul.bf16.gmra.mxu3 %v5220_v50  ;;  %v4226_v23 = vld [vmem:[%s6512_s1 + $0x8c] sm:$0xf] }
 0x14a   : > { %2047 = vmatmul.bf16.gmra.mxu1 %v5213_v47  ;;  %4060 = vmatmul.msk.bf16.vlgmr.msra.gmra.mxu2 %vm1094_vm0, %v4738_v30  ;;  %v1838_v60 = vadd.f32 %v5266_v37, %v1784_v18  ;;  %v4258_v37 = vld [vmem:[%s6512_s1 + $0x18c] sm:$0xf] }
 0x14b   : > { %v1891_v11 = vpop.f32.mrf.mxu3 }
 0x14c   : > { %v2374_v35 = vmax.f32 %v1838_v60, 0.0 }
 0x14d   : > { %v1731_v43 = vpop.f32.mrf.mxu0 }
 0x14e   : > { %v1732_v13 = vadd.f32 %v1731_v43, %v5465_v62  ;;  %v1785_v21 = vpop.f32.mrf.mxu1  ;;  %v1940_v36 = vpop.f32.mrf.mxu2  ;;  %v1889_v43 = vadd.f32 %v1888_v32, %v5515_v55 }
 0x14f   : > { %v5551_v15 = vadd.f32 %v1940_v36, %v1887_v48  ;;  %v3833_v36 = vor.u32 %v4226_v23, %v3830_v40  ;;  %v1892_v40 = vadd.f32 %v1891_v11, %v5515_v55  ;;  %v4022_v11 = vld [vmem:[%s6512_s1 + $0x218] sm:$0xf0] }
 0x150   : > { %v1786_v19 = vadd.f32 %v1785_v21, %v1732_v13 }
 0x151   : > { %2199 = vmatpush.bf16.msra.mxu0 %v3833_v36 }
 0x152   : > { %v1840_v41 = vadd.f32 %v5290_v2, %v1786_v19  ;;  %v3958_v2 = vld [vmem:[%s6512_s1 + $0x198] sm:$0xf0] }
 0x153   : > { %v1893_v10 = vpop.f32.mrf.mxu3  ;;  %v3961_v60 = vor.u32 %v4258_v37, %v3958_v2 }
 0x154   : > { %v2378_v56 = vmax.f32 %v1840_v41, 0.0 }
 0x155   : > { %v1734_v48 = vpop.f32.mrf.mxu0  ;;  %2253 = vmatpush.bf16.msra.mxu1 %v3961_v60 }
 0x156   : > { %v1735_v18 = vadd.f32 %v1734_v48, %v5465_v62  ;;  %v1788_v13 = vpop.f32.mrf.mxu1  ;;  %v1942_v21 = vpop.f32.mrf.mxu2  ;;  %v5569_v19 = vpack.c.bf16 %v2378_v56, %v2374_v35 }
 0x157   : > { %v5571_v41 = vadd.f32 %v1942_v21, %v1889_v43 }
 0x158   : > { %6545 = vst [vmem:[#allocation13_spill] sm:$0xff] %v5569_v19  ;;  %v1789_v32 = vadd.f32 %v1788_v13, %v1735_v18  ;;  %4053 = vmatmul.msk.bf16.gmra.mxu0 %vm1094_vm0, %v4779_v42  ;;  %2106 = vmatmul.bf16.gmra.mxu3 %v5258_v29  ;;  %v4274_v19 = vld [vmem:[%s6512_s1 + $0x20c] sm:$0xf] }
 0x15a   : > { %2052 = vmatmul.bf16.gmra.mxu1 %v5252_v53  ;;  %4061 = vmatmul.msk.bf16.gmra.mxu2 %vm1094_vm0, %v4759_v6  ;;  %v1843_v37 = vadd.f32 %v5307_v28, %v1789_v32  ;;  %v4222_v28 = vld [vmem:[%s6512_s1 + $0x6c] sm:$0xf] }
 0x15b   : > { %v1896_v23 = vpop.f32.mrf.mxu3  ;;  %v4254_v32 = vld [vmem:[%s6512_s1 + $0x16c] sm:$0xf] }
 0x15c   : > { %v2382_v21 = vmax.f32 %v1843_v37, 0.0 }
 0x15d   : > { %v1736_v35 = vpop.f32.mrf.mxu0 }
 0x15e   : > { %v1737_v56 = vadd.f32 %v1736_v35, %v5465_v62  ;;  %v1790_v43 = vpop.f32.mrf.mxu1  ;;  %v1945_v48 = vpop.f32.mrf.mxu2  ;;  %v1894_v35 = vadd.f32 %v1893_v10, %v5515_v55  ;;  %v3942_v10 = vld [vmem:[%s6512_s1 + $0x178] sm:$0xf0] }
 0x15f   : > { %v5581_v36 = vadd.f32 %v1945_v48, %v1892_v40  ;;  %v4025_v48 = vor.u32 %v4274_v19, %v4022_v11  ;;  %v3945_v11 = vor.u32 %v4254_v32, %v3942_v10 }
 0x160   : > { %v1791_v2 = vadd.f32 %v1790_v43, %v1737_v56 }
 0x161   : > { %2311 = vmatpush.bf16.msra.mxu3 %v4025_v48  ;;  %2254 = vmatpush.bf16.msra.mxu1 %v3945_v11  ;;  %v4218_v11 = vld [vmem:[%s6512_s1 + $0x4c] sm:$0xf] }
 0x162   : > { %v1845_v18 = vadd.f32 %v5319_v49, %v1791_v2  ;;  %v3814_v49 = vld [vmem:[%s6512_s1 + $0x78] sm:$0xf0] }
 0x163   : > { %v1898_v13 = vpop.f32.mrf.mxu3  ;;  %v3817_v2 = vor.u32 %v4222_v28, %v3814_v49 }
 0x164   : > { %v2386_v60 = vmax.f32 %v1845_v18, 0.0 }
 0x165   : > { %v1739_v40 = vpop.f32.mrf.mxu0  ;;  %2200 = vmatpush.bf16.msra.mxu0 %v3817_v2 }
 0x166   : > { %v1740_v56 = vadd.f32 %v1739_v40, %v5465_v62  ;;  %v1793_v43 = vpop.f32.mrf.mxu1  ;;  %v1947_v37 = vpop.f32.mrf.mxu2  ;;  %v5605_v19 = vpack.c.bf16 %v2386_v60, %v2382_v21  ;;  %v1897_v21 = vadd.f32 %v1896_v23, %v5515_v55  ;;  %v3798_v23 = vld [vmem:[%s6512_s1 + $0x58] sm:$0xf0] }
 0x167   : > { %v5607_v18 = vadd.f32 %v1947_v37, %v1894_v35 }
 0x168   : > { %6546 = vst [vmem:[#allocation14_spill] sm:$0xff] %v5605_v19  ;;  %v1794_v29 = vadd.f32 %v1793_v43, %v1740_v56  ;;  %4054 = vmatmul.msk.bf16.gmra.mxu0 %vm1094_vm0, %v4799_v14  ;;  %2111 = vmatmul.bf16.gmra.mxu3 %v5301_v38 }
 0x16a   : > { %2057 = vmatmul.bf16.gmra.mxu1 %v5295_v12  ;;  %4062 = vmatmul.msk.bf16.gmra.mxu2 %vm1094_vm0, %v4779_v42  ;;  %v1848_v32 = vadd.f32 %v5342_v63, %v1794_v29 }
 0x16b   : > { %v1901_v40 = vpop.f32.mrf.mxu3 }
 0x16c   : > { %v2390_v2 = vmax.f32 %v1848_v32, 0.0 }
 0x16d   : > { %v1741_v60 = vpop.f32.mrf.mxu0 }
 0x16e   : > { %v1742_v35 = vadd.f32 %v1741_v60, %v5465_v62  ;;  %v1795_v48 = vpop.f32.mrf.mxu1  ;;  %v1950_v28 = vpop.f32.mrf.mxu2  ;;  %v1899_v60 = vadd.f32 %v1898_v13, %v5515_v55 }
 0x16f   : > { %v5617_v49 = vadd.f32 %v1950_v28, %v1897_v21  ;;  %v3801_v28 = vor.u32 %v4218_v11, %v3798_v23 }
 0x170   : > { %v1796_v56 = vadd.f32 %v1795_v48, %v1742_v35 }
 0x171   : > { %2201 = vmatpush.bf16.msra.mxu0 %v3801_v28 }
 0x172   : > { %v1850_v43 = vadd.f32 %v5354_v44, %v1796_v56  ;;  %v4250_v56 = vld [vmem:[%s6512_s1 + $0x14c] sm:$0xf] }
 0x173   : > { %v1903_v37 = vpop.f32.mrf.mxu3 }
 0x174   : > { %v2394_v10 = vmax.f32 %v1850_v43, 0.0  ;;  %v3926_v43 = vld [vmem:[%s6512_s1 + $0x158] sm:$0xf0] }
 0x175   : > { %v1744_v21 = vpop.f32.mrf.mxu0  ;;  %v3929_v11 = vor.u32 %v4250_v56, %v3926_v43 }
 0x176   : > { %v1745_v29 = vadd.f32 %v1744_v21, %v5465_v62  ;;  %v1798_v63 = vpop.f32.mrf.mxu1  ;;  %v1952_v35 = vpop.f32.mrf.mxu2  ;;  %v5629_v44 = vpack.c.bf16 %v2394_v10, %v2390_v2  ;;  %v1902_v2 = vadd.f32 %v1901_v40, %v5515_v55 }
 0x177   : > { %v5631_v48 = vadd.f32 %v1952_v35, %v1899_v60  ;;  %2255 = vmatpush.bf16.msra.mxu1 %v3929_v11 }
 0x178   : > { %6547 = vst [vmem:[#allocation15_spill] sm:$0xff] %v5629_v44  ;;  %v1799_v32 = vadd.f32 %v1798_v63, %v1745_v29  ;;  %4055 = vmatmul.msk.bf16.gmra.mxu0 %vm1094_vm0, %v4840_v59  ;;  %2116 = vmatmul.bf16.gmra.mxu3 %v5336_v3 }
 0x17a   : > { %2062 = vmatmul.bf16.gmra.mxu1 %v5330_v61  ;;  %4063 = vmatmul.msk.bf16.gmra.mxu2 %vm1094_vm0, %v4799_v14  ;;  %v1853_v29 = vadd.f32 %v5376_v9, %v1799_v32  ;;  %v1904_v61 = vadd.f32 %v1903_v37, %v5515_v55  ;;  %v4246_v32 = vld [vmem:[%s6512_s1 + $0x12c] sm:$0xf] }
 0x17b   : > { %v1906_v13 = vpop.f32.mrf.mxu3 }
 0x17c   : > { %v2398_v19 = vmax.f32 %v1853_v29, 0.0 }
 0x17d   : > { %v1746_v10 = vpop.f32.mrf.mxu0 }
 0x17e   : > { %v1747_v23 = vadd.f32 %v1746_v10, %v5465_v62  ;;  %v1800_v60 = vpop.f32.mrf.mxu1  ;;  %v1955_v21 = vpop.f32.mrf.mxu2 }
 0x17f   : > { %v5647_v28 = vadd.f32 %v1955_v21, %v1902_v2 }
 0x180   : > { %v1801_v63 = vadd.f32 %v1800_v60, %v1747_v23  ;;  %v3910_v23 = vld [vmem:[%s6512_s1 + $0x138] sm:$0xf0] }
 0x182   : > { %v1855_v35 = vadd.f32 %v5382_v31, %v1801_v63  ;;  %v4214_v31 = vld [vmem:[%s6512_s1 + $0x2c] sm:$0xf]  ;;  %v3913_v63 = vor.u32 %v4246_v32, %v3910_v23  ;;  %v4288_v23 = vld [vmem:[%s6514_s3 + $0x38] sm:$0xff] }
 0x183   : > { %v1908_v44 = vpop.f32.mrf.mxu3  ;;  %2726 = vmatpush.bf16.msrb.mxu2 %v4288_v23 }
 0x184   : > { %v2402_v3 = vmax.f32 %v1855_v35, 0.0  ;;  %2256 = vmatpush.bf16.msra.mxu1 %v3913_v63 }
 0x185   : > { %v1749_v40 = vpop.f32.mrf.mxu0 }
 0x186   : > { %v1750_v56 = vadd.f32 %v1749_v40, %v5465_v62  ;;  %v1803_v43 = vpop.f32.mrf.mxu1  ;;  %v1957_v10 = vpop.f32.mrf.mxu2  ;;  %v5653_v38 = vpack.c.bf16 %v2402_v3, %v2398_v19  ;;  %v1907_v3 = vadd.f32 %v1906_v13, %v5515_v55 }
 0x187   : > { %v5655_v2 = vadd.f32 %v1957_v10, %v1904_v61  ;;  %v3782_v61 = vld [vmem:[%s6512_s1 + $0x38] sm:$0xf0] }
 0x188   : > { %6548 = vst [vmem:[#allocation16_spill] sm:$0xff] %v5653_v38  ;;  %v1804_v11 = vadd.f32 %v1803_v43, %v1750_v56  ;;  %4056 = vmatmul.msk.bf16.gmra.mxu0 %vm1094_vm0, %v4933_v5  ;;  %2121 = vmatmul.bf16.gmra.mxu3 %v5364_v58  ;;  %v3785_v37 = vor.u32 %v4214_v31, %v3782_v61 }
 0x189   : > { %v1909_v61 = vadd.f32 %v1908_v44, %v5515_v55 }
 0x18a   : > { %2067 = vmatmul.bf16.gmra.mxu1 %v5358_v51  ;;  %4064 = vmatmul.msk.bf16.gmra.mxu2 %vm1094_vm0, %v4840_v59  ;;  %v1858_v13 = vadd.f32 %v5407_v8, %v1804_v11  ;;  %v4210_v8 = vld [vmem:[%s6512_s1 + $0xc] sm:$0xf] }
 0x18b   : > { %v1911_v9 = vpop.f32.mrf.mxu3  ;;  %2202 = vmatpush.bf16.msra.mxu0 %v3785_v37 }
 0x18c   : > { %v2406_v10 = vmax.f32 %v1858_v13, 0.0 }
 0x18d   : > { %v1751_v19 = vpop.f32.mrf.mxu0 }
 0x18e   : > { %v1752_v60 = vadd.f32 %v1751_v19, %v5465_v62  ;;  %v1805_v21 = vpop.f32.mrf.mxu1  ;;  %v1960_v29 = vpop.f32.mrf.mxu2 }
 0x18f   : > { %v5677_v35 = vadd.f32 %v1960_v29, %v1907_v3 }
 0x190   : > { %v1806_v40 = vadd.f32 %v1805_v21, %v1752_v60  ;;  %v1912_v60 = vadd.f32 %v1911_v9, %v5515_v55 }
 0x192   : > { %v1860_v56 = vadd.f32 %v5416_v4, %v1806_v40 }
 0x193   : > { %v1913_v43 = vpop.f32.mrf.mxu3 }
 0x194   : > { %v2410_v31 = vmax.f32 %v1860_v56, 0.0  ;;  %v4287_v56 = vld [vmem:[%s6514_s3 + $0x30] sm:$0xff] }
 0x195   : > { %v1754_v38 = vpop.f32.mrf.mxu0  ;;  %2727 = vmatpush.bf16.msrb.mxu2 %v4287_v56 }
 0x196   : > { %v1755_v19 = vadd.f32 %v1754_v38, %v5465_v62  ;;  %v1808_v58 = vpop.f32.mrf.mxu1  ;;  %v1962_v51 = vpop.f32.mrf.mxu2  ;;  %v5683_v32 = vpack.c.bf16 %v2410_v31, %v2406_v10  ;;  %v3766_v38 = vld [vmem:[%s6512_s1 + $0x18] sm:$0xf0] }
 0x197   : > { %v5685_v3 = vadd.f32 %v1962_v51, %v1909_v61  ;;  %v3769_v4 = vor.u32 %v4210_v8, %v3766_v38  ;;  %v4242_v51 = vld [vmem:[%s6512_s1 + $0x10c] sm:$0xf] }
 0x198   : > { %v1809_v37 = vadd.f32 %v1808_v58, %v1755_v19  ;;  %4057 = vmatmul.msk.bf16.gmra.mxu0 %vm1094_vm0, %v5041_v25  ;;  %2126 = vmatmul.bf16.gmra.mxu3 %v5392_v1  ;;  %v3894_v58 = vld [vmem:[%s6512_s1 + $0x118] sm:$0xf0]  ;;  %v4286_v19 = vld [vmem:[%s6514_s3 + $0x28] sm:$0xff] }
 0x199   : > { %2203 = vmatpush.bf16.msra.mxu0 %v3769_v4  ;;  %v3897_v11 = vor.u32 %v4242_v51, %v3894_v58  ;;  %v1914_v4 = vadd.f32 %v1913_v43, %v5515_v55  ;;  %2728 = vmatpush.bf16.msrb.mxu2 %v4286_v19  ;;  %v4312_v43 = vld [vmem:[%s6514_s3 + $0xf8] sm:$0xff] }
 0x19a   : > { %2072 = vmatmul.bf16.gmra.mxu1 %v5386_v46  ;;  %4065 = vmatmul.msk.bf16.gmra.mxu2 %vm1094_vm0, %v4933_v5  ;;  %v1863_v10 = vadd.f32 %v5447_v24, %v1809_v37 }
 0x19b   : > { %v1916_v44 = vpop.f32.mrf.mxu3  ;;  %2257 = vmatpush.bf16.msra.mxu1 %v3897_v11  ;;  %2888 = vmatpush.bf16.msrb.mxu3 %v4312_v43 }
 0x19c   : > { %v2414_v8 = vmax.f32 %v1863_v10, 0.0 }
 0x19d   : > { %v1756_v21 = vpop.f32.mrf.mxu0 }
 0x19e   : > { %v1757_v29 = vadd.f32 %v1756_v21, %v5465_v62  ;;  %v1810_v63 = vpop.f32.mrf.mxu1  ;;  %v1965_v13 = vpop.f32.mrf.mxu2 }
 0x19f   : > { %v5710_v40 = vadd.f32 %v1965_v13, %v1912_v60  ;;  %v1917_v13 = vadd.f32 %v1916_v44, %v5515_v55  ;;  %v4304_v44 = vld [vmem:[%s6514_s3 + $0xb8] sm:$0xff] }
 0x1a0   : > { %v1811_v31 = vadd.f32 %v1810_v63, %v1757_v29  ;;  %v4284_v29 = vld [vmem:[%s6514_s3 + $0x18] sm:$0xff]  ;;  %2834 = vmatpush.bf16.msrb.mxu1 %v4304_v44 }
 0x1a1   : > { %v4296_v63 = vld [vmem:[%s6514_s3 + $0x78] sm:$0xff] }
 0x1a2   : > { %v1865_v61 = vadd.f32 %v5470_v22, %v1811_v31  ;;  %v4285_v22 = vld [vmem:[%s6514_s3 + $0x20] sm:$0xff]  ;;  %2780 = vmatpush.bf16.msrb.mxu0 %v4296_v63 }
 0x1a3   : > { %v1918_v9 = vpop.f32.mrf.mxu3  ;;  %2729 = vmatpush.bf16.msrb.mxu2 %v4285_v22 }
 0x1a4   : > { %v2418_v38 = vmax.f32 %v1865_v61, 0.0  ;;  %v1919_v22 = vadd.f32 %v1918_v9, %v5515_v55 }
 0x1a5   : > { %v1759_v51 = vpop.f32.mrf.mxu0 }
 0x1a6   : > { %v1760_v58 = vadd.f32 %v1759_v51, %v5465_v62  ;;  %v1967_v11 = vpop.f32.mrf.mxu2  ;;  %v5722_v23 = vpack.c.bf16 %v2418_v38, %v2414_v8  ;;  %v4283_v8 = vld [vmem:[%s6514_s3 + $0x10] sm:$0xff] }
 0x1a7   : > { %v1813_v24 = vpop.f32.mrf.mxu1  ;;  %v5724_v37 = vadd.f32 %v1967_v11, %v1914_v4  ;;  %2730 = vmatpush.bf16.msrb.mxu2 %v4284_v29  ;;  %v5762_v29 = vperm.slane %v5461_v39, 2 }
 0x1a8   : > { %v1814_v60 = vadd.f32 %v1813_v24, %v1760_v58  ;;  %4058 = vmatmul.msk.bf16.gmra.mxu0 %vm1094_vm0, %v5112_v26  ;;  %2131 = vmatmul.bf16.gmra.mxu3 %v5432_v0  ;;  %v4282_v58 = vld [vmem:[%s6514_s3 + $0x8] sm:$0xff] }
 0x1aa   : > { %2077 = vmatmul.bf16.gmra.mxu1 %v5426_v34  ;;  %4066 = vmatmul.msk.bf16.gmra.mxu2 %vm1094_vm0, %v5041_v25  ;;  %v1868_v38 = vadd.f32 %v5496_v7, %v1814_v60 }
 0x1ab   : > { %v1921_v21 = vpop.f32.mrf.mxu3  ;;  %2731 = vmatpush.bf16.msrb.mxu2 %v4283_v8 }
 0x1ac   : > { %v2422_v11 = vmax.f32 %v1868_v38, 0.0 }
 0x1ad   : > { %v1761_v56 = vpop.f32.mrf.mxu0 }
 0x1ae   : > { %v1762_v10 = vadd.f32 %v1761_v56, %v5465_v62  ;;  %v1970_v31 = vpop.f32.mrf.mxu2  ;;  %v4281_v56 = vld [vmem:[%s6514_s3] sm:$0xff] }
 0x1af   : > { %v1815_v61 = vpop.f32.mrf.mxu1  ;;  %v5746_v19 = vadd.f32 %v1970_v31, %v1917_v13  ;;  %2732 = vmatpush.bf16.msrb.mxu2 %v4282_v58  ;;  %v1922_v31 = vadd.f32 %v1921_v21, %v5515_v55 }
 0x1b0   : > { %v1816_v4 = vadd.f32 %v1815_v61, %v1762_v10  ;;  %v4311_v10 = vld [vmem:[%s6514_s3 + $0xf0] sm:$0xff] }
 0x1b1   : > { %2889 = vmatpush.bf16.msrb.mxu3 %v4311_v10 }
 0x1b2   : > { %v1870_v51 = vadd.f32 %v5509_v54, %v1816_v4 }
 0x1b3   : > { %v1923_v62 = vpop.f32.mrf.mxu3  ;;  %2733 = vmatpush.bf16.msrb.mxu2 %v4281_v56 }
 0x1b4   : > { %v2426_v24 = vmax.f32 %v1870_v51, 0.0 }
 0x1b5   : > { %v1989_v43 = vpop.f32.mrf.mxu0 }
 0x1b6   : > { %v1990_v7 = vadd.f32 %v1989_v43, %v5521_v20  ;;  %v1972_v60 = vpop.f32.mrf.mxu2  ;;  %v5764_v63 = vpack.c.bf16 %v2426_v24, %v2422_v11  ;;  %v4295_v11 = vld [vmem:[%s6514_s3 + $0x70] sm:$0xff] }
 0x1b7   : > { %v5766_v54 = vadd.f32 %v1972_v60, %v1919_v22  ;;  %v2043_v13 = vpop.f32.mrf.mxu1  ;;  %v4303_v24 = vld [vmem:[%s6514_s3 + $0xb0] sm:$0xff]  ;;  %2781 = vmatpush.bf16.msrb.mxu0 %v4295_v11  ;;  %v1924_v60 = vadd.f32 %v1923_v62, %v5515_v55 }
 0x1b8   : > { %4059 = vmatmul.msk.bf16.gmra.mxu0 %vm1094_vm0, %v5154_v33  ;;  %2136 = vmatmul.bf16.gmra.mxu3 %v5485_v16  ;;  %v2044_v20 = vadd.f32 %v2043_v13, %v5762_v29  ;;  %v2359_v51 = vmax.f32 %v1990_v7, 0.0 }
 0x1b9   : > { %2835 = vmatpush.bf16.msrb.mxu1 %v4303_v24 }
 0x1ba   : > { %2082 = vmatmul.bf16.gmra.mxu1 %v5479_v27  ;;  %4067 = vmatmul.msk.bf16.gmra.mxu2 %vm1094_vm0, %v5112_v26 }
 0x1bb   : > { %v2097_v39 = vpop.f32.mrf.mxu3 }
 0x1bc   : > { %v2098_v9 = vadd.f32 %v2097_v39, %v2044_v20 }
 0x1bd   : > { %v1991_v61 = vpop.f32.mrf.mxu0 }
 0x1be   : > { %v1992_v8 = vadd.f32 %v1991_v61, %v5541_v17  ;;  %v1975_v38 = vpop.f32.mrf.mxu2 }
 0x1bf   : > { %v5783_v4 = vadd.f32 %v1975_v38, %v1922_v31  ;;  %v2045_v44 = vpop.f32.mrf.mxu1 }
 0x1c0   : > { %v2363_v58 = vmax.f32 %v1992_v8, 0.0  ;;  %v2046_v21 = vadd.f32 %v2045_v44, %v5762_v29 }
 0x1c2   : > { %v5791_v22 = vpack.c.bf16 %v2363_v58, %v2359_v51  ;;  %v4302_v51 = vld [vmem:[%s6514_s3 + $0xa8] sm:$0xff] }
 0x1c3   : > { %v2099_v17 = vpop.f32.mrf.mxu3  ;;  %2836 = vmatpush.bf16.msrb.mxu1 %v4302_v51 }
 0x1c4   : > { %v2100_v43 = vadd.f32 %v2099_v17, %v2046_v21 }
 0x1c5   : > { %v1994_v7 = vpop.f32.mrf.mxu0 }
 0x1c6   : > { %v1995_v13 = vadd.f32 %v1994_v7, %v5551_v15  ;;  %v1977_v56 = vpop.f32.mrf.mxu2 }
 0x1c7   : > { %v5796_v20 = vadd.f32 %v1977_v56, %v1924_v60  ;;  %v2048_v39 = vpop.f32.mrf.mxu1 }
 0x1c8   : > { %2204 = vmatmul.bf16.vlgmr.msra.gmra.mxu0 %v5167_v52  ;;  %4069 = vmatmul.msk.bf16.vlgmr.msra.gmra.mxu3 %vm1094_vm0, %v4738_v30  ;;  %v2049_v10 = vadd.f32 %v2048_v39, %v5762_v29  ;;  %v2367_v44 = vmax.f32 %v1995_v13, 0.0  ;;  %v4310_v30 = vld [vmem:[%s6514_s3 + $0xe8] sm:$0xff] }
 0x1c9   : > { %2890 = vmatpush.bf16.msrb.mxu3 %v4310_v30 }
 0x1ca   : > { %2258 = vmatmul.bf16.vlgmr.msra.gmra.mxu1 %v5172_v57  ;;  %4068 = vmatmul.msk.bf16.gmra.mxu2 %vm1094_vm0, %v5154_v33  ;;  %v4294_v57 = vld [vmem:[%s6514_s3 + $0x68] sm:$0xff] }
 0x1cb   : > { %v2102_v55 = vpop.f32.mrf.mxu3  ;;  %2782 = vmatpush.bf16.msrb.mxu0 %v4294_v57 }
 0x1cc   : > { %v2103_v62 = vadd.f32 %v2102_v55, %v2049_v10 }
 0x1cd   : > { %v1996_v31 = vpop.f32.mrf.mxu0 }
 0x1ce   : > { %v1997_v15 = vadd.f32 %v1996_v31, %v5571_v41  ;;  %v2151_v61 = vpop.f32.mrf.mxu2 }
 0x1cf   : > { %v2050_v8 = vpop.f32.mrf.mxu1  ;;  %v2152_v38 = vadd.f32 %v2151_v61, %v2098_v9 }
 0x1d0   : > { %v2371_v52 = vmax.f32 %v1997_v15, 0.0  ;;  %v2051_v58 = vadd.f32 %v2050_v8, %v5762_v29 }
 0x1d1   : > { %v2360_v13 = vmax.f32 %v2152_v38, 0.0  ;;  %v4309_v38 = vld [vmem:[%s6514_s3 + $0xe0] sm:$0xff] }
 0x1d2   : > { %v5816_v41 = vpack.c.bf16 %v2371_v52, %v2367_v44  ;;  %2891 = vmatpush.bf16.msrb.mxu3 %v4309_v38 }
 0x1d3   : > { %v2104_v11 = vpop.f32.mrf.mxu3 }
 0x1d4   : > { %v2105_v9 = vadd.f32 %v2104_v11, %v2051_v58 }
 0x1d5   : > { %v1999_v24 = vpop.f32.mrf.mxu0 }
 0x1d6   : > { %v2000_v21 = vadd.f32 %v1999_v24, %v5581_v36  ;;  %v2153_v17 = vpop.f32.mrf.mxu2 }
 0x1d7   : > { %v2053_v60 = vpop.f32.mrf.mxu1  ;;  %v2154_v7 = vadd.f32 %v2153_v17, %v2100_v43 }
 0x1d8   : > { %2209 = vmatmul.bf16.gmra.mxu0 %v5213_v47  ;;  %4070 = vmatmul.msk.bf16.gmra.mxu3 %vm1094_vm0, %v4759_v6  ;;  %v2054_v39 = vadd.f32 %v2053_v60, %v5762_v29  ;;  %v2375_v8 = vmax.f32 %v2000_v21, 0.0  ;;  %v6549_v60 = vld [vmem:[#allocation6_spill] sm:$0xff] }
 0x1d9   : > { %v2364_v56 = vmax.f32 %v2154_v7, 0.0  ;;  %v6550_v7 = vld [vmem:[#allocation12_spill] sm:$0xff] }
 0x1da   : > { %2263 = vmatmul.bf16.gmra.mxu1 %v5220_v50  ;;  %2734 = vmatmul.bf16.vlgmr.msrb.gmra.mxu2 %v5506_v45  ;;  %v4293_v50 = vld [vmem:[%s6514_s3 + $0x60] sm:$0xff] }
 0x1db   : > { %v5825_v10 = vpack.c.bf16 %v2364_v56, %v2360_v13  ;;  %v2107_v55 = vpop.f32.mrf.mxu3  ;;  %2783 = vmatpush.bf16.msrb.mxu0 %v4293_v50 }
 0x1dc   : > { %v2108_v36 = vadd.f32 %v2107_v55, %v2054_v39 }
 0x1dd   : > { %v2001_v31 = vpop.f32.mrf.mxu0 }
 0x1de   : > { %v2002_v43 = vadd.f32 %v2001_v31, %v5607_v18  ;;  %v2156_v15 = vpop.f32.mrf.mxu2 }
 0x1df   : > { %v2055_v47 = vpop.f32.mrf.mxu1  ;;  %v2157_v61 = vadd.f32 %v2156_v15, %v2103_v62  ;;  %v4301_v62 = vld [vmem:[%s6514_s3 + $0xa0] sm:$0xff]  ;;  %v4308_v15 = vld [vmem:[%s6514_s3 + $0xd8] sm:$0xff] }
 0x1e0   : > { %v2379_v6 = vmax.f32 %v2002_v43, 0.0  ;;  %v2056_v45 = vadd.f32 %v2055_v47, %v5762_v29  ;;  %2837 = vmatpush.bf16.msrb.mxu1 %v4301_v62  ;;  %2892 = vmatpush.bf16.msrb.mxu3 %v4308_v15 }
 0x1e1   : > { %v2368_v24 = vmax.f32 %v2157_v61, 0.0 }
 0x1e2   : > { %v5835_v44 = vpack.c.bf16 %v2379_v6, %v2375_v8 }
 0x1e3   : > { %v2109_v52 = vpop.f32.mrf.mxu3 }
 0x1e4   : > { %v2110_v18 = vadd.f32 %v2109_v52, %v2056_v45 }
 0x1e5   : > { %v2004_v30 = vpop.f32.mrf.mxu0 }
 0x1e6   : > { %v2005_v57 = vadd.f32 %v2004_v30, %v5617_v49  ;;  %v2158_v51 = vpop.f32.mrf.mxu2 }
 0x1e7   : > { %v2058_v58 = vpop.f32.mrf.mxu1  ;;  %v2159_v11 = vadd.f32 %v2158_v51, %v2105_v9 }
 0x1e8   : > { %2214 = vmatmul.bf16.gmra.mxu0 %v5252_v53  ;;  %4071 = vmatmul.msk.bf16.gmra.mxu3 %vm1094_vm0, %v4779_v42  ;;  %v2059_v17 = vadd.f32 %v2058_v58, %v5762_v29  ;;  %v2383_v43 = vmax.f32 %v2005_v57, 0.0  ;;  %v4300_v57 = vld [vmem:[%s6514_s3 + $0x98] sm:$0xff]  ;;  %v6551_v58 = vld [vmem:[#allocation7_spill] sm:$0xff] }
 0x1e9   : > { %v2372_v21 = vmax.f32 %v2159_v11, 0.0  ;;  %2838 = vmatpush.bf16.msrb.mxu1 %v4300_v57 }
 0x1ea   : > { %2268 = vmatmul.bf16.gmra.mxu1 %v6549_v60  ;;  %2739 = vmatmul.bf16.gmra.mxu2 %v6550_v7 }
 0x1eb   : > { %v2112_v13 = vpop.f32.mrf.mxu3  ;;  %v5847_v56 = vpack.c.bf16 %v2372_v21, %v2368_v24 }
 0x1ec   : > { %v2113_v49 = vadd.f32 %v2112_v13, %v2059_v17 }
 0x1ed   : > { %v2006_v39 = vpop.f32.mrf.mxu0 }
 0x1ee   : > { %v2007_v9 = vadd.f32 %v2006_v39, %v5631_v48  ;;  %v2161_v55 = vpop.f32.mrf.mxu2  ;;  %v4292_v48 = vld [vmem:[%s6514_s3 + $0x58] sm:$0xff] }
 0x1ef   : > { %v2060_v53 = vpop.f32.mrf.mxu1  ;;  %v2162_v31 = vadd.f32 %v2161_v55, %v2108_v36  ;;  %2784 = vmatpush.bf16.msrb.mxu0 %v4292_v48 }
 0x1f0   : > { %v2387_v42 = vmax.f32 %v2007_v9, 0.0  ;;  %v2061_v47 = vadd.f32 %v2060_v53, %v5762_v29 }
 0x1f1   : > { %v2376_v62 = vmax.f32 %v2162_v31, 0.0  ;;  %v4307_v31 = vld [vmem:[%s6514_s3 + $0xd0] sm:$0xff] }
 0x1f2   : > { %v5854_v61 = vpack.c.bf16 %v2387_v42, %v2383_v43  ;;  %2893 = vmatpush.bf16.msrb.mxu3 %v4307_v31  ;;  %v6556_v31 = vld [vmem:[#allocation10_spill] sm:$0xff] }
 0x1f3   : > { %v2114_v8 = vpop.f32.mrf.mxu3 }
 0x1f4   : > { %v2115_v6 = vadd.f32 %v2114_v8, %v2061_v47 }
 0x1f5   : > { %v2009_v38 = vpop.f32.mrf.mxu0 }
 0x1f6   : > { %v2010_v36 = vadd.f32 %v2009_v38, %v5647_v28  ;;  %v2163_v50 = vpop.f32.mrf.mxu2  ;;  %v6552_v28 = vld [vmem:[#allocation13_spill] sm:$0xff]  ;;  %v4291_v38 = vld [vmem:[%s6514_s3 + $0x50] sm:$0xff] }
 0x1f7   : > { %v2063_v45 = vpop.f32.mrf.mxu1  ;;  %v2164_v52 = vadd.f32 %v2163_v50, %v2110_v18  ;;  %v6554_v50 = vld [vmem:[#allocation9_spill] sm:$0xff]  ;;  %2785 = vmatpush.bf16.msrb.mxu0 %v4291_v38 }
 0x1f8   : > { %2219 = vmatmul.bf16.gmra.mxu0 %v5295_v12  ;;  %4072 = vmatmul.msk.bf16.gmra.mxu3 %vm1094_vm0, %v4799_v14  ;;  %v2064_v51 = vadd.f32 %v2063_v45, %v5762_v29  ;;  %v2391_v7 = vmax.f32 %v2010_v36, 0.0  ;;  %v4299_v36 = vld [vmem:[%s6514_s3 + $0x90] sm:$0xff] }
 0x1f9   : > { %v2380_v30 = vmax.f32 %v2164_v52, 0.0  ;;  %2839 = vmatpush.bf16.msrb.mxu1 %v4299_v36 }
 0x1fa   : > { %2273 = vmatmul.bf16.gmra.mxu1 %v6551_v58  ;;  %2744 = vmatmul.bf16.gmra.mxu2 %v6552_v28 }
 0x1fb   : > { %v2117_v11 = vpop.f32.mrf.mxu3  ;;  %v5869_v18 = vpack.c.bf16 %v2380_v30, %v2376_v62 }
 0x1fc   : > { %v2118_v12 = vadd.f32 %v2117_v11, %v2064_v51 }
 0x1fd   : > { %v2011_v24 = vpop.f32.mrf.mxu0 }
 0x1fe   : > { %v2012_v14 = vadd.f32 %v2011_v24, %v5655_v2  ;;  %v2166_v21 = vpop.f32.mrf.mxu2 }
 0x1ff   : > { %v2065_v17 = vpop.f32.mrf.mxu1  ;;  %v2167_v60 = vadd.f32 %v2166_v21, %v2113_v49  ;;  %v6553_v49 = vld [vmem:[#allocation8_spill] sm:$0xff] }
 0x200   : > { %v2395_v13 = vmax.f32 %v2012_v14, 0.0  ;;  %v2066_v39 = vadd.f32 %v2065_v17, %v5762_v29 }
 0x201   : > { %v2384_v8 = vmax.f32 %v2167_v60, 0.0 }
 0x202   : > { %v5873_v9 = vpack.c.bf16 %v2395_v13, %v2391_v7 }
 0x203   : > { %v2119_v55 = vpop.f32.mrf.mxu3 }
 0x204   : > { %v2120_v53 = vadd.f32 %v2119_v55, %v2066_v39 }
 0x205   : > { %v2014_v43 = vpop.f32.mrf.mxu0 }
 0x206   : > { %v2015_v42 = vadd.f32 %v2014_v43, %v5677_v35  ;;  %v2168_v15 = vpop.f32.mrf.mxu2 }
 0x207   : > { %v2068_v2 = vpop.f32.mrf.mxu1  ;;  %v2169_v47 = vadd.f32 %v2168_v15, %v2115_v6  ;;  %v6555_v6 = vld [vmem:[#allocation14_spill] sm:$0xff]  ;;  %v6558_v15 = vld [vmem:[#allocation15_spill] sm:$0xff] }
 0x208   : > { %2224 = vmatmul.bf16.gmra.mxu0 %v6553_v49  ;;  %4073 = vmatmul.msk.bf16.gmra.mxu3 %vm1094_vm0, %v4840_v59  ;;  %v2069_v35 = vadd.f32 %v2068_v2, %v5762_v29  ;;  %v2399_v28 = vmax.f32 %v2015_v42, 0.0  ;;  %v6557_v42 = vld [vmem:[#allocation11_spill] sm:$0xff] }
 0x209   : > { %v2388_v48 = vmax.f32 %v2169_v47, 0.0 }
 0x20a   : > { %2278 = vmatmul.bf16.gmra.mxu1 %v6554_v50  ;;  %2749 = vmatmul.bf16.gmra.mxu2 %v6555_v6 }
 0x20b   : > { %v2122_v45 = vpop.f32.mrf.mxu3  ;;  %v5891_v59 = vpack.c.bf16 %v2388_v48, %v2384_v8 }
 0x20c   : > { %v2123_v52 = vadd.f32 %v2122_v45, %v2069_v35 }
 0x20d   : > { %v2016_v62 = vpop.f32.mrf.mxu0 }
 0x20e   : > { %v2017_v30 = vadd.f32 %v2016_v62, %v5685_v3  ;;  %v2171_v57 = vpop.f32.mrf.mxu2 }
 0x20f   : > { %v2070_v51 = vpop.f32.mrf.mxu1  ;;  %v2172_v58 = vadd.f32 %v2171_v57, %v2118_v12 }
 0x210   : > { %v2403_v11 = vmax.f32 %v2017_v30, 0.0  ;;  %v2071_v24 = vadd.f32 %v2070_v51, %v5762_v29 }
 0x211   : > { %v2392_v3 = vmax.f32 %v2172_v58, 0.0 }
 0x212   : > { %v5895_v14 = vpack.c.bf16 %v2403_v11, %v2399_v28 }
 0x213   : > { %v2124_v21 = vpop.f32.mrf.mxu3 }
 0x214   : > { %v2125_v17 = vadd.f32 %v2124_v21, %v2071_v24 }
 0x215   : > { %v2019_v60 = vpop.f32.mrf.mxu0 }
 0x216   : > { %v2020_v7 = vadd.f32 %v2019_v60, %v5710_v40  ;;  %v2173_v13 = vpop.f32.mrf.mxu2  ;;  %v4306_v40 = vld [vmem:[%s6514_s3 + $0xc8] sm:$0xff]  ;;  %v6559_v60 = vld [vmem:[#allocation16_spill] sm:$0xff] }
 0x217   : > { %v2073_v39 = vpop.f32.mrf.mxu1  ;;  %v2174_v55 = vadd.f32 %v2173_v13, %v2120_v53  ;;  %v4290_v53 = vld [vmem:[%s6514_s3 + $0x48] sm:$0xff]  ;;  %2894 = vmatpush.bf16.msrb.mxu3 %v4306_v40 }
 0x218   : > { %2229 = vmatmul.bf16.gmra.mxu0 %v6556_v31  ;;  %4074 = vmatmul.msk.bf16.gmra.mxu3 %vm1094_vm0, %v4933_v5  ;;  %v2074_v43 = vadd.f32 %v2073_v39, %v5762_v29  ;;  %v4298_v5 = vld [vmem:[%s6514_s3 + $0x88] sm:$0xff]  ;;  %v2407_v50 = vmax.f32 %v2020_v7, 0.0 }
 0x219   : > { %v2396_v12 = vmax.f32 %v2174_v55, 0.0  ;;  %2786 = vmatpush.bf16.msrb.mxu0 %v4290_v53  ;;  %2840 = vmatpush.bf16.msrb.mxu1 %v4298_v5  ;;  %v4297_v55 = vld [vmem:[%s6514_s3 + $0x80] sm:$0xff] }
 0x21a   : > { %2283 = vmatmul.bf16.gmra.mxu1 %v6557_v42  ;;  %2754 = vmatmul.bf16.gmra.mxu2 %v6558_v15 }
 0x21b   : > { %v2127_v2 = vpop.f32.mrf.mxu3  ;;  %v5913_v47 = vpack.c.bf16 %v2396_v12, %v2392_v3 }
 0x21c   : > { %v2128_v49 = vadd.f32 %v2127_v2, %v2074_v43 }
 0x21d   : > { %v2021_v8 = vpop.f32.mrf.mxu0  ;;  %2841 = vmatpush.bf16.msrb.mxu1 %v4297_v55 }
 0x21e   : > { %v2022_v48 = vadd.f32 %v2021_v8, %v5724_v37  ;;  %v2176_v38 = vpop.f32.mrf.mxu2 }
 0x21f   : > { %v2075_v36 = vpop.f32.mrf.mxu1  ;;  %v2177_v35 = vadd.f32 %v2176_v38, %v2123_v52 }
 0x220   : > { %v2411_v6 = vmax.f32 %v2022_v48, 0.0  ;;  %v2076_v45 = vadd.f32 %v2075_v36, %v5762_v29 }
 0x221   : > { %v2400_v37 = vmax.f32 %v2177_v35, 0.0 }
 0x222   : > { %v5917_v62 = vpack.c.bf16 %v2411_v6, %v2407_v50 }
 0x223   : > { %v2129_v30 = vpop.f32.mrf.mxu3 }
 0x224   : > { %v2130_v57 = vadd.f32 %v2129_v30, %v2076_v45 }
 0x225   : > { %v2024_v51 = vpop.f32.mrf.mxu0 }
 0x226   : > { %v2025_v58 = vadd.f32 %v2024_v51, %v5746_v19  ;;  %v2178_v28 = vpop.f32.mrf.mxu2  ;;  %v4305_v19 = vld [vmem:[%s6514_s3 + $0xc0] sm:$0xff] }
 0x227   : > { %v2078_v11 = vpop.f32.mrf.mxu1  ;;  %v2179_v24 = vadd.f32 %v2178_v28, %v2125_v17  ;;  %2895 = vmatpush.bf16.msrb.mxu3 %v4305_v19 }
 0x228   : > { %2234 = vmatmul.bf16.gmra.mxu0 %v5386_v46  ;;  %4075 = vmatmul.msk.bf16.gmra.mxu3 %vm1094_vm0, %v5041_v25  ;;  %v2079_v21 = vadd.f32 %v2078_v11, %v5762_v29  ;;  %v4289_v46 = vld [vmem:[%s6514_s3 + $0x40] sm:$0xff]  ;;  %v2415_v3 = vmax.f32 %v2025_v58, 0.0 }
 0x229   : > { %v2404_v52 = vmax.f32 %v2179_v24, 0.0  ;;  %2787 = vmatpush.bf16.msrb.mxu0 %v4289_v46 }
 0x22a   : > { %2288 = vmatmul.bf16.gmra.mxu1 %v5392_v1  ;;  %2759 = vmatmul.bf16.gmra.mxu2 %v6559_v60 }
 0x22b   : > { %v2132_v7 = vpop.f32.mrf.mxu3  ;;  %v5932_v17 = vpack.c.bf16 %v2404_v52, %v2400_v37 }
 0x22c   : > { %v2133_v25 = vadd.f32 %v2132_v7, %v2079_v21  ;;  %v4503_v21 = vld [vmem:[%s6513_s2] sm:$0xf] }
 0x22d   : > { %v2026_v13 = vpop.f32.mrf.mxu0 }
 0x22e   : > { %v2027_v39 = vadd.f32 %v2026_v13, %v5766_v54  ;;  %v2181_v1 = vpop.f32.mrf.mxu2 }
 0x22f   : > { %v2080_v31 = vpop.f32.mrf.mxu1  ;;  %v2182_v40 = vadd.f32 %v2181_v1, %v2128_v49 }
 0x230   : > { %v2419_v12 = vmax.f32 %v2027_v39, 0.0  ;;  %v2081_v43 = vadd.f32 %v2080_v31, %v5762_v29 }
 0x231   : > { %v2408_v38 = vmax.f32 %v2182_v40, 0.0 }
 0x232   : > { %v5939_v42 = vpack.c.bf16 %v2419_v12, %v2415_v3 }
 0x233   : > { %v2134_v15 = vpop.f32.mrf.mxu3 }
 0x234   : > { %v2135_v2 = vadd.f32 %v2134_v15, %v2081_v43 }
 0x235   : > { %v2029_v53 = vpop.f32.mrf.mxu0 }
 0x236   : > { %v2030_v5 = vadd.f32 %v2029_v53, %v5783_v4  ;;  %v2183_v54 = vpop.f32.mrf.mxu2 }
 0x237   : > { %v2083_v8 = vpop.f32.mrf.mxu1  ;;  %v2184_v48 = vadd.f32 %v2183_v54, %v2130_v57 }
 0x238   : > { %2239 = vmatmul.bf16.gmra.mxu0 %v5426_v34  ;;  %4076 = vmatmul.msk.bf16.gmra.mxu3 %vm1094_vm0, %v5112_v26  ;;  %v2084_v35 = vadd.f32 %v2083_v8, %v5762_v29  ;;  %v2423_v57 = vmax.f32 %v2030_v5, 0.0 }
 0x239   : > { %v2412_v36 = vmax.f32 %v2184_v48, 0.0 }
 0x23a   : > { %2293 = vmatmul.bf16.gmra.mxu1 %v5432_v0  ;;  %2764 = vmatmul.bf16.gmra.mxu2 %v5683_v32 }
 0x23b   : > { %v5948_v49 = vpack.c.bf16 %v2412_v36, %v2408_v38  ;;  %v2137_v50 = vpop.f32.mrf.mxu3 }
 0x23c   : > { %v2138_v4 = vadd.f32 %v2137_v50, %v2084_v35 }
 0x23d   : > { %v2031_v6 = vpop.f32.mrf.mxu0 }
 0x23e   : > { %v2032_v45 = vadd.f32 %v2031_v6, %v5796_v20  ;;  %v2186_v30 = vpop.f32.mrf.mxu2  ;;  %v5957_v20 = vperm.slane %v4503_v21, 3 }
 0x23f   : > { %v2085_v34 = vpop.f32.mrf.mxu1  ;;  %v2187_v0 = vadd.f32 %v2186_v30, %v2133_v25 }
 0x240   : > { %v2427_v51 = vmax.f32 %v2032_v45, 0.0  ;;  %v2086_v26 = vadd.f32 %v2085_v34, %v5762_v29 }
 0x241   : > { %v2416_v29 = vmax.f32 %v2187_v0, 0.0 }
 0x242   : > { %v5952_v58 = vpack.c.bf16 %v2427_v51, %v2423_v57 }
 0x243   : > { %v2139_v28 = vpop.f32.mrf.mxu3 }
 0x244   : > { %v2140_v11 = vadd.f32 %v2139_v28, %v2086_v26 }
 0x245   : > { %v2205_v24 = vpop.f32.mrf.mxu0 }
 0x246   : > { %v2188_v32 = vpop.f32.mrf.mxu2  ;;  %v2206_v46 = vadd.f32 %v2205_v24, %v5957_v20 }
 0x247   : > { %v2189_v37 = vadd.f32 %v2188_v32, %v2135_v2  ;;  %v2259_v52 = vpop.f32.mrf.mxu1 }
 0x248   : > { %2244 = vmatmul.bf16.gmra.mxu0 %v5479_v27  ;;  %4077 = vmatmul.msk.bf16.gmra.mxu3 %vm1094_vm0, %v5154_v33  ;;  %v2260_v27 = vadd.f32 %v2259_v52, %v2206_v46 }
 0x249   : > { %v2420_v60 = vmax.f32 %v2189_v37, 0.0 }
 0x24a   : > { %2298 = vmatmul.bf16.gmra.mxu1 %v5485_v16  ;;  %2769 = vmatmul.bf16.gmra.mxu2 %v5722_v23 }
 0x24b   : > { %v5964_v7 = vpack.c.bf16 %v2420_v60, %v2416_v29  ;;  %v2313_v19 = vpop.f32.mrf.mxu3 }
 0x24c   : > { %v2314_v55 = vadd.f32 %v2313_v19, %v2260_v27 }
 0x24d   : > { %v2207_v25 = vpop.f32.mrf.mxu0 }
 0x24e   : > { %v2208_v13 = vadd.f32 %v2207_v25, %v5957_v20  ;;  %v2191_v39 = vpop.f32.mrf.mxu2  ;;  %v2361_v16 = vmax.f32 %v2314_v55, 0.0 }
 0x24f   : > { %v2261_v1 = vpop.f32.mrf.mxu1  ;;  %v2192_v12 = vadd.f32 %v2191_v39, %v2138_v4 }
 0x250   : > { %v2262_v31 = vadd.f32 %v2261_v1, %v2208_v13 }
 0x251   : > { %v2424_v5 = vmax.f32 %v2192_v12, 0.0 }
 0x253   : > { %v2315_v33 = vpop.f32.mrf.mxu3 }
 0x254   : > { %v2316_v3 = vadd.f32 %v2315_v33, %v2262_v31 }
 0x255   : > { %v2210_v43 = vpop.f32.mrf.mxu0 }
 0x256   : > { %v2365_v15 = vmax.f32 %v2316_v3, 0.0  ;;  %v2193_v23 = vpop.f32.mrf.mxu2  ;;  %v2211_v38 = vadd.f32 %v2210_v43, %v5957_v20 }
 0x257   : > { %v2194_v2 = vadd.f32 %v2193_v23, %v2140_v11  ;;  %v2264_v40 = vpop.f32.mrf.mxu1 }
 0x258   : > { %v2433_v53 = vpack.c.bf16 %v2365_v15, %v2361_v16  ;;  %2788 = vmatmul.bf16.vlgmr.msrb.gmra.mxu0 %v5791_v22  ;;  %v2265_v4 = vadd.f32 %v2264_v40, %v2211_v38 }
 0x259   : > { %v2428_v54 = vmax.f32 %v2194_v2, 0.0 }
 0x25a   : > { %2842 = vmatmul.bf16.vlgmr.msrb.gmra.mxu1 %v5825_v10  ;;  %2896 = vmatmul.bf16.vlgmr.msrb.gmra.mxu3 %v2433_v53 }
 0x25b   : > { %v5970_v8 = vpack.c.bf16 %v2428_v54, %v2424_v5  ;;  %v2318_v48 = vpop.f32.mrf.mxu3  ;;  %2774 = vmatmul.bf16.gmra.mxu2 %v5764_v63 }
 0x25c   : > { %v2319_v6 = vadd.f32 %v2318_v48, %v2265_v4 }
 0x25d   : > { %v2212_v36 = vpop.f32.mrf.mxu0 }
 0x25e   : > { %v2213_v35 = vadd.f32 %v2212_v36, %v5957_v20  ;;  %v2369_v57 = vmax.f32 %v2319_v6, 0.0 }
 0x25f   : > { %v2266_v50 = vpop.f32.mrf.mxu1 }
 0x260   : > { %v2267_v45 = vadd.f32 %v2266_v50, %v2213_v35 }
 0x263   : > { %v2320_v22 = vpop.f32.mrf.mxu3 }
 0x264   : > { %v2321_v30 = vadd.f32 %v2320_v22, %v2267_v45 }
 0x265   : > { %v2215_v34 = vpop.f32.mrf.mxu0 }
 0x266   : > { %v2373_v10 = vmax.f32 %v2321_v30, 0.0  ;;  %v2216_v28 = vadd.f32 %v2215_v34, %v5957_v20 }
 0x267   : > { %v2269_v51 = vpop.f32.mrf.mxu1 }
 0x268   : > { %2793 = vmatmul.bf16.gmra.mxu0 %v5816_v41  ;;  %v2437_v26 = vpack.c.bf16 %v2373_v10, %v2369_v57  ;;  %v2270_v32 = vadd.f32 %v2269_v51, %v2216_v28 }
 0x26a   : > { %2847 = vmatmul.bf16.gmra.mxu1 %v5847_v56  ;;  %2901 = vmatmul.bf16.gmra.mxu3 %v2437_v26 }
 0x26b   : > { %v2323_v63 = vpop.f32.mrf.mxu3 }
 0x26c   : > { %v2324_v37 = vadd.f32 %v2323_v63, %v2270_v32 }
 0x26d   : > { %v2217_v11 = vpop.f32.mrf.mxu0 }
 0x26e   : > { %v2218_v0 = vadd.f32 %v2217_v11, %v5957_v20  ;;  %v2377_v19 = vmax.f32 %v2324_v37, 0.0 }
 0x26f   : > { %v2271_v24 = vpop.f32.mrf.mxu1 }
 0x270   : > { %v2272_v52 = vadd.f32 %v2271_v24, %v2218_v0 }
 0x273   : > { %v2325_v21 = vpop.f32.mrf.mxu3 }
 0x274   : > { %v2326_v29 = vadd.f32 %v2325_v21, %v2272_v52 }
 0x275   : > { %v2220_v60 = vpop.f32.mrf.mxu0 }
 0x276   : > { %v2381_v46 = vmax.f32 %v2326_v29, 0.0  ;;  %v2221_v13 = vadd.f32 %v2220_v60, %v5957_v20  ;;  %v2735_v60 = vpop.f32.mrf.mxu2 }
 0x277   : > { %v2274_v41 = vpop.f32.mrf.mxu1 }
 0x278   : > { %2798 = vmatmul.bf16.gmra.mxu0 %v5835_v44  ;;  %v2441_v56 = vpack.c.bf16 %v2381_v46, %v2377_v19  ;;  %v2275_v55 = vadd.f32 %v2274_v41, %v2221_v13 }
 0x27a   : > { %2852 = vmatmul.bf16.gmra.mxu1 %v5869_v18  ;;  %2906 = vmatmul.bf16.gmra.mxu3 %v2441_v56 }
 0x27b   : > { %v2328_v25 = vpop.f32.mrf.mxu3 }
 0x27c   : > { %v2329_v31 = vadd.f32 %v2328_v25, %v2275_v55 }
 0x27d   : > { %v2222_v39 = vpop.f32.mrf.mxu0 }
 0x27e   : > { %v2223_v1 = vadd.f32 %v2222_v39, %v5957_v20  ;;  %v2385_v16 = vmax.f32 %v2329_v31, 0.0 }
 0x27f   : > { %v2276_v27 = vpop.f32.mrf.mxu1 }
 0x280   : > { %v2277_v33 = vadd.f32 %v2276_v27, %v2223_v1 }
 0x283   : > { %v2330_v3 = vpop.f32.mrf.mxu3 }
 0x284   : > { %v2331_v12 = vadd.f32 %v2330_v3, %v2277_v33 }
 0x285   : > { %v2225_v43 = vpop.f32.mrf.mxu0 }
 0x286   : > { %v2389_v15 = vmax.f32 %v2331_v12, 0.0  ;;  %v2226_v2 = vadd.f32 %v2225_v43, %v5957_v20 }
 0x287   : > { %v2279_v44 = vpop.f32.mrf.mxu1 }
 0x288   : > { %2803 = vmatmul.bf16.gmra.mxu0 %v5854_v61  ;;  %v2445_v18 = vpack.c.bf16 %v2389_v15, %v2385_v16  ;;  %v2280_v54 = vadd.f32 %v2279_v44, %v2226_v2 }
 0x28a   : > { %2857 = vmatmul.bf16.gmra.mxu1 %v5891_v59  ;;  %2911 = vmatmul.bf16.gmra.mxu3 %v2445_v18 }
 0x28b   : > { %v2333_v23 = vpop.f32.mrf.mxu3 }
 0x28c   : > { %v2334_v48 = vadd.f32 %v2333_v23, %v2280_v54 }
 0x28d   : > { %v2227_v40 = vpop.f32.mrf.mxu0 }
 0x28e   : > { %v2228_v53 = vadd.f32 %v2227_v40, %v5957_v20  ;;  %v2393_v4 = vmax.f32 %v2334_v48, 0.0 }
 0x28f   : > { %v2281_v5 = vpop.f32.mrf.mxu1 }
 0x290   : > { %v2282_v38 = vadd.f32 %v2281_v5, %v2228_v53 }
 0x293   : > { %v2335_v36 = vpop.f32.mrf.mxu3 }
 0x294   : > { %v2336_v35 = vadd.f32 %v2335_v36, %v2282_v38 }
 0x295   : > { %v2230_v50 = vpop.f32.mrf.mxu0 }
 0x296   : > { %v2397_v6 = vmax.f32 %v2336_v35, 0.0  ;;  %v2231_v22 = vadd.f32 %v2230_v50, %v5957_v20 }
 0x297   : > { %v2284_v61 = vpop.f32.mrf.mxu1 }
 0x298   : > { %2808 = vmatmul.bf16.gmra.mxu0 %v5873_v9  ;;  %v2449_v59 = vpack.c.bf16 %v2397_v6, %v2393_v4  ;;  %v2285_v10 = vadd.f32 %v2284_v61, %v2231_v22  ;;  %v6006_v4 = vld [vmem:[%s6515_s4] ss:$0 sm:$0xff] }
 0x29a   : > { %2862 = vmatmul.bf16.gmra.mxu1 %v5913_v47  ;;  %2916 = vmatmul.bf16.gmra.mxu3 %v2449_v59 }
 0x29b   : > { %v2338_v45 = vpop.f32.mrf.mxu3 }
 0x29c   : > { %v2339_v51 = vadd.f32 %v2338_v45, %v2285_v10  ;;  %v2736_v45 = vadd.f32 %v6006_v4, %v2735_v60 }
 0x29d   : > { %v2232_v30 = vpop.f32.mrf.mxu0 }
 0x29e   : > { %v2233_v34 = vadd.f32 %v2232_v30, %v5957_v20  ;;  %v2401_v0 = vmax.f32 %v2339_v51, 0.0 }
 0x29f   : > { %v2286_v57 = vpop.f32.mrf.mxu1 }
 0x2a0   : > { %v2287_v26 = vadd.f32 %v2286_v57, %v2233_v34 }
 0x2a3   : > { %v2340_v63 = vpop.f32.mrf.mxu3 }
 0x2a4   : > { %v2341_v28 = vadd.f32 %v2340_v63, %v2287_v26 }
 0x2a5   : > { %v2235_v11 = vpop.f32.mrf.mxu0 }
 0x2a6   : > { %v2405_v24 = vmax.f32 %v2341_v28, 0.0  ;;  %v2236_v37 = vadd.f32 %v2235_v11, %v5957_v20 }
 0x2a7   : > { %v2289_v9 = vpop.f32.mrf.mxu1 }
 0x2a8   : > { %2813 = vmatmul.bf16.gmra.mxu0 %v5895_v14  ;;  %v2453_v47 = vpack.c.bf16 %v2405_v24, %v2401_v0  ;;  %v2290_v19 = vadd.f32 %v2289_v9, %v2236_v37 }
 0x2aa   : > { %2867 = vmatmul.bf16.gmra.mxu1 %v5932_v17  ;;  %2921 = vmatmul.bf16.gmra.mxu3 %v2453_v47  ;;  %v2737_v17 = vpop.f32.mrf.mxu2 }
 0x2ab   : > { %v2343_v32 = vpop.f32.mrf.mxu3  ;;  %v2738_v28 = vadd.f32 %v6006_v4, %v2737_v17 }
 0x2ac   : > { %v2344_v46 = vadd.f32 %v2343_v32, %v2290_v19 }
 0x2ad   : > { %v2237_v52 = vpop.f32.mrf.mxu0 }
 0x2ae   : > { %v2238_v21 = vadd.f32 %v2237_v52, %v5957_v20  ;;  %v2409_v39 = vmax.f32 %v2344_v46, 0.0 }
 0x2af   : > { %v2291_v29 = vpop.f32.mrf.mxu1 }
 0x2b0   : > { %v2292_v41 = vadd.f32 %v2291_v29, %v2238_v21 }
 0x2b2   : > { %v2740_v18 = vpop.f32.mrf.mxu2 }
 0x2b3   : > { %v2345_v56 = vpop.f32.mrf.mxu3  ;;  %v2741_v32 = vadd.f32 %v6006_v4, %v2740_v18 }
 0x2b4   : > { %v2346_v25 = vadd.f32 %v2345_v56, %v2292_v41 }
 0x2b5   : > { %v2240_v13 = vpop.f32.mrf.mxu0 }
 0x2b6   : > { %v2413_v14 = vmax.f32 %v2346_v25, 0.0  ;;  %v2241_v31 = vadd.f32 %v2240_v13, %v5957_v20 }
 0x2b7   : > { %v2294_v1 = vpop.f32.mrf.mxu1 }
 0x2b8   : > { %v2457_v27 = vpack.c.bf16 %v2413_v14, %v2409_v39  ;;  %2818 = vmatmul.bf16.gmra.mxu0 %v5917_v62  ;;  %v2295_v43 = vadd.f32 %v2294_v1, %v2241_v31 }
 0x2ba   : > { %2872 = vmatmul.bf16.gmra.mxu1 %v5948_v49  ;;  %2926 = vmatmul.bf16.gmra.mxu3 %v2457_v27  ;;  %v2742_v38 = vpop.f32.mrf.mxu2 }
 0x2bb   : > { %v2348_v55 = vpop.f32.mrf.mxu3  ;;  %v2743_v41 = vadd.f32 %v6006_v4, %v2742_v38 }
 0x2bc   : > { %v2349_v16 = vadd.f32 %v2348_v55, %v2295_v43 }
 0x2bd   : > { %v2242_v33 = vpop.f32.mrf.mxu0 }
 0x2be   : > { %v2243_v3 = vadd.f32 %v2242_v33, %v5957_v20  ;;  %v2417_v40 = vmax.f32 %v2349_v16, 0.0 }
 0x2bf   : > { %v2296_v12 = vpop.f32.mrf.mxu1 }
 0x2c0   : > { %v2297_v15 = vadd.f32 %v2296_v12, %v2243_v3 }
 0x2c3   : > { %v2350_v44 = vpop.f32.mrf.mxu3 }
 0x2c4   : > { %v2351_v23 = vadd.f32 %v2350_v44, %v2297_v15 }
 0x2c5   : > { %v2245_v2 = vpop.f32.mrf.mxu0 }
 0x2c6   : > { %v2421_v62 = vmax.f32 %v2351_v23, 0.0  ;;  %v2246_v54 = vadd.f32 %v2245_v2, %v5957_v20 }
 0x2c7   : > { %v2299_v53 = vpop.f32.mrf.mxu1 }
 0x2c8   : > { %v2461_v5 = vpack.c.bf16 %v2421_v62, %v2417_v40  ;;  %2823 = vmatmul.bf16.gmra.mxu0 %v5939_v42  ;;  %v2300_v50 = vadd.f32 %v2299_v53, %v2246_v54 }
 0x2ca   : > { %2877 = vmatmul.bf16.gmra.mxu1 %v5964_v7  ;;  %2931 = vmatmul.bf16.gmra.mxu3 %v2461_v5 }
 0x2cb   : > { %v2353_v49 = vpop.f32.mrf.mxu3 }
 0x2cc   : > { %v2354_v42 = vadd.f32 %v2353_v49, %v2300_v50 }
 0x2cd   : > { %v2247_v48 = vpop.f32.mrf.mxu0 }
 0x2ce   : > { %v2248_v36 = vadd.f32 %v2247_v48, %v5957_v20  ;;  %v2425_v22 = vmax.f32 %v2354_v42, 0.0  ;;  %v2745_v20 = vpop.f32.mrf.mxu2 }
 0x2cf   : > { %v2301_v35 = vpop.f32.mrf.mxu1  ;;  %v2746_v27 = vadd.f32 %v6006_v4, %v2745_v20 }
 0x2d0   : > { %v2302_v6 = vadd.f32 %v2301_v35, %v2248_v36 }
 0x2d3   : > { %v2355_v7 = vpop.f32.mrf.mxu3 }
 0x2d4   : > { %v2356_v61 = vadd.f32 %v2355_v7, %v2302_v6 }
 0x2d5   : > { %v2789_v59 = vpop.f32.mrf.mxu0 }
 0x2d6   : > { %v2429_v30 = vmax.f32 %v2356_v61, 0.0  ;;  %v2790_v10 = vadd.f32 %v2789_v59, %v2736_v45 }
 0x2d7   : > { %v2843_v34 = vpop.f32.mrf.mxu1 }
 0x2d8   : > { %v2465_v57 = vpack.c.bf16 %v2429_v30, %v2425_v22  ;;  %2828 = vmatmul.bf16.gmra.mxu0 %v5952_v58  ;;  %v2844_v51 = vadd.f32 %v2843_v34, %v2790_v10  ;;  %v2747_v58 = vpop.f32.mrf.mxu2 }
 0x2d9   : > { %v2748_v16 = vadd.f32 %v6006_v4, %v2747_v58 }
 0x2da   : > { %2882 = vmatmul.bf16.gmra.mxu1 %v5970_v8  ;;  %2936 = vmatmul.bf16.gmra.mxu3 %v2465_v57 }
 0x2dd   : > { %v2791_v26 = vpop.f32.mrf.mxu0  ;;  %v2897_v63 = vpop.f32.mrf.mxu3 }
 0x2de   : > { %v6015_v11 = vadd.f32 %v2897_v63, %v2844_v51  ;;  %v2792_v24 = vadd.f32 %v2791_v26, %v2738_v28 }
 0x2df   : > { %v2845_v0 = vpop.f32.mrf.mxu1 }
 0x2e0   : > { %3320 = vst [vmem:[%s6017_s27] sm:$0xff] %v6015_v11  ;;  %2960 = vrot.lane.b32.xlu0 %v6015_v11, %s4603_s9  ;;  %v2846_v8 = vadd.f32 %v2845_v0, %v2792_v24  ;;  %v2750_v29 = vpop.f32.mrf.mxu2 }
 0x2e1   : > { %v2751_v53 = vadd.f32 %v6006_v4, %v2750_v29 }
 0x2e5   : > { %v2794_v9 = vpop.f32.mrf.mxu0  ;;  %v2899_v47 = vpop.f32.mrf.mxu3 }
 0x2e6   : > { %v6024_v37 = vadd.f32 %v2899_v47, %v2846_v8  ;;  %v2795_v21 = vadd.f32 %v2794_v9, %v2741_v32 }
 0x2e7   : > { %v2848_v52 = vpop.f32.mrf.mxu1 }
 0x2e8   : > { %3321 = vst [vmem:[%s6017_s27 + $0x8] sm:$0xff] %v6024_v37  ;;  %2962 = vrot.lane.b32.xlu1 %v6024_v37, %s4603_s9  ;;  %v2849_v60 = vadd.f32 %v2848_v52, %v2795_v21  ;;  %v2752_v17 = vpop.f32.mrf.mxu2 }
 0x2e9   : > { %v2753_v50 = vadd.f32 %v6006_v4, %v2752_v17 }
 0x2ed   : > { %v2796_v19 = vpop.f32.mrf.mxu0  ;;  %v2902_v46 = vpop.f32.mrf.mxu3 }
 0x2ee   : > { %v6031_v56 = vadd.f32 %v2902_v46, %v2849_v60  ;;  %v2797_v13 = vadd.f32 %v2796_v19, %v2743_v41 }
 0x2ef   : > { %v2850_v25 = vpop.f32.mrf.mxu1 }
 0x2f0   : > { %3322 = vst [vmem:[%s6017_s27 + $0x10] sm:$0xff] %v6031_v56  ;;  %2964 = vrot.lane.b32.xlu2 %v6031_v56, %s4603_s9  ;;  %v2851_v39 = vadd.f32 %v2850_v25, %v2797_v13  ;;  %v2755_v18 = vpop.f32.mrf.mxu2 }
 0x2f1   : > { %v2756_v30 = vadd.f32 %v6006_v4, %v2755_v18 }
 0x2f5   : > { %v2799_v14 = vpop.f32.mrf.mxu0  ;;  %v2904_v1 = vpop.f32.mrf.mxu3 }
 0x2f6   : > { %v6038_v55 = vadd.f32 %v2904_v1, %v2851_v39  ;;  %v2800_v33 = vadd.f32 %v2799_v14, %v2746_v27 }
 0x2f7   : > { %v2853_v31 = vpop.f32.mrf.mxu1 }
 0x2f8   : > { %3323 = vst [vmem:[%s6017_s27 + $0x18] sm:$0xff] %v6038_v55  ;;  %2966 = vrot.lane.b32.xlu0 %v6038_v55, %s4603_s9  ;;  %v2854_v3 = vadd.f32 %v2853_v31, %v2800_v33  ;;  %v2757_v48 = vpop.f32.mrf.mxu2 }
 0x2f9   : > { %v2758_v63 = vadd.f32 %v6006_v4, %v2757_v48 }
 0x2fd   : > { %v2801_v12 = vpop.f32.mrf.mxu0  ;;  %v2907_v43 = vpop.f32.mrf.mxu3 }
 0x2fe   : > { %v6045_v15 = vadd.f32 %v2907_v43, %v2854_v3  ;;  %v2802_v23 = vadd.f32 %v2801_v12, %v2748_v16 }
 0x2ff   : > { %v2855_v44 = vpop.f32.mrf.mxu1 }
 0x300   : > { %3324 = vst [vmem:[%s6017_s27 + $0x20] sm:$0xff] %v6045_v15  ;;  %2968 = vrot.lane.b32.xlu1 %v6045_v15, %s4603_s9  ;;  %v2856_v2 = vadd.f32 %v2855_v44, %v2802_v23  ;;  %v2760_v61 = vpop.f32.mrf.mxu2 }
 0x301   : > { %v2761_v32 = vadd.f32 %v6006_v4, %v2760_v61 }
 0x305   : > { %v2804_v40 = vpop.f32.mrf.mxu0  ;;  %v2909_v62 = vpop.f32.mrf.mxu3 }
 0x306   : > { %v6052_v5 = vadd.f32 %v2909_v62, %v2856_v2  ;;  %v2805_v54 = vadd.f32 %v2804_v40, %v2751_v53 }
 0x307   : > { %v2858_v49 = vpop.f32.mrf.mxu1 }
 0x308   : > { %3325 = vst [vmem:[%s6017_s27 + $0x28] sm:$0xff] %v6052_v5  ;;  %2970 = vrot.lane.b32.xlu2 %v6052_v5, %s4603_s9  ;;  %v2859_v38 = vadd.f32 %v2858_v49, %v2805_v54  ;;  %v2762_v28 = vpop.f32.mrf.mxu2 }
 0x309   : > { %v2763_v25 = vadd.f32 %v6006_v4, %v2762_v28 }
 0x30d   : > { %v2806_v36 = vpop.f32.mrf.mxu0  ;;  %v2912_v35 = vpop.f32.mrf.mxu3 }
 0x30e   : > { %v6059_v42 = vadd.f32 %v2912_v35, %v2859_v38  ;;  %v2807_v7 = vadd.f32 %v2806_v36, %v2753_v50 }
 0x30f   : > { %v2860_v6 = vpop.f32.mrf.mxu1 }
 0x310   : > { %3326 = vst [vmem:[%s6017_s27 + $0x30] sm:$0xff] %v6059_v42  ;;  %2972 = vrot.lane.b32.xlu0 %v6059_v42, %s4603_s9  ;;  %v2861_v59 = vadd.f32 %v2860_v6, %v2807_v7  ;;  %v2765_v29 = vpop.f32.mrf.mxu2 }
 0x311   : > { %v2766_v33 = vadd.f32 %v6006_v4, %v2765_v29 }
 0x315   : > { %v2809_v45 = vpop.f32.mrf.mxu0  ;;  %v2914_v22 = vpop.f32.mrf.mxu3 }
 0x316   : > { %v6066_v34 = vadd.f32 %v2914_v22, %v2861_v59  ;;  %v2810_v57 = vadd.f32 %v2809_v45, %v2756_v30 }
 0x317   : > { %v2863_v20 = vpop.f32.mrf.mxu1 }
 0x318   : > { %3327 = vst [vmem:[%s6017_s27 + $0x38] sm:$0xff] %v6066_v34  ;;  %2974 = vrot.lane.b32.xlu1 %v6066_v34, %s4603_s9  ;;  %v2864_v10 = vadd.f32 %v2863_v20, %v2810_v57  ;;  %v2767_v1 = vpop.f32.mrf.mxu2 }
 0x319   : > { %v2768_v2 = vadd.f32 %v6006_v4, %v2767_v1 }
 0x31d   : > { %v2811_v51 = vpop.f32.mrf.mxu0  ;;  %v2917_v26 = vpop.f32.mrf.mxu3 }
 0x31e   : > { %v6073_v0 = vadd.f32 %v2917_v26, %v2864_v10  ;;  %v2812_v58 = vadd.f32 %v2811_v51, %v2758_v63 }
 0x31f   : > { %v2865_v24 = vpop.f32.mrf.mxu1 }
 0x320   : > { %3328 = vst [vmem:[%s6017_s27 + $0x40] sm:$0xff] %v6073_v0  ;;  %2976 = vrot.lane.b32.xlu2 %v6073_v0, %s4603_s9  ;;  %v2866_v8 = vadd.f32 %v2865_v24, %v2812_v58  ;;  %v2770_v16 = vpop.f32.mrf.mxu2 }
 0x321   : > { %v2771_v38 = vadd.f32 %v6006_v4, %v2770_v16 }
 0x325   : > { %v2814_v9 = vpop.f32.mrf.mxu0  ;;  %v2919_v47 = vpop.f32.mrf.mxu3 }
 0x326   : > { %v6080_v52 = vadd.f32 %v2919_v47, %v2866_v8  ;;  %v2815_v60 = vadd.f32 %v2814_v9, %v2761_v32 }
 0x327   : > { %v2868_v21 = vpop.f32.mrf.mxu1 }
 0x328   : > { %3329 = vst [vmem:[%s6017_s27 + $0x48] sm:$0xff] %v6080_v52  ;;  %2978 = vrot.lane.b32.xlu0 %v6080_v52, %s4603_s9  ;;  %v2869_v19 = vadd.f32 %v2868_v21, %v2815_v60  ;;  %v2772_v35 = vpop.f32.mrf.mxu2 }
 0x329   : > { %v2773_v45 = vadd.f32 %v6006_v4, %v2772_v35 }
 0x32d   : > { %v2816_v46 = vpop.f32.mrf.mxu0  ;;  %v2922_v41 = vpop.f32.mrf.mxu3 }
 0x32e   : > { %v6087_v13 = vadd.f32 %v2922_v41, %v2869_v19  ;;  %v2817_v14 = vadd.f32 %v2816_v46, %v2763_v25 }
 0x32f   : > { %v2870_v39 = vpop.f32.mrf.mxu1 }
 0x330   : > { %3330 = vst [vmem:[%s6017_s27 + $0x50] sm:$0xff] %v6087_v13  ;;  %2980 = vrot.lane.b32.xlu1 %v6087_v13, %s4603_s9  ;;  %v2871_v27 = vadd.f32 %v2870_v39, %v2817_v14  ;;  %v2775_v57 = vpop.f32.mrf.mxu2 }
 0x331   : > { %v2776_v63 = vadd.f32 %v6006_v4, %v2775_v57 }
 0x335   : > { %v2819_v17 = vpop.f32.mrf.mxu0  ;;  %v2924_v31 = vpop.f32.mrf.mxu3 }
 0x336   : > { %v6094_v3 = vadd.f32 %v2924_v31, %v2871_v27  ;;  %v2820_v43 = vadd.f32 %v2819_v17, %v2766_v33 }
 0x337   : > { %v2873_v12 = vpop.f32.mrf.mxu1 }
 0x338   : > { %3331 = vst [vmem:[%s6017_s27 + $0x58] sm:$0xff] %v6094_v3  ;;  %2982 = vrot.lane.b32.xlu2 %v6094_v3, %s4603_s9  ;;  %v2874_v44 = vadd.f32 %v2873_v12, %v2820_v43  ;;  %v2777_v8 = vpop.f32.mrf.mxu2 }
 0x339   : > { %v2778_v29 = vadd.f32 %v6006_v4, %v2777_v8 }
 0x33d   : > { %v2821_v18 = vpop.f32.mrf.mxu0  ;;  %v2927_v23 = vpop.f32.mrf.mxu3 }
 0x33e   : > { %v6101_v40 = vadd.f32 %v2927_v23, %v2874_v44  ;;  %v2822_v53 = vadd.f32 %v2821_v18, %v2768_v2 }
 0x33f   : > { %v2875_v62 = vpop.f32.mrf.mxu1 }
 0x340   : > { %3332 = vst [vmem:[%s6017_s27 + $0x60] sm:$0xff] %v6101_v40  ;;  %2984 = vrot.lane.b32.xlu0 %v6101_v40, %s4603_s9  ;;  %v2876_v49 = vadd.f32 %v2875_v62, %v2822_v53 }
 0x345   : > { %v2824_v54 = vpop.f32.mrf.mxu0  ;;  %v2929_v48 = vpop.f32.mrf.mxu3 }
 0x346   : > { %v6108_v36 = vadd.f32 %v2929_v48, %v2876_v49  ;;  %v2825_v6 = vadd.f32 %v2824_v54, %v2771_v38 }
 0x347   : > { %v2878_v50 = vpop.f32.mrf.mxu1 }
 0x348   : > { %3333 = vst [vmem:[%s6017_s27 + $0x68] sm:$0xff] %v6108_v36  ;;  %2986 = vrot.lane.b32.xlu1 %v6108_v36, %s4603_s9  ;;  %v2879_v7 = vadd.f32 %v2878_v50, %v2825_v6 }
 0x34a   : > { %v2965_v17 = vpop.permute.xlu2 %2964 }
 0x34b   : > { %v6157_v33 = vmax.f32 %v6031_v56, %v2965_v17 }
 0x34d   : > { %v2826_v61 = vpop.f32.mrf.mxu0  ;;  %v2932_v59 = vpop.f32.mrf.mxu3 }
 0x34e   : > { %v6115_v22 = vadd.f32 %v2932_v59, %v2879_v7  ;;  %v2827_v20 = vadd.f32 %v2826_v61, %v2773_v45 }
 0x34f   : > { %v2880_v30 = vpop.f32.mrf.mxu1 }
 0x350   : > { %3334 = vst [vmem:[%s6017_s27 + $0x70] sm:$0xff] %v6115_v22  ;;  %2988 = vrot.lane.b32.xlu2 %v6115_v22, %s4603_s9  ;;  %v2881_v10 = vadd.f32 %v2880_v30, %v2827_v20 }
 0x352   : > { %v2961_v9 = vpop.permute.xlu0 %2960 }
 0x353   : > { %v6130_v60 = vmax.f32 %v6015_v11, %v2961_v9 }
 0x355   : > { %v2829_v51 = vpop.f32.mrf.mxu0  ;;  %v2934_v26 = vpop.f32.mrf.mxu3 }
 0x356   : > { %v6122_v28 = vadd.f32 %v2934_v26, %v2881_v10  ;;  %v2830_v58 = vadd.f32 %v2829_v51, %v2776_v63 }
 0x357   : > { %v2883_v24 = vpop.f32.mrf.mxu1 }
 0x358   : > { %3335 = vst [vmem:[%s6017_s27 + $0x78] sm:$0xff] %v6122_v28  ;;  %2990 = vrot.lane.b32.xlu0 %v6122_v28, %s4603_s9  ;;  %v2884_v47 = vadd.f32 %v2883_v24, %v2830_v58 }
 0x35a   : > { %v2963_v25 = vpop.permute.xlu1 %2962 }
 0x35b   : > { %v6141_v4 = vmax.f32 %v6024_v37, %v2963_v25 }
 0x35d   : > { %v2831_v32 = vpop.f32.mrf.mxu0  ;;  %v2937_v21 = vpop.f32.mrf.mxu3 }
 0x35e   : > { %v6132_v19 = vadd.f32 %v2937_v21, %v2884_v47  ;;  %v2832_v46 = vadd.f32 %v2831_v32, %v2778_v29 }
 0x35f   : > { %v2885_v41 = vpop.f32.mrf.mxu1 }
 0x360   : > { %3336 = vst [vmem:[%s6017_s27 + $0x80] sm:$0xff] %v6132_v19  ;;  %2992 = vrot.lane.b32.xlu1 %v6132_v19, %s4603_s9  ;;  %3104 = vrot.lane.b32.xlu0 %v6130_v60, %s4604_s29  ;;  %v2886_v39 = vadd.f32 %v2885_v41, %v2832_v46 }
 0x362   : > { %v2971_v43 = vpop.permute.xlu2 %2970 }
 0x363   : > { %v6167_v44 = vmax.f32 %v6052_v5, %v2971_v43 }
 0x365   : > { %v2939_v14 = vpop.f32.mrf.mxu3 }
 0x366   : > { %v6143_v1 = vadd.f32 %v2939_v14, %v2886_v39 }
 0x368   : > { %3337 = vst [vmem:[%s6017_s27 + $0x88] sm:$0xff] %v6143_v1  ;;  %2994 = vrot.lane.b32.xlu2 %v6143_v1, %s4603_s9  ;;  %3106 = vrot.lane.b32.xlu1 %v6141_v4, %s4604_s29 }
 0x36a   : > { %v2967_v27 = vpop.permute.xlu0 %2966 }
 0x36b   : > { %v6152_v31 = vmax.f32 %v6038_v55, %v2967_v27 }
 0x36d   : > { %3110 = vrot.lane.b32.xlu0 %v6152_v31, %s4604_s29 }
 0x370   : > { %3108 = vrot.lane.b32.xlu2 %v6157_v33, %s4604_s29 }
 0x372   : > { %v2969_v12 = vpop.permute.xlu1 %2968 }
 0x373   : > { %v6162_v16 = vmax.f32 %v6045_v15, %v2969_v12 }
 0x375   : > { %3112 = vrot.lane.b32.xlu1 %v6162_v16, %s4604_s29 }
 0x378   : > { %3114 = vrot.lane.b32.xlu2 %v6167_v44, %s4604_s29 }
 0x37a   : > { %v2977_v18 = vpop.permute.xlu2 %2976 }
 0x37b   : > { %v6172_v23 = vmax.f32 %v6073_v0, %v2977_v18 }
 0x380   : > { %3120 = vrot.lane.b32.xlu2 %v6172_v23, %s4604_s29 }
 0x382   : > { %v2973_v2 = vpop.permute.xlu0 %2972 }
 0x383   : > { %v6177_v62 = vmax.f32 %v6059_v42, %v2973_v2 }
 0x385   : > { %3116 = vrot.lane.b32.xlu0 %v6177_v62, %s4604_s29 }
 0x38a   : > { %v2975_v53 = vpop.permute.xlu1 %2974 }
 0x38b   : > { %v6182_v49 = vmax.f32 %v6066_v34, %v2975_v53 }
 0x38d   : > { %3118 = vrot.lane.b32.xlu1 %v6182_v49, %s4604_s29 }
 0x392   : > { %v2983_v54 = vpop.permute.xlu2 %2982 }
 0x393   : > { %v6187_v48 = vmax.f32 %v6094_v3, %v2983_v54 }
 0x395   : > { %3126 = vrot.lane.b32.xlu2 %v6187_v48, %s4604_s29 }
 0x39a   : > { %v2979_v38 = vpop.permute.xlu0 %2978 }
 0x39b   : > { %v6192_v35 = vmax.f32 %v6080_v52, %v2979_v38 }
 0x39d   : > { %3122 = vrot.lane.b32.xlu0 %v6192_v35, %s4604_s29 }
 0x3a2   : > { %v2981_v50 = vpop.permute.xlu1 %2980 }
 0x3a3   : > { %v6197_v6 = vmax.f32 %v6087_v13, %v2981_v50 }
 0x3a5   : > { %3124 = vrot.lane.b32.xlu1 %v6197_v6, %s4604_s29 }
 0x3aa   : > { %v2989_v7 = vpop.permute.xlu2 %2988 }
 0x3ab   : > { %v6202_v61 = vmax.f32 %v6115_v22, %v2989_v7 }
 0x3ad   : > { %3132 = vrot.lane.b32.xlu2 %v6202_v61, %s4604_s29 }
 0x3b2   : > { %v2985_v59 = vpop.permute.xlu0 %2984 }
 0x3b3   : > { %v6207_v45 = vmax.f32 %v6101_v40, %v2985_v59 }
 0x3b5   : > { %3128 = vrot.lane.b32.xlu0 %v6207_v45, %s4604_s29 }
 0x3ba   : > { %v2987_v30 = vpop.permute.xlu1 %2986 }
 0x3bb   : > { %v6212_v20 = vmax.f32 %v6108_v36, %v2987_v30 }
 0x3bd   : > { %3130 = vrot.lane.b32.xlu1 %v6212_v20, %s4604_s29 }
 0x3c2   : > { %v2995_v57 = vpop.permute.xlu2 %2994 }
 0x3c3   : > { %v6217_v10 = vmax.f32 %v6143_v1, %v2995_v57 }
 0x3c5   : > { %3138 = vrot.lane.b32.xlu2 %v6217_v10, %s4604_s29 }
 0x3ca   : > { %v3109_v51 = vpop.permute.xlu2 %3108  ;;  %v2991_v26 = vpop.permute.xlu0 %2990 }
 0x3cb   : > { %v3160_v63 = vsub.f32 %v6031_v56, %v3109_v51  ;;  %v6223_v24 = vmax.f32 %v6122_v28, %v2991_v26 }
 0x3cd   : > { %v3180_v58 = vmul.f32 1.442695, %v3160_v63  ;;  %3134 = vrot.lane.b32.xlu0 %v6223_v24, %s4604_s29 }
 0x3cf   : > { %4395 = vpow2.f32 %v3180_v58 }
 0x3d2   : > { %v3115_v8 = vpop.permute.xlu2 %3114  ;;  %v2993_v9 = vpop.permute.xlu1 %2992 }
 0x3d3   : > { %v3163_v47 = vsub.f32 %v6052_v5, %v3115_v8  ;;  %v6229_v32 = vmax.f32 %v6132_v19, %v2993_v9  ;;  %v3105_v21 = vpop.permute.xlu0 %3104 }
 0x3d4   : > { %v3158_v29 = vsub.f32 %v6015_v11, %v3105_v21 }
 0x3d5   : > { %v6232_v46 = vpop.eup %4395  ;;  %v3186_v41 = vmul.f32 1.442695, %v3163_v47  ;;  %3136 = vrot.lane.b32.xlu1 %v6229_v32, %s4604_s29 }
 0x3d6   : > { %v3176_v25 = vmul.f32 1.442695, %v3158_v29  ;;  %3234 = vrot.lane.b32.xlu2 %v6232_v46, %s4603_s9 }
 0x3d7   : > { %4397 = vpow2.f32 %v3186_v41 }
 0x3d8   : > { %4399 = vpow2.f32 %v3176_v25 }
 0x3da   : > { %v3121_v39 = vpop.permute.xlu2 %3120  ;;  %v3107_v14 = vpop.permute.xlu1 %3106 }
 0x3db   : > { %v3166_v27 = vsub.f32 %v6073_v0, %v3121_v39  ;;  %v3159_v17 = vsub.f32 %v6024_v37, %v3107_v14 }
 0x3dd   : > { %v6240_v12 = vpop.eup %4397  ;;  %v3192_v43 = vmul.f32 1.442695, %v3166_v27  ;;  %v3178_v18 = vmul.f32 1.442695, %v3159_v17 }
 0x3de   : > { %v6242_v2 = vpop.eup %4399  ;;  %3240 = vrot.lane.b32.xlu2 %v6240_v12, %s4603_s9 }
 0x3df   : > { %4401 = vpow2.f32 %v3192_v43  ;;  %3230 = vrot.lane.b32.xlu0 %v6242_v2, %s4603_s9  ;;  %v3111_v53 = vpop.permute.xlu0 %3110 }
 0x3e0   : > { %4403 = vpow2.f32 %v3178_v18  ;;  %v3161_v54 = vsub.f32 %v6038_v55, %v3111_v53 }
 0x3e2   : > { %v3182_v38 = vmul.f32 1.442695, %v3161_v54 }
 0x3e4   : > { %4405 = vpow2.f32 %v3182_v38 }
 0x3e5   : > { %v6249_v50 = vpop.eup %4401 }
 0x3e6   : > { %v6251_v7 = vpop.eup %4403  ;;  %3246 = vrot.lane.b32.xlu2 %v6249_v50, %s4603_s9 }
 0x3e7   : > { %3232 = vrot.lane.b32.xlu1 %v6251_v7, %s4603_s9  ;;  %v3113_v59 = vpop.permute.xlu1 %3112 }
 0x3e8   : > { %v3162_v30 = vsub.f32 %v6045_v15, %v3113_v59 }
 0x3ea   : > { %v6258_v57 = vpop.eup %4405  ;;  %v3184_v51 = vmul.f32 1.442695, %v3162_v30 }
 0x3eb   : > { %3236 = vrot.lane.b32.xlu0 %v6258_v57, %s4603_s9 }
 0x3ec   : > { %4407 = vpow2.f32 %v3184_v51 }
 0x3ef   : > { %v3127_v26 = vpop.permute.xlu2 %3126 }
 0x3f0   : > { %v3169_v63 = vsub.f32 %v6094_v3, %v3127_v26 }
 0x3f2   : > { %v6263_v58 = vpop.eup %4407  ;;  %v3198_v8 = vmul.f32 1.442695, %v3169_v63 }
 0x3f3   : > { %3238 = vrot.lane.b32.xlu1 %v6263_v58, %s4603_s9 }
 0x3f4   : > { %4409 = vpow2.f32 %v3198_v8 }
 0x3f7   : > { %v3117_v9 = vpop.permute.xlu0 %3116 }
 0x3f8   : > { %v3164_v47 = vsub.f32 %v6059_v42, %v3117_v9 }
 0x3fa   : > { %v6268_v21 = vpop.eup %4409  ;;  %v3188_v29 = vmul.f32 1.442695, %v3164_v47 }
 0x3fb   : > { %3252 = vrot.lane.b32.xlu2 %v6268_v21, %s4603_s9 }
 0x3fc   : > { %4411 = vpow2.f32 %v3188_v29  ;;  %v3034_v29 = vsub.f32 %v6031_v56, %v6157_v33 }
 0x3ff   : > { %v3119_v41 = vpop.permute.xlu1 %3118 }
 0x400   : > { %v3165_v25 = vsub.f32 %v6066_v34, %v3119_v41 }
 0x402   : > { %v6273_v39 = vpop.eup %4411  ;;  %v3190_v14 = vmul.f32 1.442695, %v3165_v25  ;;  %v3054_v25 = vmul.f32 1.442695, %v3034_v29 }
 0x403   : > { %3242 = vrot.lane.b32.xlu0 %v6273_v39, %s4603_s9 }
 0x404   : > { %4413 = vpow2.f32 %v3190_v14 }
 0x407   : > { %v3133_v27 = vpop.permute.xlu2 %3132 }
 0x408   : > { %v3172_v17 = vsub.f32 %v6115_v22, %v3133_v27 }
 0x40a   : > { %v6278_v43 = vpop.eup %4413  ;;  %v3204_v18 = vmul.f32 1.442695, %v3172_v17 }
 0x40b   : > { %3244 = vrot.lane.b32.xlu1 %v6278_v43, %s4603_s9 }
 0x40c   : > { %4415 = vpow2.f32 %v3204_v18  ;;  %v3037_v18 = vsub.f32 %v6052_v5, %v6167_v44 }
 0x40e   : > { %v3060_v56 = vmul.f32 1.442695, %v3037_v18 }
 0x40f   : > { %v3123_v53 = vpop.permute.xlu0 %3122 }
 0x410   : > { %v3167_v54 = vsub.f32 %v6080_v52, %v3123_v53 }
 0x412   : > { %v6283_v38 = vpop.eup %4415  ;;  %v3194_v59 = vmul.f32 1.442695, %v3167_v54 }
 0x413   : > { %3258 = vrot.lane.b32.xlu2 %v6283_v38, %s4603_s9 }
 0x414   : > { %4417 = vpow2.f32 %v3194_v59 }
 0x417   : > { %v3125_v30 = vpop.permute.xlu1 %3124 }
 0x418   : > { %v3168_v51 = vsub.f32 %v6087_v13, %v3125_v30 }
 0x41a   : > { %v6288_v26 = vpop.eup %4417  ;;  %v3196_v63 = vmul.f32 1.442695, %v3168_v51 }
 0x41b   : > { %3248 = vrot.lane.b32.xlu0 %v6288_v26, %s4603_s9 }
 0x41c   : > { %4419 = vpow2.f32 %v3196_v63 }
 0x41f   : > { %v3139_v8 = vpop.permute.xlu2 %3138 }
 0x420   : > { %v3175_v9 = vsub.f32 %v6143_v1, %v3139_v8  ;;  %v3040_v8 = vsub.f32 %v6073_v0, %v6172_v23 }
 0x422   : > { %v6293_v47 = vpop.eup %4419  ;;  %v3210_v41 = vmul.f32 1.442695, %v3175_v9  ;;  %v3066_v5 = vmul.f32 1.442695, %v3040_v8  ;;  %v3043_v8 = vsub.f32 %v6094_v3, %v6187_v48  ;;  %v3035_v48 = vsub.f32 %v6038_v55, %v6152_v31 }
 0x423   : > { %3250 = vrot.lane.b32.xlu1 %v6293_v47, %s4603_s9  ;;  %v3036_v55 = vsub.f32 %v6045_v15, %v6162_v16  ;;  %v3046_v15 = vsub.f32 %v6115_v22, %v6202_v61  ;;  %v3038_v22 = vsub.f32 %v6059_v42, %v6177_v62 }
 0x424   : > { %4421 = vpow2.f32 %v3210_v41 }
 0x425   : > { %4423 = vpow2.f32 %v3054_v25 }
 0x427   : > { %v3129_v14 = vpop.permute.xlu0 %3128 }
 0x428   : > { %v3170_v27 = vsub.f32 %v6101_v40, %v3129_v14 }
 0x42a   : > { %v6300_v17 = vpop.eup %4421  ;;  %v3200_v53 = vmul.f32 1.442695, %v3170_v27 }
 0x42b   : > { %3264 = vrot.lane.b32.xlu2 %v6300_v17, %s4603_s9  ;;  %v4424_v54 = vpop.eup %4423 }
 0x42c   : > { %4425 = vpow2.f32 %v3200_v53 }
 0x42d   : > { %4427 = vpow2.f32 %v3060_v56 }
 0x42f   : > { %v3131_v33 = vpop.permute.xlu1 %3130 }
 0x430   : > { %v3171_v59 = vsub.f32 %v6108_v36, %v3131_v33  ;;  %v3235_v30 = vpop.permute.xlu2 %3234 }
 0x431   : > { %v3286_v51 = vadd.f32 %v4424_v54, %v3235_v30 }
 0x432   : > { %v6307_v63 = vpop.eup %4425  ;;  %v3202_v9 = vmul.f32 1.442695, %v3171_v59 }
 0x433   : > { %4429 = vrcp.f32 %v3286_v51  ;;  %3254 = vrot.lane.b32.xlu0 %v6307_v63, %s4603_s9  ;;  %v4428_v44 = vpop.eup %4427 }
 0x434   : > { %4431 = vpow2.f32 %v3202_v9 }
 0x435   : > { %4433 = vpow2.f32 %v3066_v5 }
 0x438   : > { %v3241_v29 = vpop.permute.xlu2 %3240 }
 0x439   : > { %v4430_v41 = vpop.eup %4429  ;;  %v3289_v25 = vadd.f32 %v4428_v44, %v3241_v29 }
 0x43a   : > { %v6313_v14 = vpop.eup %4431  ;;  %v3340_v27 = vmul.f32 %v4430_v41, %v4424_v54  ;;  %3397 = vrot.lane.b32.xlu2 %v4430_v41, %s4604_s29  ;;  %v3032_v54 = vsub.f32 %v6015_v11, %v6130_v60  ;;  %v3033_v11 = vsub.f32 %v6024_v37, %v6141_v4  ;;  %v3072_v60 = vmul.f32 1.442695, %v3043_v8 }
 0x43b   : > { %4435 = vrcp.f32 %v3289_v25  ;;  %3256 = vrot.lane.b32.xlu1 %v6313_v14, %s4603_s9  ;;  %v4434_v23 = vpop.eup %4433 }
 0x43c   : > { %3359 = vst.msk [vmem:[%s6017_s27 + $0x10] sm:$0xff] %vm3356_vm3, %v3340_v27  ;;  %v3050_v51 = vmul.f32 1.442695, %v3032_v54  ;;  %v3052_v3 = vmul.f32 1.442695, %v3033_v11 }
 0x43d   : > { %v3058_v54 = vmul.f32 1.442695, %v3036_v55 }
 0x43f   : > { %v3135_v0 = vpop.permute.xlu0 %3134 }
 0x440   : > { %v3173_v18 = vsub.f32 %v6122_v28, %v3135_v0  ;;  %v3247_v53 = vpop.permute.xlu2 %3246 }
 0x441   : > { %v4436_v56 = vpop.eup %4435  ;;  %v3292_v33 = vadd.f32 %v4434_v23, %v3247_v53  ;;  %v3056_v53 = vmul.f32 1.442695, %v3035_v48 }
 0x442   : > { %v3343_v59 = vmul.f32 %v4436_v56, %v4428_v44  ;;  %v3206_v30 = vmul.f32 1.442695, %v3173_v18  ;;  %3403 = vrot.lane.b32.xlu2 %v4436_v56, %s4604_s29 }
 0x443   : > { %4437 = vrcp.f32 %v3292_v33 }
 0x444   : > { %4439 = vpow2.f32 %v3206_v30  ;;  %3362 = vst.msk [vmem:[%s6017_s27 + $0x28] sm:$0xff] %vm3356_vm3, %v3343_v59 }
 0x445   : > { %4441 = vpow2.f32 %v3050_v51 }
 0x447   : > { %v3137_v9 = vpop.permute.xlu1 %3136 }
 0x448   : > { %v3174_v5 = vsub.f32 %v6132_v19, %v3137_v9 }
 0x449   : > { %v4438_v29 = vpop.eup %4437 }
 0x44a   : > { %v6329_v44 = vpop.eup %4439  ;;  %v3346_v41 = vmul.f32 %v4438_v29, %v4434_v23  ;;  %v3208_v25 = vmul.f32 1.442695, %v3174_v5  ;;  %3409 = vrot.lane.b32.xlu2 %v4438_v29, %s4604_s29 }
 0x44b   : > { %3260 = vrot.lane.b32.xlu0 %v6329_v44, %s4603_s9  ;;  %v4442_v27 = vpop.eup %4441 }
 0x44c   : > { %4443 = vpow2.f32 %v3208_v25  ;;  %3365 = vst.msk [vmem:[%s6017_s27 + $0x40] sm:$0xff] %vm3356_vm3, %v3346_v41  ;;  %v3078_v25 = vmul.f32 1.442695, %v3046_v15 }
 0x44d   : > { %4445 = vpow2.f32 %v3072_v60 }
 0x44e   : > { %4447 = vpow2.f32 %v3052_v3 }
 0x451   : > { %v3231_v0 = vpop.permute.xlu0 %3230 }
 0x452   : > { %v6340_v23 = vpop.eup %4443  ;;  %v3284_v18 = vadd.f32 %v4442_v27, %v3231_v0  ;;  %v3062_v0 = vmul.f32 1.442695, %v3038_v22 }
 0x453   : > { %3262 = vrot.lane.b32.xlu1 %v6340_v23, %s4603_s9  ;;  %v4446_v37 = vpop.eup %4445 }
 0x454   : > { %4449 = vrcp.f32 %v3284_v18  ;;  %v4448_v31 = vpop.eup %4447 }
 0x455   : > { %v3253_v4 = vpop.permute.xlu2 %3252  ;;  %4451 = vpow2.f32 %v3056_v53 }
 0x456   : > { %v3295_v56 = vadd.f32 %v4446_v37, %v3253_v4 }
 0x458   : > { %4453 = vrcp.f32 %v3295_v56  ;;  %v3039_v56 = vsub.f32 %v6066_v34, %v6182_v49 }
 0x459   : > { %v3233_v33 = vpop.permute.xlu1 %3232 }
 0x45a   : > { %v4450_v59 = vpop.eup %4449  ;;  %v3285_v30 = vadd.f32 %v4448_v31, %v3233_v33  ;;  %v3064_v42 = vmul.f32 1.442695, %v3039_v56 }
 0x45b   : > { %v3338_v51 = vmul.f32 %v4450_v59, %v4442_v27  ;;  %3393 = vrot.lane.b32.xlu0 %v4450_v59, %s4604_s29  ;;  %v4452_v8 = vpop.eup %4451 }
 0x45c   : > { %4455 = vrcp.f32 %v3285_v30  ;;  %v3049_v30 = vsub.f32 %v6143_v1, %v6217_v10 }
 0x45d   : > { %v3237_v9 = vpop.permute.xlu0 %3236  ;;  %3357 = vst.msk [vmem:[%s6017_s27] sm:$0xff] %vm3356_vm3, %v3338_v51  ;;  %4457 = vpow2.f32 %v3058_v54 }
 0x45e   : > { %v4454_v5 = vpop.eup %4453  ;;  %v3287_v29 = vadd.f32 %v4452_v8, %v3237_v9  ;;  %v3084_v34 = vmul.f32 1.442695, %v3049_v30 }
 0x45f   : > { %v3349_v16 = vmul.f32 %v4454_v5, %v4446_v37  ;;  %3415 = vrot.lane.b32.xlu2 %v4454_v5, %s4604_s29  ;;  %v3041_v5 = vsub.f32 %v6080_v52, %v6192_v35 }
 0x460   : > { %4459 = vrcp.f32 %v3287_v29 }
 0x461   : > { %3368 = vst.msk [vmem:[%s6017_s27 + $0x58] sm:$0xff] %vm3356_vm3, %v3349_v16  ;;  %4461 = vpow2.f32 %v3078_v25  ;;  %v3068_v1 = vmul.f32 1.442695, %v3041_v5  ;;  %v3042_v25 = vsub.f32 %v6087_v13, %v6197_v6 }
 0x462   : > { %v4456_v41 = vpop.eup %4455 }
 0x463   : > { %v3339_v11 = vmul.f32 %v4456_v41, %v4448_v31  ;;  %3395 = vrot.lane.b32.xlu1 %v4456_v41, %s4604_s29  ;;  %v4458_v60 = vpop.eup %4457  ;;  %v3070_v52 = vmul.f32 1.442695, %v3042_v25 }
 0x465   : > { %v3239_v3 = vpop.permute.xlu1 %3238  ;;  %3358 = vst.msk [vmem:[%s6017_s27 + $0x8] sm:$0xff] %vm3356_vm3, %v3339_v11 }
 0x466   : > { %v4460_v48 = vpop.eup %4459  ;;  %v3288_v27 = vadd.f32 %v4458_v60, %v3239_v3 }
 0x467   : > { %v3341_v61 = vmul.f32 %v4460_v48, %v4452_v8  ;;  %3399 = vrot.lane.b32.xlu0 %v4460_v48, %s4604_s29  ;;  %v4462_v18 = vpop.eup %4461 }
 0x468   : > { %4463 = vrcp.f32 %v3288_v27 }
 0x469   : > { %3360 = vst.msk [vmem:[%s6017_s27 + $0x18] sm:$0xff] %vm3356_vm3, %v3341_v61  ;;  %4465 = vpow2.f32 %v3062_v0 }
 0x46d   : > { %v3259_v53 = vpop.permute.xlu2 %3258 }
 0x46e   : > { %v4464_v37 = vpop.eup %4463  ;;  %v3298_v4 = vadd.f32 %v4462_v18, %v3259_v53  ;;  %v3044_v53 = vsub.f32 %v6101_v40, %v6207_v45 }
 0x46f   : > { %v3342_v55 = vmul.f32 %v4464_v37, %v4458_v60  ;;  %3401 = vrot.lane.b32.xlu1 %v4464_v37, %s4604_s29  ;;  %v4466_v62 = vpop.eup %4465 }
 0x470   : > { %4467 = vrcp.f32 %v3298_v4  ;;  %v3074_v4 = vmul.f32 1.442695, %v3044_v53 }
 0x471   : > { %3361 = vst.msk [vmem:[%s6017_s27 + $0x20] sm:$0xff] %vm3356_vm3, %v3342_v55  ;;  %4469 = vpow2.f32 %v3064_v42  ;;  %v3045_v42 = vsub.f32 %v6108_v36, %v6212_v20 }
 0x473   : > { %v3076_v40 = vmul.f32 1.442695, %v3045_v42 }
 0x475   : > { %v3243_v31 = vpop.permute.xlu0 %3242 }
 0x476   : > { %v4468_v33 = vpop.eup %4467  ;;  %v3290_v59 = vadd.f32 %v4466_v62, %v3243_v31 }
 0x477   : > { %v3352_v54 = vmul.f32 %v4468_v33, %v4462_v18  ;;  %3421 = vrot.lane.b32.xlu2 %v4468_v33, %s4604_s29  ;;  %v4470_v49 = vpop.eup %4469 }
 0x478   : > { %4471 = vrcp.f32 %v3290_v59 }
 0x479   : > { %3371 = vst.msk [vmem:[%s6017_s27 + $0x70] sm:$0xff] %vm3356_vm3, %v3352_v54  ;;  %4473 = vpow2.f32 %v3084_v34  ;;  %v3047_v34 = vsub.f32 %v6122_v28, %v6223_v24 }
 0x47d   : > { %v3245_v51 = vpop.permute.xlu1 %3244 }
 0x47e   : > { %v4472_v8 = vpop.eup %4471  ;;  %v3291_v9 = vadd.f32 %v4470_v49, %v3245_v51 }
 0x47f   : > { %v3344_v29 = vmul.f32 %v4472_v8, %v4466_v62  ;;  %3405 = vrot.lane.b32.xlu0 %v4472_v8, %s4604_s29  ;;  %v4474_v10 = vpop.eup %4473  ;;  %v3048_v8 = vsub.f32 %v6132_v19, %v6229_v32 }
 0x480   : > { %4475 = vrcp.f32 %v3291_v9 }
 0x481   : > { %3363 = vst.msk [vmem:[%s6017_s27 + $0x30] sm:$0xff] %vm3356_vm3, %v3344_v29  ;;  %4477 = vpow2.f32 %v3068_v1  ;;  %v3082_v24 = vmul.f32 1.442695, %v3048_v8 }
 0x485   : > { %v3265_v15 = vpop.permute.xlu2 %3264 }
 0x486   : > { %v4476_v16 = vpop.eup %4475  ;;  %v3301_v41 = vadd.f32 %v4474_v10, %v3265_v15 }
 0x487   : > { %v3345_v11 = vmul.f32 %v4476_v16, %v4470_v49  ;;  %3407 = vrot.lane.b32.xlu1 %v4476_v16, %s4604_s29  ;;  %v4478_v35 = vpop.eup %4477 }
 0x488   : > { %4479 = vrcp.f32 %v3301_v41 }
 0x489   : > { %3364 = vst.msk [vmem:[%s6017_s27 + $0x38] sm:$0xff] %vm3356_vm3, %v3345_v11  ;;  %4481 = vpow2.f32 %v3070_v52 }
 0x48d   : > { %v3249_v60 = vpop.permute.xlu0 %3248 }
 0x48e   : > { %v4480_v3 = vpop.eup %4479  ;;  %v3293_v48 = vadd.f32 %v4478_v35, %v3249_v60 }
 0x48f   : > { %v3355_v27 = vmul.f32 %v4480_v3, %v4474_v10  ;;  %3427 = vrot.lane.b32.xlu2 %v4480_v3, %s4604_s29  ;;  %v4482_v6 = vpop.eup %4481 }
 0x490   : > { %4483 = vrcp.f32 %v3293_v48 }
 0x491   : > { %3374 = vst.msk [vmem:[%s6017_s27 + $0x88] sm:$0xff] %vm3356_vm3, %v3355_v27 }
 0x494   : > { %v3398_v13 = vpop.permute.xlu2 %3397 }
 0x495   : > { %v3449_v22 = vmul.f32 %v6232_v46, %v3398_v13  ;;  %v3251_v61 = vpop.permute.xlu1 %3250 }
 0x496   : > { %v4484_v0 = vpop.eup %4483  ;;  %v3294_v18 = vadd.f32 %v4482_v6, %v3251_v61 }
 0x497   : > { %v3347_v37 = vmul.f32 %v4484_v0, %v4478_v35  ;;  %3468 = vst.msk [vmem:[%s6017_s27 + $0x10] sm:$0xff] %vm3465_vm4, %v3449_v22  ;;  %3411 = vrot.lane.b32.xlu0 %v4484_v0, %s4604_s29 }
 0x498   : > { %4485 = vrcp.f32 %v3294_v18 }
 0x499   : > { %3366 = vst.msk [vmem:[%s6017_s27 + $0x48] sm:$0xff] %vm3356_vm3, %v3347_v37  ;;  %4487 = vpow2.f32 %v3074_v4 }
 0x49a   : > { %4489 = vpow2.f32 %v3076_v40 }
 0x49c   : > { %v3404_v56 = vpop.permute.xlu2 %3403 }
 0x49d   : > { %v3452_v46 = vmul.f32 %v6240_v12, %v3404_v56 }
 0x49e   : > { %v4486_v55 = vpop.eup %4485 }
 0x49f   : > { %v3348_v62 = vmul.f32 %v4486_v55, %v4482_v6  ;;  %3471 = vst.msk [vmem:[%s6017_s27 + $0x28] sm:$0xff] %vm3465_vm4, %v3452_v46  ;;  %3413 = vrot.lane.b32.xlu1 %v4486_v55, %s4604_s29  ;;  %v4488_v31 = vpop.eup %4487 }
 0x4a0   : > { %v4490_v36 = vpop.eup %4489 }
 0x4a1   : > { %3367 = vst.msk [vmem:[%s6017_s27 + $0x50] sm:$0xff] %vm3356_vm3, %v3348_v62 }
 0x4a4   : > { %v3410_v45 = vpop.permute.xlu2 %3409 }
 0x4a5   : > { %v3455_v33 = vmul.f32 %v6249_v50, %v3410_v45  ;;  %v3255_v59 = vpop.permute.xlu0 %3254  ;;  %v3080_v50 = vmul.f32 1.442695, %v3047_v34 }
 0x4a6   : > { %v3296_v12 = vadd.f32 %v4488_v31, %v3255_v59 }
 0x4a7   : > { %3474 = vst.msk [vmem:[%s6017_s27 + $0x40] sm:$0xff] %vm3465_vm4, %v3455_v33 }
 0x4a8   : > { %4491 = vrcp.f32 %v3296_v12 }
 0x4ad   : > { %v3257_v20 = vpop.permute.xlu1 %3256 }
 0x4ae   : > { %v4492_v30 = vpop.eup %4491  ;;  %v3297_v54 = vadd.f32 %v4490_v36, %v3257_v20 }
 0x4af   : > { %v3350_v49 = vmul.f32 %v4492_v30, %v4488_v31  ;;  %3417 = vrot.lane.b32.xlu0 %v4492_v30, %s4604_s29 }
 0x4b0   : > { %4493 = vrcp.f32 %v3297_v54 }
 0x4b1   : > { %3369 = vst.msk [vmem:[%s6017_s27 + $0x60] sm:$0xff] %vm3356_vm3, %v3350_v49  ;;  %4495 = vpow2.f32 %v3080_v50 }
 0x4b2   : > { %4497 = vpow2.f32 %v3082_v24 }
 0x4b6   : > { %v4494_v51 = vpop.eup %4493 }
 0x4b7   : > { %v3351_v9 = vmul.f32 %v4494_v51, %v4490_v36  ;;  %3419 = vrot.lane.b32.xlu1 %v4494_v51, %s4604_s29  ;;  %v4496_v29 = vpop.eup %4495 }
 0x4b8   : > { %v4498_v19 = vpop.eup %4497 }
 0x4b9   : > { %3370 = vst.msk [vmem:[%s6017_s27 + $0x68] sm:$0xff] %vm3356_vm3, %v3351_v9  ;;  %v3416_v5 = vpop.permute.xlu2 %3415 }
 0x4ba   : > { %v3458_v28 = vmul.f32 %v6268_v21, %v3416_v5 }
 0x4bc   : > { %3477 = vst.msk [vmem:[%s6017_s27 + $0x58] sm:$0xff] %vm3465_vm4, %v3458_v28 }
 0x4bd   : > { %v3261_v1 = vpop.permute.xlu0 %3260 }
 0x4be   : > { %v3299_v10 = vadd.f32 %v4496_v29, %v3261_v1 }
 0x4c0   : > { %4499 = vrcp.f32 %v3299_v10 }
 0x4c5   : > { %v3263_v32 = vpop.permute.xlu1 %3262 }
 0x4c6   : > { %v4500_v15 = vpop.eup %4499  ;;  %v3300_v16 = vadd.f32 %v4498_v19, %v3263_v32 }
 0x4c7   : > { %v3353_v41 = vmul.f32 %v4500_v15, %v4496_v29  ;;  %3423 = vrot.lane.b32.xlu0 %v4500_v15, %s4604_s29 }
 0x4c8   : > { %4501 = vrcp.f32 %v3300_v16 }
 0x4c9   : > { %3372 = vst.msk [vmem:[%s6017_s27 + $0x78] sm:$0xff] %vm3356_vm3, %v3353_v41 }
 0x4cd   : > { %v3394_v21 = vpop.permute.xlu0 %3393 }
 0x4ce   : > { %v4502_v25 = vpop.eup %4501  ;;  %v3447_v11 = vmul.f32 %v6242_v2, %v3394_v21 }
 0x4cf   : > { %v3354_v52 = vmul.f32 %v4502_v25, %v4498_v19  ;;  %3425 = vrot.lane.b32.xlu1 %v4502_v25, %s4604_s29 }
 0x4d0   : > { %3466 = vst.msk [vmem:[%s6017_s27] sm:$0xff] %vm3465_vm4, %v3447_v11 }
 0x4d1   : > { %3373 = vst.msk [vmem:[%s6017_s27 + $0x80] sm:$0xff] %vm3356_vm3, %v3354_v52  ;;  %v3422_v35 = vpop.permute.xlu2 %3421 }
 0x4d2   : > { %v3461_v60 = vmul.f32 %v6283_v38, %v3422_v35 }
 0x4d4   : > { %3480 = vst.msk [vmem:[%s6017_s27 + $0x70] sm:$0xff] %vm3465_vm4, %v3461_v60 }
 0x4d5   : > { %v3396_v3 = vpop.permute.xlu1 %3395 }
 0x4d6   : > { %v3448_v48 = vmul.f32 %v6251_v7, %v3396_v3 }
 0x4d8   : > { %3467 = vst.msk [vmem:[%s6017_s27 + $0x8] sm:$0xff] %vm3465_vm4, %v3448_v48 }
 0x4d9   : > { %v3400_v2 = vpop.permute.xlu0 %3399 }
 0x4da   : > { %v3450_v27 = vmul.f32 %v6258_v57, %v3400_v2 }
 0x4dc   : > { %3469 = vst.msk [vmem:[%s6017_s27 + $0x18] sm:$0xff] %vm3465_vm4, %v3450_v27 }
 0x4e1   : > { %v3402_v13 = vpop.permute.xlu1 %3401 }
 0x4e2   : > { %v3451_v6 = vmul.f32 %v6263_v58, %v3402_v13 }
 0x4e4   : > { %3470 = vst.msk [vmem:[%s6017_s27 + $0x20] sm:$0xff] %vm3465_vm4, %v3451_v6 }
 0x4e9   : > { %v3428_v38 = vpop.permute.xlu2 %3427 }
 0x4ea   : > { %v3464_v22 = vmul.f32 %v6300_v17, %v3428_v38 }
 0x4ec   : > { %3483 = vst.msk [vmem:[%s6017_s27 + $0x88] sm:$0xff] %vm3465_vm4, %v3464_v22 }
 0x4f1   : > { %v3406_v7 = vpop.permute.xlu0 %3405 }
 0x4f2   : > { %v3453_v61 = vmul.f32 %v6273_v39, %v3406_v7 }
 0x4f4   : > { %3472 = vst.msk [vmem:[%s6017_s27 + $0x30] sm:$0xff] %vm3465_vm4, %v3453_v61 }
 0x4f9   : > { %v3408_v57 = vpop.permute.xlu1 %3407 }
 0x4fa   : > { %v3454_v58 = vmul.f32 %v6278_v43, %v3408_v57 }
 0x4fc   : > { %3473 = vst.msk [vmem:[%s6017_s27 + $0x38] sm:$0xff] %vm3465_vm4, %v3454_v58 }
 0x509   : > { %v3412_v0 = vpop.permute.xlu0 %3411 }
 0x50a   : > { %v3456_v18 = vmul.f32 %v6288_v26, %v3412_v0 }
 0x50c   : > { %3475 = vst.msk [vmem:[%s6017_s27 + $0x48] sm:$0xff] %vm3465_vm4, %v3456_v18 }
 0x511   : > { %v3414_v17 = vpop.permute.xlu1 %3413 }
 0x512   : > { %v3457_v53 = vmul.f32 %v6293_v47, %v3414_v17 }
 0x514   : > { %3476 = vst.msk [vmem:[%s6017_s27 + $0x50] sm:$0xff] %vm3465_vm4, %v3457_v53 }
 0x521   : > { %v3418_v39 = vpop.permute.xlu0 %3417 }
 0x522   : > { %v3459_v37 = vmul.f32 %v6307_v63, %v3418_v39 }
 0x524   : > { %3478 = vst.msk [vmem:[%s6017_s27 + $0x60] sm:$0xff] %vm3465_vm4, %v3459_v37 }
 0x529   : > { %v3420_v43 = vpop.permute.xlu1 %3419 }
 0x52a   : > { %v3460_v4 = vmul.f32 %v6313_v14, %v3420_v43 }
 0x52c   : > { %3479 = vst.msk [vmem:[%s6017_s27 + $0x68] sm:$0xff] %vm3465_vm4, %v3460_v4 }
 0x539   : > { %v3424_v26 = vpop.permute.xlu0 %3423 }
 0x53a   : > { %v3462_v47 = vmul.f32 %v6329_v44, %v3424_v26 }
 0x53c   : > { %3481 = vst.msk [vmem:[%s6017_s27 + $0x78] sm:$0xff] %vm3465_vm4, %v3462_v47 }
 0x541   : > { %v3426_v63 = vpop.permute.xlu1 %3425 }
 0x542   : > { %v3463_v14 = vmul.f32 %v6340_v23, %v3426_v63 }
 0x544   : > { %3482 = vst.msk [vmem:[%s6017_s27 + $0x80] sm:$0xff] %vm3465_vm4, %v3463_v14 }
 0x545   : > { %4531 = shalt.err (!%p4528_p6)
}
 0x546   : > { %s4605_s13 = smov 128   ;;  %s4606_s27 = smov 8  }
 0x547   : > { %4316 = dma.vmem_to_hbm [thread:$0]  (%p4688_p3), %s3500_s10, 2304, %s3502_s12, %s3485_s21, %s4605_s13, %s4605_s13, %s4606_s27  }
 0x548 PF: > { %p4322_p7 = scmp.ge.s32.totalorder %s4598_s25, 2  ;;  %s3516_s8 = sand.u32 1, %s4570_s18  }
 0x549   : > { %s3517_s14 = scalar_lea.sflag [#allocation3], %s3516_s8 }
 0x54a   : > { %p4319_p9 = pnand %p4322_p7, %p4697_p8 }
 0x54c   : > { %p4320_p10 = pneg %p4319_p9 }
 0x54e   : > { %4565 = dma.done.wait (%p4320_p10), %s3517_s14, 2304  }
 0x54f   : > { %4567 = vsyncadd (%p4320_p10), %s3517_s14, 4294964992  ;;  %s18_s25 = sadd.s32 1, %s4598_s25   ;;  %s6560_s6 = sld [smem:[#allocation5_spill]] }
 0x550   : > { %p15_p11 = scmp.ge.s32.totalorder %s18_s25, 6   ;;  %s6561_s18 = smov %s4574_s19 }
 0x551   : > { %s6562_s19 = smov %s4578_s20  ;;  %s6563_s20 = smov %s4706_s11 }
 0x552   : > { %s6564_s21 = smov %s4590_s23  ;;  %s6565_s22 = smov %s4594_s24 }
 0x553   : > { %s6566_s23 = smov %s6569_s28  ;;  %17 = sbr.rel (!%p15_p11) target bundleno = 7 (0x7), region = 84 }
 0x555   : > { %s6567_s24 = smov %s6560_s6 }
 0x558   :  { %3523 = vsyncpa [#allocation3], 1 }
 0x559   :  { %3525 = vsyncpa [#allocation3 + $0x1], 1 }

</bundles_post_ra>
